<compile_context>
chip_gen: v7x
topology: tpu7x:2x2x1
jax: 0.10.0
libtpu: 0.0.40
codegen_flags: <defaults>
</compile_context>

<pallas_src>
import functools

import jax
import jax.numpy as jnp
import numpy as np
from jax import lax
from jax.experimental import pallas as pl
from jax.experimental.pallas import tpu as pltpu

LEAKY_SLOPE = 0.01     # nn.LeakyReLU default
BN_EPS = 1e-5          # nn.BatchNorm2d default
LANE = 128
ROW_PITCH_ALIGN = 32   # padded row pitch multiple of 32 -> (R, Wp, C) <-> (R*Wp, C) reshape is layout-free


def _round_up(x, m):
    return (x + m - 1) // m * m


def _pick_row_tile(h, target):
    """Largest even divisor of h that is <= target (falls back to a whole-image tile)."""
    cands = [t for t in range(2, min(target, h) + 1, 2) if h % t == 0]
    return max(cands) if cands else h


def _vmem_limit_bytes():
    try:
        cap = pltpu.get_tpu_info().vmem_capacity_bytes
    except Exception:
        cap = 64 * 1024 * 1024
    return int(min(0.75 * cap, 96 * 1024 * 1024))


# ------------------------------ kernel ---------------------------------------

def _conv3x3_bn_lrelu(pflat, w_ref, shift, out_rows, wp):
    """3x3 'same' conv as 3 dy-grouped MXU matmuls (K = 3*Cin each) + shift + LeakyReLU.

    pflat: ((out_rows+2)*wp, cin) f32 flattened padded slab (row pitch wp). Output row r
           reads slab rows r..r+2. Columns {w, wp-1} (the only padding columns a kept
           output ever reads) must hold zeros.
    w_ref: (3, 3*cin, cout) bf16 ref, [dy, dx*cin + c, cout]; BN scale pre-folded.
    shift: (1, cout) f32 folded conv-bias + BN shift.
    Returns (out_rows*wp, cout) f32; padding columns of each output row hold garbage.
    """
    cin = pflat.shape[-1]
    rows = out_rows * wp
    acc = None
    for dy in range(3):
        # Row-slab slice: offset dy*wp is a multiple of 8 -> aligned, no relayout.
        slab = pflat[dy * wp: dy * wp + rows]
        pieces = []
        for dx in range(3):
            # dx shift via sublane roll (XLU slot); wrapped-in elements are zeros from the
            # padding columns or land in discarded output columns.
            amt = (1 - dx) % rows
            p = slab if amt == 0 else pltpu.roll(slab, amt, axis=0)
            pieces.append(p.astype(jnp.bfloat16))
        patch = jnp.concatenate(pieces, axis=-1)              # (rows, 3*cin) bf16
        part = jnp.dot(patch, w_ref[dy],                      # MXU, f32 accumulation
                       preferred_element_type=jnp.float32)
        acc = part if acc is None else acc + part
    y = acc + shift                                           # conv bias + BN (scale folded into W)
    return jnp.where(y > 0, y, LEAKY_SLOPE * y)               # LeakyReLU, f32 epilogue


def double_conv_kernel(xt_ref, xm_ref, xb_ref, w1_ref, t1_ref, w2_ref, t2_ref,
                       o_ref, xpad_ref, mid_ref):
    # xt/xb: (1, 2, W, Cin) halo rows above/below the tile; xm: (1, TR, W, Cin) tile rows.
    # o: (1, TR, W, C2p)
    # xpad: (TR+4, Wp, Cin) f32 scratch  (global rows i*TR-2 .. i*TR+TR+1, zeros off-image)
    # mid:  (TR+2, Wp, C1)  f32 scratch  (conv1 rows  i*TR-1 .. i*TR+TR,   zeros off-image)
    i = pl.program_id(1)
    last = pl.num_programs(1) - 1
    _, tr, w, cin = xm_ref.shape
    wp = xpad_ref.shape[1]
    c1 = mid_ref.shape[-1]

    # Padding columns w and wp-1 are the only pad columns a kept output reads; they are
    # never written below, but scratch starts uninitialized, so zero them (cheap, 4 thin
    # column stores) every step instead of a full-slab zero.
    xpad_ref[:, w:w + 1, :] = jnp.zeros((tr + 4, 1, cin), xpad_ref.dtype)
    xpad_ref[:, wp - 1:wp, :] = jnp.zeros((tr + 4, 1, cin), xpad_ref.dtype)
    mid_ref[:, w:w + 1, :] = jnp.zeros((tr + 2, 1, c1), mid_ref.dtype)
    mid_ref[:, wp - 1:wp, :] = jnp.zeros((tr + 2, 1, c1), mid_ref.dtype)

    # Tile rows -> xpad interior; halo rows -> real data or zeros at the image border.
    # TODO(synk): DMA the input straight into xpad (memory_space=pl.ANY + make_async_copy)
    #             to drop this extra VMEM staging block and the copy pass.
    xpad_ref[2:tr + 2, 0:w, :] = xm_ref[0].astype(xpad_ref.dtype)

    @pl.when(i > 0)
    def _():
        xpad_ref[0:2, 0:w, :] = xt_ref[0].astype(xpad_ref.dtype)

    @pl.when(i == 0)
    def _():
        xpad_ref[0:2, 0:w, :] = jnp.zeros((2, w, cin), xpad_ref.dtype)

    @pl.when(i < last)
    def _():
        xpad_ref[tr + 2:tr + 4, 0:w, :] = xb_ref[0].astype(xpad_ref.dtype)

    @pl.when(i == last)
    def _():
        xpad_ref[tr + 2:tr + 4, 0:w, :] = jnp.zeros((2, w, cin), xpad_ref.dtype)

    # ---- conv1 + BN + LeakyReLU over TR+2 rows (tile + 1-row halo each side); the
    #      conv1 activation stays in VMEM and never round-trips HBM ----
    pflat = xpad_ref[...].reshape((tr + 4) * wp, cin)
    y1 = _conv3x3_bn_lrelu(pflat, w1_ref, t1_ref[...], tr + 2, wp)
    mid_ref[:, 0:w, :] = y1.reshape(tr + 2, wp, c1)[:, :w, :]

    # conv2's zero padding above/below the image (conv1 of an off-image row is invalid).
    @pl.when(i == 0)
    def _():
        mid_ref[0:1, 0:w, :] = jnp.zeros((1, w, c1), mid_ref.dtype)

    @pl.when(i == last)
    def _():
        mid_ref[tr + 1:tr + 2, 0:w, :] = jnp.zeros((1, w, c1), mid_ref.dtype)

    # ---- conv2 + BN + LeakyReLU over the TR tile rows -> output block ----
    mflat = mid_ref[...].reshape((tr + 2) * wp, c1)
    y2 = _conv3x3_bn_lrelu(mflat, w2_ref, t2_ref[...], tr, wp)
    o_ref[0] = y2.reshape(tr, wp, -1)[:, :w, :].astype(o_ref.dtype)


# ------------------------------ wrapper ---------------------------------------

def fold_bn_im2col(w_hwio, b, gamma, beta, cout_pad):
    """Fold eval-mode BN (running mean=0, var=1) + conv bias into the weights/shift.

    Returns a (3, 3*Cin, cout_pad) bf16 tap-major weight tensor with the BN scale folded
    into its columns, and a (1, cout_pad) f32 shift (scale*bias + beta)."""
    kh, kw, cin, cout = w_hwio.shape
    scale = gamma / jnp.sqrt(1.0 + BN_EPS)                 # (Cout,)
    shift = scale * b + beta                               # (Cout,)
    w_mat = w_hwio.reshape(kh * kw * cin, cout) * scale[None, :]
    pad = cout_pad - cout
    if pad:
        w_mat = jnp.pad(w_mat, ((0, 0), (0, pad)))
        shift = jnp.pad(shift, (0, pad))
    return (w_mat.reshape(3, 3 * cin, cout_pad).astype(jnp.bfloat16),
            shift.reshape(1, cout_pad).astype(jnp.float32))


def double_conv_forward_nhwc(x_nhwc, params, *, row_tile=32):
    """Fused DoubleConv forward, NHWC in / NHWC out (preferred entry point)."""
    n, h, w, cin = x_nhwc.shape
    c1 = params["w1"].shape[-1]
    c2 = params["w2"].shape[-1]
    # Lane-dense output padding only when Cout is big enough to amortize the extra writes.
    c2p = _round_up(c2, LANE) if c2 >= 64 else c2
    wp = _round_up(w + 2, ROW_PITCH_ALIGN)    # padded row pitch inside the kernel
    tr = _pick_row_tile(h, row_tile)          # rows per tile (even divisor of H)
    ntiles = h // tr
    hblk = tr // 2                            # halo BlockSpecs use 2-row blocks
    nhblk = (h + 1) // 2

    w1, t1 = fold_bn_im2col(params["w1"], params["b1"], params["g1"], params["be1"], c1)
    w2, t2 = fold_bn_im2col(params["w2"], params["b2"], params["g2"], params["be2"], c2p)

    out = pl.pallas_call(
        double_conv_kernel,
        out_shape=jax.ShapeDtypeStruct((n, h, w, c2p), x_nhwc.dtype),
        grid_spec=pltpu.PrefetchScalarGridSpec(
            num_scalar_prefetch=0,
            grid=(n, ntiles),
            in_specs=[
                # 2-row halo above the tile (rows i*TR-2 .. i*TR-1; ignored when i == 0)
                pl.BlockSpec((1, 2, w, cin),
                             lambda b, i: (b, jnp.maximum(i * hblk - 1, 0), 0, 0)),
                # the TR tile rows
                pl.BlockSpec((1, tr, w, cin), lambda b, i: (b, i, 0, 0)),
                # 2-row halo below the tile (rows (i+1)*TR .. +1; ignored when i == last)
                pl.BlockSpec((1, 2, w, cin),
                             lambda b, i: (b, jnp.clip((i + 1) * hblk, 0, nhblk - 1), 0, 0)),
                pl.BlockSpec((3, 3 * cin, c1), lambda b, i: (0, 0, 0)),
                pl.BlockSpec((1, c1), lambda b, i: (0, 0)),
                pl.BlockSpec((3, 3 * c1, c2p), lambda b, i: (0, 0, 0)),
                pl.BlockSpec((1, c2p), lambda b, i: (0, 0)),
            ],
            out_specs=pl.BlockSpec((1, tr, w, c2p), lambda b, i: (b, i, 0, 0)),
            scratch_shapes=[
                pltpu.VMEM((tr + 4, wp, cin), jnp.float32),   # padded input rows
                pltpu.VMEM((tr + 2, wp, c1), jnp.float32),    # padded conv1 activation
            ],
        ),
        compiler_params=pltpu.CompilerParams(
            dimension_semantics=("parallel", "parallel"),     # batch x row-tiles (megacore)
            vmem_limit_bytes=_vmem_limit_bytes(),
        ),
    )(x_nhwc, x_nhwc, x_nhwc, w1, t1, w2, t2)

    if c2p != c2:
        out = out[..., :c2]                   # drop channel padding (only when padded)
    return out


def double_conv_forward(x_nchw, params, *, row_tile=32):
    """PyTorch-parity NCHW wrapper.
    TODO(synk): keep the surrounding model NHWC end-to-end; these two transposes are a
                full extra HBM read+write each around an otherwise single-pass kernel."""
    x_nhwc = jnp.transpose(x_nchw, (0, 2, 3, 1))
    out = double_conv_forward_nhwc(x_nhwc, params, row_tile=row_tile)
    return jnp.transpose(out, (0, 3, 1, 2))


# --------------------------- params & reference --------------------------------

def init_params(key, in_ch, out_ch):
    ks = jax.random.split(key, 8)

    def conv_init(kw, kb, cin, cout):
        bound = 1.0 / np.sqrt(cin * 9)               # PyTorch Conv2d default init range
        wgt = jax.random.uniform(kw, (3, 3, cin, cout), jnp.float32, -bound, bound)
        bia = jax.random.uniform(kb, (cout,), jnp.float32, -bound, bound)
        return wgt, bia

    w1, b1 = conv_init(ks[0], ks[1], in_ch, out_ch)
    w2, b2 = conv_init(ks[2], ks[3], out_ch, out_ch)
    g1 = 1.0 + 0.1 * jax.random.normal(ks[4], (out_ch,), jnp.float32)
    be1 = 0.1 * jax.random.normal(ks[5], (out_ch,), jnp.float32)
    g2 = 1.0 + 0.1 * jax.random.normal(ks[6], (out_ch,), jnp.float32)
    be2 = 0.1 * jax.random.normal(ks[7], (out_ch,), jnp.float32)
    return dict(w1=w1, b1=b1, g1=g1, be1=be1, w2=w2, b2=b2, g2=g2, be2=be2)


def ref_forward(x_nchw, params):
    # Pure-JAX f32 reference of the same (eval-mode-BN) DoubleConv forward, NCHW.
    def block(x, wgt, b, g, be):
        z = lax.conv_general_dilated(
            x, wgt, (1, 1), "SAME",
            dimension_numbers=("NCHW", "HWIO", "NCHW"),
            precision=lax.Precision.HIGHEST)
        z = z + b[None, :, None, None]
        z = g[None, :, None, None] * z / jnp.sqrt(1.0 + BN_EPS) + be[None, :, None, None]
        return jnp.where(z > 0, z, LEAKY_SLOPE * z)

    x = block(x_nchw, params["w1"], params["b1"], params["g1"], params["be1"])
    x = block(x, params["w2"], params["b2"], params["g2"], params["be2"])
    return x


if __name__ == "__main__":
    key = jax.random.PRNGKey(0)
    kx, kp = jax.random.split(key)
    in_ch, out_ch = 4, 8
    x = jax.random.normal(kx, (2, in_ch, 16, 16), jnp.float32)   # NCHW, like PyTorch
    params = init_params(kp, in_ch, out_ch)

    # row_tile=8 -> 2 row tiles per image, exercising the halo/tiling path.
    fwd = jax.jit(functools.partial(double_conv_forward, row_tile=8))
    out = jax.block_until_ready(fwd(x, params))
    assert out.shape == (2, out_ch, 16, 16), out.shape

    ref = ref_forward(x, params)
    # Tolerance reflects bf16 MXU operands (f32 accumulation) vs. the f32 reference.
    np.testing.assert_allclose(np.asarray(out), np.asarray(ref), atol=2e-2, rtol=2e-2)
    print("KERNEL_OK")
</pallas_src>

<mosaic_0001>
module attributes {stable_mosaic.version = 11 : i64} {
  func.func @double_conv_kernel(%arg0: i32, %arg1: i32, %arg2: memref<1x2x16x4xf32, #tpu.memory_space<vmem>>, %arg3: memref<1x8x16x4xf32, #tpu.memory_space<vmem>>, %arg4: memref<1x2x16x4xf32, #tpu.memory_space<vmem>>, %arg5: memref<3x12x8xbf16, #tpu.memory_space<vmem>>, %arg6: memref<1x8xf32, #tpu.memory_space<vmem>>, %arg7: memref<3x24x8xbf16, #tpu.memory_space<vmem>>, %arg8: memref<1x8xf32, #tpu.memory_space<vmem>>, %arg9: memref<1x8x16x8xf32, #tpu.memory_space<vmem>>, %arg10: memref<12x32x4xf32, #tpu.memory_space<vmem>>, %arg11: memref<10x32x8xf32, #tpu.memory_space<vmem>>) attributes {dimension_semantics = [#tpu.dimension_semantics<parallel>, #tpu.dimension_semantics<parallel>], iteration_bounds = array<i64: 2, 2>, scalar_prefetch = 0 : i64, scratch_operands = 2 : i64, tpu.core_type = #tpu.core_type<tc>, window_params = [{transform_indices = @transform_0, window_bounds = array<i64: 1, 2, 16, 4>}, {transform_indices = @transform_1, window_bounds = array<i64: 1, 8, 16, 4>}, {transform_indices = @transform_2, window_bounds = array<i64: 1, 2, 16, 4>}, {pipeline_mode = #tpu.pipeline_mode<synchronous>, transform_indices = @transform_3, window_bounds = array<i64: 3, 12, 8>}, {pipeline_mode = #tpu.pipeline_mode<synchronous>, transform_indices = @transform_4, window_bounds = array<i64: 1, 8>}, {pipeline_mode = #tpu.pipeline_mode<synchronous>, transform_indices = @transform_5, window_bounds = array<i64: 3, 24, 8>}, {pipeline_mode = #tpu.pipeline_mode<synchronous>, transform_indices = @transform_6, window_bounds = array<i64: 1, 8>}, {transform_indices = @transform_7, window_bounds = array<i64: 1, 8, 16, 8>}]} {
    %cst = arith.constant 0.000000e+00 : f32
    %0 = vector.broadcast %cst : f32 to vector<12x1x4xf32>
    %c0 = arith.constant 0 : index
    %c16 = arith.constant 16 : index
    %c0_0 = arith.constant 0 : index
    %1 = vector.load %arg10[%c0, %c16, %c0_0] : memref<12x32x4xf32, #tpu.memory_space<vmem>>, vector<12x1x4xf32>
    tpu.vector_store %arg10[%c0, %c16, %c0_0], %0 {strides = array<i32>} : memref<12x32x4xf32, #tpu.memory_space<vmem>>, vector<12x1x4xf32>,
    %cst_1 = arith.constant 0.000000e+00 : f32
    %2 = vector.broadcast %cst_1 : f32 to vector<12x1x4xf32>
    %c0_2 = arith.constant 0 : index
    %c31 = arith.constant 31 : index
    %c0_3 = arith.constant 0 : index
    %3 = vector.load %arg10[%c0_2, %c31, %c0_3] : memref<12x32x4xf32, #tpu.memory_space<vmem>>, vector<12x1x4xf32>
    tpu.vector_store %arg10[%c0_2, %c31, %c0_3], %2 {strides = array<i32>} : memref<12x32x4xf32, #tpu.memory_space<vmem>>, vector<12x1x4xf32>,
    %cst_4 = arith.constant 0.000000e+00 : f32
    %4 = vector.broadcast %cst_4 : f32 to vector<10x1x8xf32>
    %c0_5 = arith.constant 0 : index
    %c16_6 = arith.constant 16 : index
    %c0_7 = arith.constant 0 : index
    %5 = vector.load %arg11[%c0_5, %c16_6, %c0_7] : memref<10x32x8xf32, #tpu.memory_space<vmem>>, vector<10x1x8xf32>
    tpu.vector_store %arg11[%c0_5, %c16_6, %c0_7], %4 {strides = array<i32>} : memref<10x32x8xf32, #tpu.memory_space<vmem>>, vector<10x1x8xf32>,
    %cst_8 = arith.constant 0.000000e+00 : f32
    %6 = vector.broadcast %cst_8 : f32 to vector<10x1x8xf32>
    %c0_9 = arith.constant 0 : index
    %c31_10 = arith.constant 31 : index
    %c0_11 = arith.constant 0 : index
    %7 = vector.load %arg11[%c0_9, %c31_10, %c0_11] : memref<10x32x8xf32, #tpu.memory_space<vmem>>, vector<10x1x8xf32>
    tpu.vector_store %arg11[%c0_9, %c31_10, %c0_11], %6 {strides = array<i32>} : memref<10x32x8xf32, #tpu.memory_space<vmem>>, vector<10x1x8xf32>,
    %c0_12 = arith.constant 0 : index
    %c0_13 = arith.constant 0 : index
    %c0_14 = arith.constant 0 : index
    %c0_15 = arith.constant 0 : index
    %8 = vector.load %arg3[%c0_12, %c0_13, %c0_14, %c0_15] : memref<1x8x16x4xf32, #tpu.memory_space<vmem>>, vector<1x8x16x4xf32>
    %9 = vector.shape_cast %8 : vector<1x8x16x4xf32> to vector<8x16x4xf32>
    %c2 = arith.constant 2 : index
    %c0_16 = arith.constant 0 : index
    %c0_17 = arith.constant 0 : index
    %10 = vector.load %arg10[%c2, %c0_16, %c0_17] : memref<12x32x4xf32, #tpu.memory_space<vmem>>, vector<8x16x4xf32>
    tpu.vector_store %arg10[%c2, %c0_16, %c0_17], %9 {strides = array<i32>} : memref<12x32x4xf32, #tpu.memory_space<vmem>>, vector<8x16x4xf32>,
    %c0_i32 = arith.constant 0 : i32
    %11 = arith.cmpi sgt, %arg1, %c0_i32 : i32
    %12 = arith.extui %11 : i1 to i32
    %c0_i32_18 = arith.constant 0 : i32
    %13 = arith.cmpi ne, %12, %c0_i32_18 : i32
    scf.if %13 {
      %c0_82 = arith.constant 0 : index
      %c0_83 = arith.constant 0 : index
      %c0_84 = arith.constant 0 : index
      %c0_85 = arith.constant 0 : index
      %121 = vector.load %arg2[%c0_82, %c0_83, %c0_84, %c0_85] : memref<1x2x16x4xf32, #tpu.memory_space<vmem>>, vector<1x2x16x4xf32>
      %122 = vector.shape_cast %121 : vector<1x2x16x4xf32> to vector<2x16x4xf32>
      %c0_86 = arith.constant 0 : index
      %c0_87 = arith.constant 0 : index
      %c0_88 = arith.constant 0 : index
      %123 = vector.load %arg10[%c0_86, %c0_87, %c0_88] : memref<12x32x4xf32, #tpu.memory_space<vmem>>, vector<2x16x4xf32>
      tpu.vector_store %arg10[%c0_86, %c0_87, %c0_88], %122 {strides = array<i32>} : memref<12x32x4xf32, #tpu.memory_space<vmem>>, vector<2x16x4xf32>,
    } else {
    }
    %c0_i32_19 = arith.constant 0 : i32
    %14 = arith.cmpi eq, %arg1, %c0_i32_19 : i32
    %15 = arith.extui %14 : i1 to i32
    %c0_i32_20 = arith.constant 0 : i32
    %16 = arith.cmpi ne, %15, %c0_i32_20 : i32
    scf.if %16 {
      %cst_82 = arith.constant 0.000000e+00 : f32
      %121 = vector.broadcast %cst_82 : f32 to vector<2x16x4xf32>
      %c0_83 = arith.constant 0 : index
      %c0_84 = arith.constant 0 : index
      %c0_85 = arith.constant 0 : index
      %122 = vector.load %arg10[%c0_83, %c0_84, %c0_85] : memref<12x32x4xf32, #tpu.memory_space<vmem>>, vector<2x16x4xf32>
      tpu.vector_store %arg10[%c0_83, %c0_84, %c0_85], %121 {strides = array<i32>} : memref<12x32x4xf32, #tpu.memory_space<vmem>>, vector<2x16x4xf32>,
    } else {
    }
    %c1_i32 = arith.constant 1 : i32
    %17 = arith.cmpi slt, %arg1, %c1_i32 : i32
    %18 = arith.extui %17 : i1 to i32
    %c0_i32_21 = arith.constant 0 : i32
    %19 = arith.cmpi ne, %18, %c0_i32_21 : i32
    scf.if %19 {
      %c0_82 = arith.constant 0 : index
      %c0_83 = arith.constant 0 : index
      %c0_84 = arith.constant 0 : index
      %c0_85 = arith.constant 0 : index
      %121 = vector.load %arg4[%c0_82, %c0_83, %c0_84, %c0_85] : memref<1x2x16x4xf32, #tpu.memory_space<vmem>>, vector<1x2x16x4xf32>
      %122 = vector.shape_cast %121 : vector<1x2x16x4xf32> to vector<2x16x4xf32>
      %c10 = arith.constant 10 : index
      %c0_86 = arith.constant 0 : index
      %c0_87 = arith.constant 0 : index
      %123 = vector.load %arg10[%c10, %c0_86, %c0_87] : memref<12x32x4xf32, #tpu.memory_space<vmem>>, vector<2x16x4xf32>
      tpu.vector_store %arg10[%c10, %c0_86, %c0_87], %122 {strides = array<i32>} : memref<12x32x4xf32, #tpu.memory_space<vmem>>, vector<2x16x4xf32>,
    } else {
    }
    %c1_i32_22 = arith.constant 1 : i32
    %20 = arith.cmpi eq, %arg1, %c1_i32_22 : i32
    %21 = arith.extui %20 : i1 to i32
    %c0_i32_23 = arith.constant 0 : i32
    %22 = arith.cmpi ne, %21, %c0_i32_23 : i32
    scf.if %22 {
      %cst_82 = arith.constant 0.000000e+00 : f32
      %121 = vector.broadcast %cst_82 : f32 to vector<2x16x4xf32>
      %c10 = arith.constant 10 : index
      %c0_83 = arith.constant 0 : index
      %c0_84 = arith.constant 0 : index
      %122 = vector.load %arg10[%c10, %c0_83, %c0_84] : memref<12x32x4xf32, #tpu.memory_space<vmem>>, vector<2x16x4xf32>
      tpu.vector_store %arg10[%c10, %c0_83, %c0_84], %121 {strides = array<i32>} : memref<12x32x4xf32, #tpu.memory_space<vmem>>, vector<2x16x4xf32>,
    } else {
    }
    %c0_24 = arith.constant 0 : index
    %c0_25 = arith.constant 0 : index
    %c0_26 = arith.constant 0 : index
    %23 = vector.load %arg10[%c0_24, %c0_25, %c0_26] : memref<12x32x4xf32, #tpu.memory_space<vmem>>, vector<12x32x4xf32>
    %24 = vector.shape_cast %23 : vector<12x32x4xf32> to vector<384x4xf32>
    %c0_27 = arith.constant 0 : index
    %c0_28 = arith.constant 0 : index
    %25 = vector.load %arg6[%c0_27, %c0_28] : memref<1x8xf32, #tpu.memory_space<vmem>>, vector<1x8xf32>
    %26 = vector.extract_strided_slice %24 {offsets = [0, 0], sizes = [320, 4], strides = [1, 1]} : vector<384x4xf32> to vector<320x4xf32>
    %c1_i32_29 = arith.constant 1 : i32
    %27 = tpu.dynamic_rotate %26 by %c1_i32_29 dim 0 : vector<320x4xf32>, i32 -> vector<320x4xf32>
    %28 = arith.truncf %27 : vector<320x4xf32> to vector<320x4xbf16>
    %29 = arith.truncf %26 : vector<320x4xf32> to vector<320x4xbf16>
    %c319_i32 = arith.constant 319 : i32
    %30 = tpu.dynamic_rotate %26 by %c319_i32 dim 0 : vector<320x4xf32>, i32 -> vector<320x4xf32>
    %31 = arith.truncf %30 : vector<320x4xf32> to vector<320x4xbf16>
    %32 = tpu.concatenate %28, %29, %31 in 1 : vector<320x4xbf16>, vector<320x4xbf16>, vector<320x4xbf16> -> vector<320x12xbf16>
    %c0_30 = arith.constant 0 : index
    %c0_31 = arith.constant 0 : index
    %c0_32 = arith.constant 0 : index
    %33 = vector.load %arg5[%c0_30, %c0_31, %c0_32] : memref<3x12x8xbf16, #tpu.memory_space<vmem>>, vector<1x12x8xbf16>
    %34 = vector.shape_cast %33 : vector<1x12x8xbf16> to vector<12x8xbf16>
    %cst_33 = arith.constant dense<0.000000e+00> : vector<320x8xf32>
    %35 = tpu.matmul %32, %34, %cst_33 {dimension_numbers = #tpu.dot_dimension_numbers<[1], [0], [0], [1], [0, 0, 1, 1], [], []>} : vector<320x12xbf16>, vector<12x8xbf16>, vector<320x8xf32> -> vector<320x8xf32>
    %36 = vector.extract_strided_slice %24 {offsets = [32, 0], sizes = [320, 4], strides = [1, 1]} : vector<384x4xf32> to vector<320x4xf32>
    %c1_i32_34 = arith.constant 1 : i32
    %37 = tpu.dynamic_rotate %36 by %c1_i32_34 dim 0 : vector<320x4xf32>, i32 -> vector<320x4xf32>
    %38 = arith.truncf %37 : vector<320x4xf32> to vector<320x4xbf16>
    %39 = arith.truncf %36 : vector<320x4xf32> to vector<320x4xbf16>
    %c319_i32_35 = arith.constant 319 : i32
    %40 = tpu.dynamic_rotate %36 by %c319_i32_35 dim 0 : vector<320x4xf32>, i32 -> vector<320x4xf32>
    %41 = arith.truncf %40 : vector<320x4xf32> to vector<320x4xbf16>
    %42 = tpu.concatenate %38, %39, %41 in 1 : vector<320x4xbf16>, vector<320x4xbf16>, vector<320x4xbf16> -> vector<320x12xbf16>
    %c1 = arith.constant 1 : index
    %c0_36 = arith.constant 0 : index
    %c0_37 = arith.constant 0 : index
    %43 = vector.load %arg5[%c1, %c0_36, %c0_37] : memref<3x12x8xbf16, #tpu.memory_space<vmem>>, vector<1x12x8xbf16>
    %44 = vector.shape_cast %43 : vector<1x12x8xbf16> to vector<12x8xbf16>
    %cst_38 = arith.constant dense<0.000000e+00> : vector<320x8xf32>
    %45 = tpu.matmul %42, %44, %cst_38 {dimension_numbers = #tpu.dot_dimension_numbers<[1], [0], [0], [1], [0, 0, 1, 1], [], []>} : vector<320x12xbf16>, vector<12x8xbf16>, vector<320x8xf32> -> vector<320x8xf32>
    %46 = arith.addf %35, %45 : vector<320x8xf32>
    %47 = vector.extract_strided_slice %24 {offsets = [64, 0], sizes = [320, 4], strides = [1, 1]} : vector<384x4xf32> to vector<320x4xf32>
    %c1_i32_39 = arith.constant 1 : i32
    %48 = tpu.dynamic_rotate %47 by %c1_i32_39 dim 0 : vector<320x4xf32>, i32 -> vector<320x4xf32>
    %49 = arith.truncf %48 : vector<320x4xf32> to vector<320x4xbf16>
    %50 = arith.truncf %47 : vector<320x4xf32> to vector<320x4xbf16>
    %c319_i32_40 = arith.constant 319 : i32
    %51 = tpu.dynamic_rotate %47 by %c319_i32_40 dim 0 : vector<320x4xf32>, i32 -> vector<320x4xf32>
    %52 = arith.truncf %51 : vector<320x4xf32> to vector<320x4xbf16>
    %53 = tpu.concatenate %49, %50, %52 in 1 : vector<320x4xbf16>, vector<320x4xbf16>, vector<320x4xbf16> -> vector<320x12xbf16>
    %c2_41 = arith.constant 2 : index
    %c0_42 = arith.constant 0 : index
    %c0_43 = arith.constant 0 : index
    %54 = vector.load %arg5[%c2_41, %c0_42, %c0_43] : memref<3x12x8xbf16, #tpu.memory_space<vmem>>, vector<1x12x8xbf16>
    %55 = vector.shape_cast %54 : vector<1x12x8xbf16> to vector<12x8xbf16>
    %cst_44 = arith.constant dense<0.000000e+00> : vector<320x8xf32>
    %56 = tpu.matmul %53, %55, %cst_44 {dimension_numbers = #tpu.dot_dimension_numbers<[1], [0], [0], [1], [0, 0, 1, 1], [], []>} : vector<320x12xbf16>, vector<12x8xbf16>, vector<320x8xf32> -> vector<320x8xf32>
    %57 = arith.addf %46, %56 : vector<320x8xf32>
    %58 = vector.broadcast %25 : vector<1x8xf32> to vector<320x8xf32>
    %59 = arith.addf %57, %58 : vector<320x8xf32>
    %cst_45 = arith.constant 0.000000e+00 : f32
    %60 = vector.broadcast %cst_45 : f32 to vector<320x8xf32>
    %61 = arith.cmpf ogt, %59, %60 : vector<320x8xf32>
    %cst_46 = arith.constant 0.00999999977 : f32
    %62 = vector.broadcast %cst_46 : f32 to vector<320x8xf32>
    %63 = arith.mulf %62, %59 : vector<320x8xf32>
    %64 = arith.select %61, %59, %63 : vector<320x8xi1>, vector<320x8xf32>
    %65 = vector.shape_cast %64 : vector<320x8xf32> to vector<10x32x8xf32>
    %66 = vector.extract_strided_slice %65 {offsets = [0, 0, 0], sizes = [10, 16, 8], strides = [1, 1, 1]} : vector<10x32x8xf32> to vector<10x16x8xf32>
    %c0_47 = arith.constant 0 : index
    %c0_48 = arith.constant 0 : index
    %c0_49 = arith.constant 0 : index
    %67 = vector.load %arg11[%c0_47, %c0_48, %c0_49] : memref<10x32x8xf32, #tpu.memory_space<vmem>>, vector<10x16x8xf32>
    tpu.vector_store %arg11[%c0_47, %c0_48, %c0_49], %66 {strides = array<i32>} : memref<10x32x8xf32, #tpu.memory_space<vmem>>, vector<10x16x8xf32>,
    %c0_i32_50 = arith.constant 0 : i32
    %68 = arith.cmpi eq, %arg1, %c0_i32_50 : i32
    %69 = arith.extui %68 : i1 to i32
    %c0_i32_51 = arith.constant 0 : i32
    %70 = arith.cmpi ne, %69, %c0_i32_51 : i32
    scf.if %70 {
      %cst_82 = arith.constant 0.000000e+00 : f32
      %121 = vector.broadcast %cst_82 : f32 to vector<1x16x8xf32>
      %c0_83 = arith.constant 0 : index
      %c0_84 = arith.constant 0 : index
      %c0_85 = arith.constant 0 : index
      %122 = vector.load %arg11[%c0_83, %c0_84, %c0_85] : memref<10x32x8xf32, #tpu.memory_space<vmem>>, vector<1x16x8xf32>
      tpu.vector_store %arg11[%c0_83, %c0_84, %c0_85], %121 {strides = array<i32>} : memref<10x32x8xf32, #tpu.memory_space<vmem>>, vector<1x16x8xf32>,
    } else {
    }
    %c1_i32_52 = arith.constant 1 : i32
    %71 = arith.cmpi eq, %arg1, %c1_i32_52 : i32
    %72 = arith.extui %71 : i1 to i32
    %c0_i32_53 = arith.constant 0 : i32
    %73 = arith.cmpi ne, %72, %c0_i32_53 : i32
    scf.if %73 {
      %cst_82 = arith.constant 0.000000e+00 : f32
      %121 = vector.broadcast %cst_82 : f32 to vector<1x16x8xf32>
      %c9 = arith.constant 9 : index
      %c0_83 = arith.constant 0 : index
      %c0_84 = arith.constant 0 : index
      %122 = vector.load %arg11[%c9, %c0_83, %c0_84] : memref<10x32x8xf32, #tpu.memory_space<vmem>>, vector<1x16x8xf32>
      tpu.vector_store %arg11[%c9, %c0_83, %c0_84], %121 {strides = array<i32>} : memref<10x32x8xf32, #tpu.memory_space<vmem>>, vector<1x16x8xf32>,
    } else {
    }
    %c0_54 = arith.constant 0 : index
    %c0_55 = arith.constant 0 : index
    %c0_56 = arith.constant 0 : index
    %74 = vector.load %arg11[%c0_54, %c0_55, %c0_56] : memref<10x32x8xf32, #tpu.memory_space<vmem>>, vector<10x32x8xf32>
    %75 = vector.shape_cast %74 : vector<10x32x8xf32> to vector<320x8xf32>
    %c0_57 = arith.constant 0 : index
    %c0_58 = arith.constant 0 : index
    %76 = vector.load %arg8[%c0_57, %c0_58] : memref<1x8xf32, #tpu.memory_space<vmem>>, vector<1x8xf32>
    %77 = vector.extract_strided_slice %75 {offsets = [0, 0], sizes = [256, 8], strides = [1, 1]} : vector<320x8xf32> to vector<256x8xf32>
    %c1_i32_59 = arith.constant 1 : i32
    %78 = tpu.dynamic_rotate %77 by %c1_i32_59 dim 0 : vector<256x8xf32>, i32 -> vector<256x8xf32>
    %79 = arith.truncf %78 : vector<256x8xf32> to vector<256x8xbf16>
    %80 = arith.truncf %77 : vector<256x8xf32> to vector<256x8xbf16>
    %c255_i32 = arith.constant 255 : i32
    %81 = tpu.dynamic_rotate %77 by %c255_i32 dim 0 : vector<256x8xf32>, i32 -> vector<256x8xf32>
    %82 = arith.truncf %81 : vector<256x8xf32> to vector<256x8xbf16>
    %83 = tpu.concatenate %79, %80, %82 in 1 : vector<256x8xbf16>, vector<256x8xbf16>, vector<256x8xbf16> -> vector<256x24xbf16>
    %c0_60 = arith.constant 0 : index
    %c0_61 = arith.constant 0 : index
    %c0_62 = arith.constant 0 : index
    %84 = vector.load %arg7[%c0_60, %c0_61, %c0_62] : memref<3x24x8xbf16, #tpu.memory_space<vmem>>, vector<1x24x8xbf16>
    %85 = vector.shape_cast %84 : vector<1x24x8xbf16> to vector<24x8xbf16>
    %cst_63 = arith.constant dense<0.000000e+00> : vector<256x8xf32>
    %86 = tpu.matmul %83, %85, %cst_63 {dimension_numbers = #tpu.dot_dimension_numbers<[1], [0], [0], [1], [0, 0, 1, 1], [], []>} : vector<256x24xbf16>, vector<24x8xbf16>, vector<256x8xf32> -> vector<256x8xf32>
    %87 = vector.extract_strided_slice %75 {offsets = [32, 0], sizes = [256, 8], strides = [1, 1]} : vector<320x8xf32> to vector<256x8xf32>
    %c1_i32_64 = arith.constant 1 : i32
    %88 = tpu.dynamic_rotate %87 by %c1_i32_64 dim 0 : vector<256x8xf32>, i32 -> vector<256x8xf32>
    %89 = arith.truncf %88 : vector<256x8xf32> to vector<256x8xbf16>
    %90 = arith.truncf %87 : vector<256x8xf32> to vector<256x8xbf16>
    %c255_i32_65 = arith.constant 255 : i32
    %91 = tpu.dynamic_rotate %87 by %c255_i32_65 dim 0 : vector<256x8xf32>, i32 -> vector<256x8xf32>
    %92 = arith.truncf %91 : vector<256x8xf32> to vector<256x8xbf16>
    %93 = tpu.concatenate %89, %90, %92 in 1 : vector<256x8xbf16>, vector<256x8xbf16>, vector<256x8xbf16> -> vector<256x24xbf16>
    %c1_66 = arith.constant 1 : index
    %c0_67 = arith.constant 0 : index
    %c0_68 = arith.constant 0 : index
    %94 = vector.load %arg7[%c1_66, %c0_67, %c0_68] : memref<3x24x8xbf16, #tpu.memory_space<vmem>>, vector<1x24x8xbf16>
    %95 = vector.shape_cast %94 : vector<1x24x8xbf16> to vector<24x8xbf16>
    %cst_69 = arith.constant dense<0.000000e+00> : vector<256x8xf32>
    %96 = tpu.matmul %93, %95, %cst_69 {dimension_numbers = #tpu.dot_dimension_numbers<[1], [0], [0], [1], [0, 0, 1, 1], [], []>} : vector<256x24xbf16>, vector<24x8xbf16>, vector<256x8xf32> -> vector<256x8xf32>
    %97 = arith.addf %86, %96 : vector<256x8xf32>
    %98 = vector.extract_strided_slice %75 {offsets = [64, 0], sizes = [256, 8], strides = [1, 1]} : vector<320x8xf32> to vector<256x8xf32>
    %c1_i32_70 = arith.constant 1 : i32
    %99 = tpu.dynamic_rotate %98 by %c1_i32_70 dim 0 : vector<256x8xf32>, i32 -> vector<256x8xf32>
    %100 = arith.truncf %99 : vector<256x8xf32> to vector<256x8xbf16>
    %101 = arith.truncf %98 : vector<256x8xf32> to vector<256x8xbf16>
    %c255_i32_71 = arith.constant 255 : i32
    %102 = tpu.dynamic_rotate %98 by %c255_i32_71 dim 0 : vector<256x8xf32>, i32 -> vector<256x8xf32>
    %103 = arith.truncf %102 : vector<256x8xf32> to vector<256x8xbf16>
    %104 = tpu.concatenate %100, %101, %103 in 1 : vector<256x8xbf16>, vector<256x8xbf16>, vector<256x8xbf16> -> vector<256x24xbf16>
    %c2_72 = arith.constant 2 : index
    %c0_73 = arith.constant 0 : index
    %c0_74 = arith.constant 0 : index
    %105 = vector.load %arg7[%c2_72, %c0_73, %c0_74] : memref<3x24x8xbf16, #tpu.memory_space<vmem>>, vector<1x24x8xbf16>
    %106 = vector.shape_cast %105 : vector<1x24x8xbf16> to vector<24x8xbf16>
    %cst_75 = arith.constant dense<0.000000e+00> : vector<256x8xf32>
    %107 = tpu.matmul %104, %106, %cst_75 {dimension_numbers = #tpu.dot_dimension_numbers<[1], [0], [0], [1], [0, 0, 1, 1], [], []>} : vector<256x24xbf16>, vector<24x8xbf16>, vector<256x8xf32> -> vector<256x8xf32>
    %108 = arith.addf %97, %107 : vector<256x8xf32>
    %109 = vector.broadcast %76 : vector<1x8xf32> to vector<256x8xf32>
    %110 = arith.addf %108, %109 : vector<256x8xf32>
    %cst_76 = arith.constant 0.000000e+00 : f32
    %111 = vector.broadcast %cst_76 : f32 to vector<256x8xf32>
    %112 = arith.cmpf ogt, %110, %111 : vector<256x8xf32>
    %cst_77 = arith.constant 0.00999999977 : f32
    %113 = vector.broadcast %cst_77 : f32 to vector<256x8xf32>
    %114 = arith.mulf %113, %110 : vector<256x8xf32>
    %115 = arith.select %112, %110, %114 : vector<256x8xi1>, vector<256x8xf32>
    %116 = vector.shape_cast %115 : vector<256x8xf32> to vector<8x32x8xf32>
    %117 = vector.extract_strided_slice %116 {offsets = [0, 0, 0], sizes = [8, 16, 8], strides = [1, 1, 1]} : vector<8x32x8xf32> to vector<8x16x8xf32>
    %c0_78 = arith.constant 0 : index
    %c0_79 = arith.constant 0 : index
    %c0_80 = arith.constant 0 : index
    %c0_81 = arith.constant 0 : index
    %118 = vector.load %arg9[%c0_78, %c0_79, %c0_80, %c0_81] : memref<1x8x16x8xf32, #tpu.memory_space<vmem>>, vector<1x8x16x8xf32>
    %119 = vector.shape_cast %118 : vector<1x8x16x8xf32> to vector<8x16x8xf32>
    %120 = vector.shape_cast %117 : vector<8x16x8xf32> to vector<1x8x16x8xf32>
    tpu.vector_store %arg9[%c0_78, %c0_79, %c0_80, %c0_81], %120 {strides = array<i32>} : memref<1x8x16x8xf32, #tpu.memory_space<vmem>>, vector<1x8x16x8xf32>,
    return
  }
  func.func @transform_0(%arg0: i32, %arg1: i32) -> (i32, i32, i32, i32) {
    %c4_i32 = arith.constant 4 : i32
    %0 = arith.muli %arg1, %c4_i32 : i32
    %c1_i32 = arith.constant 1 : i32
    %1 = arith.subi %0, %c1_i32 : i32
    %c0_i32 = arith.constant 0 : i32
    %2 = arith.maxsi %1, %c0_i32 : i32
    %c0_i32_0 = arith.constant 0 : i32
    %c0_i32_1 = arith.constant 0 : i32
    %c0_i32_2 = arith.constant 0 : i32
    return %arg0, %2, %c0_i32_0, %c0_i32_1 : i32, i32, i32, i32
  }
  func.func @transform_1(%arg0: i32, %arg1: i32) -> (i32, i32, i32, i32) {
    %c0_i32 = arith.constant 0 : i32
    %c0_i32_0 = arith.constant 0 : i32
    %c0_i32_1 = arith.constant 0 : i32
    return %arg0, %arg1, %c0_i32, %c0_i32_0 : i32, i32, i32, i32
  }
  func.func @transform_2(%arg0: i32, %arg1: i32) -> (i32, i32, i32, i32) {
    %c1_i32 = arith.constant 1 : i32
    %0 = arith.addi %arg1, %c1_i32 : i32
    %c4_i32 = arith.constant 4 : i32
    %1 = arith.muli %0, %c4_i32 : i32
    %c0_i32 = arith.constant 0 : i32
    %c7_i32 = arith.constant 7 : i32
    %2 = arith.maxsi %c0_i32, %1 : i32
    %3 = arith.minsi %c7_i32, %2 : i32
    %c0_i32_0 = arith.constant 0 : i32
    %c0_i32_1 = arith.constant 0 : i32
    %c0_i32_2 = arith.constant 0 : i32
    return %arg0, %3, %c0_i32_0, %c0_i32_1 : i32, i32, i32, i32
  }
  func.func @transform_3(%arg0: i32, %arg1: i32) -> (i32, i32, i32) {
    %c0_i32 = arith.constant 0 : i32
    %c0_i32_0 = arith.constant 0 : i32
    %c0_i32_1 = arith.constant 0 : i32
    %c0_i32_2 = arith.constant 0 : i32
    return %c0_i32, %c0_i32_0, %c0_i32_1 : i32, i32, i32
  }
  func.func @transform_4(%arg0: i32, %arg1: i32) -> (i32, i32) {
    %c0_i32 = arith.constant 0 : i32
    %c0_i32_0 = arith.constant 0 : i32
    %c0_i32_1 = arith.constant 0 : i32
    return %c0_i32, %c0_i32_0 : i32, i32
  }
  func.func @transform_5(%arg0: i32, %arg1: i32) -> (i32, i32, i32) {
    %c0_i32 = arith.constant 0 : i32
    %c0_i32_0 = arith.constant 0 : i32
    %c0_i32_1 = arith.constant 0 : i32
    %c0_i32_2 = arith.constant 0 : i32
    return %c0_i32, %c0_i32_0, %c0_i32_1 : i32, i32, i32
  }
  func.func @transform_6(%arg0: i32, %arg1: i32) -> (i32, i32) {
    %c0_i32 = arith.constant 0 : i32
    %c0_i32_0 = arith.constant 0 : i32
    %c0_i32_1 = arith.constant 0 : i32
    return %c0_i32, %c0_i32_0 : i32, i32
  }
  func.func @transform_7(%arg0: i32, %arg1: i32) -> (i32, i32, i32, i32) {
    %c0_i32 = arith.constant 0 : i32
    %c0_i32_0 = arith.constant 0 : i32
    %c0_i32_1 = arith.constant 0 : i32
    return %arg0, %arg1, %c0_i32, %c0_i32_0 : i32, i32, i32, i32
  }
}

</mosaic_0001>

<bundles_post_ra>
// kernel: double_conv_forward.1
= control target key start
LH: loop header
LB: loop body
LE: loop exit
PB: predicated region body
PF: predicated region fallthrough
CT: control target
= control target key end

     0   :  { %s3926_s24 = smov 0   ;;  %s3928_s25 = smov 0   ;;  %s6363_s0 = inlined_call_operand.vmem [shape: f32[2,16,16,4], index: 0, kind: input, shape index: {}, may-alias: {0,1,2}]   ;;  %s6364_s1 = inlined_call_operand.vmem [shape: f32[2,16,16,4], index: 1, kind: input, shape index: {}, may-alias: {0,1,2}]   ;;  %s6365_s2 = inlined_call_operand.vmem [shape: f32[2,16,16,4], index: 2, kind: input, shape index: {}, may-alias: {0,1,2}]   ;;  %s6366_s3 = inlined_call_operand.vmem [shape: bf16[3,12,8], index: 3, kind: input, shape index: {}]   ;;  %s6367_s4 = inlined_call_operand.vmem [shape: f32[1,8], index: 4, kind: input, shape index: {}]   ;;  %s6368_s5 = inlined_call_operand.vmem [shape: bf16[3,24,8], index: 5, kind: input, shape index: {}]   ;;  %s6369_s6 = inlined_call_operand.vmem [shape: f32[1,8], index: 6, kind: input, shape index: {}]   ;;  %s6370_s7 = inlined_call_operand.vmem [shape: f32[2,16,16,8], index: 7, kind: output, shape index: {}]  }
   0x1   :  { %s3930_s26 = smov 0   ;;  %s3932_s27 = smov 0  }
   0x2   :  { %s3934_s28 = smov 0  }
   0x3 LB: > { %s26_s29 = sadd.s32 1, %s3868_s26  ;;  %s29_s30 = sadd.s32 1, %s3872_s27  ;;  %s3876_s28 = sphi %s3934_s28, %s17_s28   ;;  %s3872_s27 = sphi %s3932_s27, %s6558_s27   ;;  %s3868_s26 = sphi %s3930_s26, %s6557_s26   ;;  %s3864_s25 = sphi %s3928_s25, %s6556_s25   ;;  %s3860_s24 = sphi %s3926_s24, %s6555_s24  }
   0x4   : > { %p27_p0 = scmp.ge.s32.totalorder %s26_s29, 2  ;;  %p3247_p1 = scmp.ge.s32.totalorder %s3876_s28, 1 }
   0x5   : > { %p335_p2 = scmp.lt.s32.totalorder %s3876_s28, 5 }
   0x6   : > { %s6560_s29 = smov (%p27_p0, %s26_s29), 0  ;;  %s6562_s30 = smov (!%p27_p0, %s29_s30), %s3872_s27 }
   0x7   : > { %p336_p3 = pnand %p3247_p1, %p335_p2  ;;  %p31_p4 = scmp.ge.s32.totalorder %s6562_s30, 2 }
   0x9   : > { %s6564_s30 = smov (%p31_p4, %s6562_s30), 0  ;;  %339 = sbr.rel (%p336_p3) target bundleno = 1057 (0x421), region = 48 }
  0x10   : > { %vm472_vm0 = vcmask 24576   ;;  %vm497_vm1 = vcmask 57344   ;;  %s3248_s8 = sshll.u32 %s3860_s24, 2  ;;  %p412_p5 = scmp.lt.s32.totalorder %s3864_s25, 1  ;;  %v3878_v0 = vmov 0.0   ;;  %vm535_vm2 = vcmask 31744  }
  0x11   : > { %473 = vst.msk [vmem:[#allocation2 + $0x10] sm:$0x1] %vm472_vm0, %v3878_v0  ;;  %474 = vst.msk [vmem:[#allocation2 + $0x30] sm:$0x1] %vm472_vm0, %v3878_v0  ;;  %s3249_s9 = sadd.s32 4294967295, %s3248_s8  ;;  %s3254_s10 = sshll.u32 %s3860_s24, 3 }
  0x12   : > { %475 = vst.msk [vmem:[#allocation2 + $0x50] sm:$0x1] %vm472_vm0, %v3878_v0  ;;  %476 = vst.msk [vmem:[#allocation2 + $0x70] sm:$0x1] %vm472_vm0, %v3878_v0  ;;  %p409_p6 = scmp.gt.s32.totalorder %s3249_s9, 0  ;;  %p429_p7 = scmp.lt.s32.totalorder %s3254_s10, 15 }
  0x13   : > { %477 = vst.msk [vmem:[#allocation2 + $0x90] sm:$0x1] %vm472_vm0, %v3878_v0  ;;  %478 = vst.msk [vmem:[#allocation2 + $0xb0] sm:$0x1] %vm472_vm0, %v3878_v0  ;;  %s6566_s25 = smov (!%p412_p5, %s3864_s25), 1  ;;  %s4014_s11 = sadd.s32 4, %s3248_s8 }
  0x14   : > { %479 = vst.msk [vmem:[#allocation2 + $0xd0] sm:$0x1] %vm472_vm0, %v3878_v0  ;;  %480 = vst.msk [vmem:[#allocation2 + $0xf0] sm:$0x1] %vm472_vm0, %v3878_v0  ;;  %s6568_s9 = smov (!%p409_p6, %s3249_s9), 0  ;;  %s4016_s13 = sshll.u32 %s6566_s25, 5 }
  0x15   : > { %481 = vst.msk [vmem:[#allocation2 + $0x110] sm:$0x1] %vm472_vm0, %v3878_v0  ;;  %482 = vst.msk [vmem:[#allocation2 + $0x130] sm:$0x1] %vm472_vm0, %v3878_v0  ;;  %s3250_s12 = sshll.u32 %s6568_s9, 1  ;;  %p439_p9 = scmp.gt.s32.totalorder %s4014_s11, 0 }
  0x16   : > { %483 = vst.msk [vmem:[#allocation2 + $0x150] sm:$0x1] %vm472_vm0, %v3878_v0  ;;  %484 = vst.msk [vmem:[#allocation2 + $0x170] sm:$0x1] %vm472_vm0, %v3878_v0  ;;  %p414_p8 = scmp.lt.s32.totalorder %s3250_s12, 15  ;;  %s6570_s10 = smov (!%p429_p7, %s3254_s10), 15 }
  0x17   : > { %485 = vst.msk [vmem:[#allocation2 + $0x1f] sm:$0x1] %vm472_vm0, %v3878_v0  ;;  %486 = vst.msk [vmem:[#allocation2 + $0x3f] sm:$0x1] %vm472_vm0, %v3878_v0  ;;  %s3255_s14 = sshll.u32 %s6570_s10, 1  ;;  %p3259_p10 = scmp.lt.s32.totalorder %s4014_s11, 7 }
  0x18   : > { %487 = vst.msk [vmem:[#allocation2 + $0x5f] sm:$0x1] %vm472_vm0, %v3878_v0  ;;  %488 = vst.msk [vmem:[#allocation2 + $0x7f] sm:$0x1] %vm472_vm0, %v3878_v0  ;;  %s6572_s12 = smov (!%p414_p8, %s3250_s12), 15  ;;  %s433_s16 = sadd.s32 %s3255_s14, %s4016_s13 }
  0x19   : > { %489 = vst.msk [vmem:[#allocation2 + $0x9f] sm:$0x1] %vm472_vm0, %v3878_v0  ;;  %490 = vst.msk [vmem:[#allocation2 + $0xbf] sm:$0x1] %vm472_vm0, %v3878_v0  ;;  %s3251_s15 = sshll.u32 %s6572_s12, 1  ;;  %s3257_s18 = sshll.u32 %s433_s16, 3 }
  0x1a   : > { %491 = vst.msk [vmem:[#allocation2 + $0xdf] sm:$0x1] %vm472_vm0, %v3878_v0  ;;  %492 = vst.msk [vmem:[#allocation2 + $0xff] sm:$0x1] %vm472_vm0, %v3878_v0  ;;  %s418_s17 = sadd.s32 %s4016_s13, %s3251_s15  ;;  %s4025_s22 = scalar_lea.vmem %s6364_s1, %s3257_s18 }
  0x1b   : > { %493 = vst.msk [vmem:[#allocation2 + $0x11f] sm:$0x1] %vm472_vm0, %v3878_v0  ;;  %494 = vst.msk [vmem:[#allocation2 + $0x13f] sm:$0x1] %vm472_vm0, %v3878_v0  ;;  %s3253_s19 = sshll.u32 %s418_s17, 3  ;;  %s4035_s12 = scalar_lea.vmem %s6370_s7, %s3257_s18  ;;  %v518_v1 = vld [vmem:[%s4025_s22] sm:$0xff] }
  0x1c   : > { %495 = vst.msk [vmem:[#allocation2 + $0x15f] sm:$0x1] %vm472_vm0, %v3878_v0  ;;  %496 = vst.msk [vmem:[#allocation2 + $0x17f] sm:$0x1] %vm472_vm0, %v3878_v0  ;;  %s4030_s8 = scalar_lea.vmem %s6363_s0, %s3253_s19  ;;  %v519_v2 = vld [vmem:[%s4025_s22 + $0x8] sm:$0xff]  ;;  %v520_v3 = vld [vmem:[%s4025_s22 + $0x10] sm:$0xff] }
  0x1d   : > { %498 = vst.msk [vmem:[#allocation3 + $0x10] sm:$0x1] %vm497_vm1, %v3878_v0  ;;  %499 = vst.msk [vmem:[#allocation3 + $0x30] sm:$0x1] %vm497_vm1, %v3878_v0  ;;  %s440_s14 = scalar_select %p439_p9, %s4014_s11, 0  ;;  %v521_v4 = vld [vmem:[%s4025_s22 + $0x18] sm:$0xff] }
  0x1e   : > { %500 = vst.msk [vmem:[#allocation3 + $0x50] sm:$0x1] %vm497_vm1, %v3878_v0  ;;  %501 = vst.msk [vmem:[#allocation3 + $0x70] sm:$0x1] %vm497_vm1, %v3878_v0  ;;  %v522_v5 = vld [vmem:[%s4025_s22 + $0x20] sm:$0xff]  ;;  %v523_v6 = vld [vmem:[%s4025_s22 + $0x28] sm:$0xff] }
  0x1f   : > { %502 = vst.msk [vmem:[#allocation3 + $0x90] sm:$0x1] %vm497_vm1, %v3878_v0  ;;  %503 = vst.msk [vmem:[#allocation3 + $0xb0] sm:$0x1] %vm497_vm1, %v3878_v0  ;;  %v524_v7 = vld [vmem:[%s4025_s22 + $0x30] sm:$0xff]  ;;  %v525_v8 = vld [vmem:[%s4025_s22 + $0x38] sm:$0xff] }
  0x20   : > { %504 = vst.msk [vmem:[#allocation3 + $0xd0] sm:$0x1] %vm497_vm1, %v3878_v0  ;;  %505 = vst.msk [vmem:[#allocation3 + $0xf0] sm:$0x1] %vm497_vm1, %v3878_v0  ;;  %v526_v9 = vld [vmem:[%s4025_s22 + $0x40] sm:$0xff]  ;;  %s6574_s14 = smov (!%p3259_p10, %s440_s14), 7 }
  0x21   : > { %506 = vst.msk [vmem:[#allocation3 + $0x110] sm:$0x1] %vm497_vm1, %v3878_v0  ;;  %507 = vst.msk [vmem:[#allocation3 + $0x130] sm:$0x1] %vm497_vm1, %v3878_v0  ;;  %v527_v10 = vld [vmem:[%s4025_s22 + $0x48] sm:$0xff]  ;;  %v528_v11 = vld [vmem:[%s4025_s22 + $0x50] sm:$0xff] }
  0x22   : > { %508 = vst.msk [vmem:[#allocation3 + $0x1f] sm:$0x1] %vm497_vm1, %v3878_v0  ;;  %509 = vst.msk [vmem:[#allocation3 + $0x3f] sm:$0x1] %vm497_vm1, %v3878_v0  ;;  %v529_v12 = vld [vmem:[%s4025_s22 + $0x58] sm:$0xff]  ;;  %v530_v13 = vld [vmem:[%s4025_s22 + $0x60] sm:$0xff] }
  0x23   : > { %510 = vst.msk [vmem:[#allocation3 + $0x5f] sm:$0x1] %vm497_vm1, %v3878_v0  ;;  %511 = vst.msk [vmem:[#allocation3 + $0x7f] sm:$0x1] %vm497_vm1, %v3878_v0  ;;  %v531_v14 = vld [vmem:[%s4025_s22 + $0x68] sm:$0xff]  ;;  %v532_v15 = vld [vmem:[%s4025_s22 + $0x70] sm:$0xff] }
  0x24   : > { %512 = vst.msk [vmem:[#allocation3 + $0x9f] sm:$0x1] %vm497_vm1, %v3878_v0  ;;  %513 = vst.msk [vmem:[#allocation3 + $0xbf] sm:$0x1] %vm497_vm1, %v3878_v0  ;;  %s3264_s11 = sshll.u32 %s6574_s14, 1  ;;  %v533_v16 = vld [vmem:[%s4025_s22 + $0x78] sm:$0xff] }
  0x25   : > { %514 = vst.msk [vmem:[#allocation3 + $0xdf] sm:$0x1] %vm497_vm1, %v3878_v0  ;;  %515 = vst.msk [vmem:[#allocation3 + $0xff] sm:$0x1] %vm497_vm1, %v3878_v0  ;;  %p446_p11 = scmp.lt.s32.totalorder %s3264_s11, 15  ;;  %p3272_p12 = scmp.le.s32.totalorder %s3860_s24, 0 }
  0x26   : > { %516 = vst.msk [vmem:[#allocation3 + $0x11f] sm:$0x1] %vm497_vm1, %v3878_v0  ;;  %517 = vst.msk [vmem:[#allocation3 + $0x13f] sm:$0x1] %vm497_vm1, %v3878_v0  ;;  %v556_v17 = vld [vmem:[%s4030_s8] sm:$0xff] (!%p3272_p12)  ;;  %v557_v18 = vld [vmem:[%s4030_s8 + $0x8] sm:$0xff] (!%p3272_p12) }
  0x27   : > { %536 = vst.msk [vmem:[#allocation2 + $0x40] sm:$0xff] %vm535_vm2, %v518_v1  ;;  %537 = vst.msk [vmem:[#allocation2 + $0x48] sm:$0xff] %vm535_vm2, %v519_v2  ;;  %s6576_s11 = smov (!%p446_p11, %s3264_s11), 15  ;;  %v558_v19 = vld [vmem:[%s4030_s8 + $0x10] sm:$0xff] (!%p3272_p12)  ;;  %v559_v20 = vld [vmem:[%s4030_s8 + $0x18] sm:$0xff] (!%p3272_p12) }
  0x28   : > { %538 = vst.msk [vmem:[#allocation2 + $0x60] sm:$0xff] %vm535_vm2, %v520_v3  ;;  %539 = vst.msk [vmem:[#allocation2 + $0x68] sm:$0xff] %vm535_vm2, %v521_v4  ;;  %s3265_s15 = sshll.u32 %s6576_s11, 1  ;;  %555 = sbr.rel (%p3272_p12) target bundleno = 49 (0x31), region = 52 }
  0x29   : > { %540 = vst.msk [vmem:[#allocation2 + $0x80] sm:$0xff] %vm535_vm2, %v522_v5  ;;  %541 = vst.msk [vmem:[#allocation2 + $0x88] sm:$0xff] %vm535_vm2, %v523_v6  ;;  %s450_s16 = sadd.s32 %s3265_s15, %s4016_s13 }
  0x2a   : > { %542 = vst.msk [vmem:[#allocation2 + $0xa0] sm:$0xff] %vm535_vm2, %v524_v7  ;;  %543 = vst.msk [vmem:[#allocation2 + $0xa8] sm:$0xff] %vm535_vm2, %v525_v8  ;;  %s3267_s17 = sshll.u32 %s450_s16, 3 }
  0x2b   : > { %544 = vst.msk [vmem:[#allocation2 + $0xc0] sm:$0xff] %vm535_vm2, %v526_v9  ;;  %545 = vst.msk [vmem:[#allocation2 + $0xc8] sm:$0xff] %vm535_vm2, %v527_v10  ;;  %s452_s20 = scalar_lea.vmem %s6365_s2, %s3267_s17 }
  0x2c   : > { %546 = vst.msk [vmem:[#allocation2 + $0xe0] sm:$0xff] %vm535_vm2, %v528_v11  ;;  %547 = vst.msk [vmem:[#allocation2 + $0xe8] sm:$0xff] %vm535_vm2, %v529_v12 }
  0x2d   : > { %548 = vst.msk [vmem:[#allocation2 + $0x100] sm:$0xff] %vm535_vm2, %v530_v13  ;;  %549 = vst.msk [vmem:[#allocation2 + $0x108] sm:$0xff] %vm535_vm2, %v531_v14 }
  0x2e   : > { %550 = vst.msk [vmem:[#allocation2 + $0x120] sm:$0xff] %vm535_vm2, %v532_v15  ;;  %551 = vst.msk [vmem:[#allocation2 + $0x128] sm:$0xff] %vm535_vm2, %v533_v16 }
  0x2f   : > { %560 = vst.msk [vmem:[#allocation2] sm:$0xff] %vm535_vm2, %v556_v17  ;;  %561 = vst.msk [vmem:[#allocation2 + $0x8] sm:$0xff] %vm535_vm2, %v557_v18 }
  0x30   : > { %562 = vst.msk [vmem:[#allocation2 + $0x20] sm:$0xff] %vm535_vm2, %v558_v19  ;;  %563 = vst.msk [vmem:[#allocation2 + $0x28] sm:$0xff] %vm535_vm2, %v559_v20 }
  0x31 PF: > { %p3273_p13 = scmp.ne.s32.totalorder %s3860_s24, 0 }
  0x32   : > { %v3879_v21 = vmov (!%p3273_p13), 0.0  }
  0x33   : > { %567 = sbr.rel (%p3273_p13) target bundleno = 58 (0x3a), region = 56  ;;  %568 = vst.msk [vmem:[#allocation2] sm:$0xff] (!%p3273_p13), %vm535_vm2, %v3879_v21  ;;  %569 = vst.msk [vmem:[#allocation2 + $0x8] sm:$0xff] (!%p3273_p13), %vm535_vm2, %v3879_v21 }
  0x34   : > { %570 = vst.msk [vmem:[#allocation2 + $0x20] sm:$0xff] (!%p3273_p13), %vm535_vm2, %v3879_v21  ;;  %571 = vst.msk [vmem:[#allocation2 + $0x28] sm:$0xff] (!%p3273_p13), %vm535_vm2, %v3879_v21 }
  0x3a PF: > { %p3274_p0 = scmp.ge.s32.totalorder %s3860_s24, 1 }
  0x3b   : > { %v576_v22 = vld [vmem:[%s452_s20] sm:$0xff] (!%p3274_p0)  ;;  %v577_v23 = vld [vmem:[%s452_s20 + $0x8] sm:$0xff] (!%p3274_p0)  ;;  %v578_v24 = vld [vmem:[%s452_s20 + $0x10] sm:$0xff] (!%p3274_p0) }
  0x3c   : > { %575 = sbr.rel (%p3274_p0) target bundleno = 67 (0x43), region = 60  ;;  %581 = vst.msk [vmem:[#allocation2 + $0x140] sm:$0xff] (!%p3274_p0), %vm535_vm2, %v576_v22  ;;  %582 = vst.msk [vmem:[#allocation2 + $0x148] sm:$0xff] (!%p3274_p0), %vm535_vm2, %v577_v23  ;;  %v579_v25 = vld [vmem:[%s452_s20 + $0x18] sm:$0xff] (!%p3274_p0) }
  0x3d   : > { %583 = vst.msk [vmem:[#allocation2 + $0x160] sm:$0xff] (!%p3274_p0), %vm535_vm2, %v578_v24  ;;  %584 = vst.msk [vmem:[#allocation2 + $0x168] sm:$0xff] (!%p3274_p0), %vm535_vm2, %v579_v25 }
  0x43 PF: > { %p3275_p1 = scmp.ne.s32.totalorder %s3860_s24, 1 }
  0x44   : > { %v3880_v26 = vmov (!%p3275_p1), 0.0  }
  0x45   : > { %588 = sbr.rel (%p3275_p1) target bundleno = 76 (0x4c), region = 64  ;;  %590 = vst.msk [vmem:[#allocation2 + $0x140] sm:$0xff] (!%p3275_p1), %vm535_vm2, %v3880_v26  ;;  %591 = vst.msk [vmem:[#allocation2 + $0x148] sm:$0xff] (!%p3275_p1), %vm535_vm2, %v3880_v26 }
  0x46   : > { %592 = vst.msk [vmem:[#allocation2 + $0x160] sm:$0xff] (!%p3275_p1), %vm535_vm2, %v3880_v26  ;;  %593 = vst.msk [vmem:[#allocation2 + $0x168] sm:$0xff] (!%p3275_p1), %vm535_vm2, %v3880_v26 }
  0x4c PF: > { %v4106_v27 = vld [vmem:[#allocation2 + $0x20] sm:$0xff]  ;;  %v4108_v28 = vld [vmem:[#allocation2 + $0x28] sm:$0xff]  ;;  %v4110_v29 = vld [vmem:[#allocation2 + $0x50] sm:$0xff]  ;;  %v683_v30 = vlaneseq  ;;  %s3881_s13 = smov 4   ;;  %s3882_s21 = smov 8   ;;  %vm1195_vm5 = vcmask 1045504  }
  0x4d   : > { %v748_v31 = vpack.c.bf16 %v4108_v28, %v4106_v27  ;;  %v4114_v32 = vld [vmem:[#allocation2 + $0x58] sm:$0xff]  ;;  %v4116_v33 = vld [vmem:[#allocation2 + $0x30] sm:$0xff]  ;;  %v4122_v36 = vld [vmem:[#allocation2 + $0x40] sm:$0xff]  ;;  %v4127_v38 = vrot.slane %v4106_v27, 1  ;;  %v771_v39 = vrot.slane %v4108_v28, 1  ;;  %v776_v43 = vrot.slane %v4110_v29, 1 }
  0x4e   : > { %v4118_v34 = vld [vmem:[#allocation2 + $0x38] sm:$0xff]  ;;  %v751_v35 = vpack.c.bf16 %v4114_v32, %v4110_v29  ;;  %v4124_v37 = vld [vmem:[#allocation2 + $0x48] sm:$0xff]  ;;  %v772_v41 = vrot.slane %v4116_v33, 1  ;;  %v4134_v42 = vld [vmem:[#allocation2 + $0x60] sm:$0xff]  ;;  %v4139_v45 = vshrl.u32 %v683_v30, 7  ;;  %v4142_v46 = vrot.slane %v4122_v36, 1 }
  0x4f   : > { %891 = vrot.lane.b32.xlu0 %v748_v31, %s3881_s13  ;;  %v749_v40 = vpack.c.bf16 %v4118_v34, %v4116_v33  ;;  %v773_v44 = vrot.slane %v4118_v34, 1  ;;  %v775_v47 = vrot.slane %v4124_v37, 1  ;;  %v777_v48 = vrot.slane %v4114_v32, 1  ;;  %v4161_v55 = vld [vmem:[#allocation2 + $0x68] sm:$0xff]  ;;  %v4168_v59 = vld [vmem:[#allocation2 + $0x70] sm:$0xff]  ;;  %v4177_v1 = vld [vmem:[#allocation2 + $0x78] sm:$0xff] }
  0x50   : > { %897 = vrot.lane.b32.xlu1 %v751_v35, %s3881_s13  ;;  %vm806_vm3 = vcmp.lt.s32.totalorder %v4139_v45, 7  ;;  %v750_v49 = vpack.c.bf16 %v4124_v37, %v4122_v36  ;;  %v778_v50 = vrot.slane %v4134_v42, 1  ;;  %v779_v61 = vrot.slane %v4161_v55, 1  ;;  %v4180_v3 = vld [vmem:[#allocation2 + $0x80] sm:$0xff]  ;;  %v4185_v7 = vld [vmem:[#allocation2 + $0x88] sm:$0xff]  ;;  %v4187_v8 = vld [vmem:[#allocation2 + $0x90] sm:$0xff] }
  0x51   : > { %v840_v51 = vsel %vm806_vm3, %v771_v39, %v772_v41  ;;  %v841_v52 = vsel %vm806_vm3, %v4127_v38, %v771_v39  ;;  %v838_v53 = vsel %vm806_vm3, %v773_v44, %v4142_v46  ;;  %v839_v54 = vsel %vm806_vm3, %v772_v41, %v773_v44  ;;  %v4189_v9 = vld [vmem:[#allocation2 + $0x98] sm:$0xff]  ;;  %v4198_v13 = vld [vmem:[#allocation2 + $0xa0] sm:$0xff]  ;;  %v4200_v14 = vld [vmem:[#allocation2 + $0xa8] sm:$0xff] }
  0x52   : > { %v849_v56 = vpack.c.bf16 %v840_v51, %v841_v52  ;;  %v836_v57 = vsel %vm806_vm3, %v775_v47, %v776_v43  ;;  %v837_v58 = vsel %vm806_vm3, %v4142_v46, %v775_v47  ;;  %v850_v60 = vpack.c.bf16 %v838_v53, %v839_v54  ;;  %v4202_v15 = vld [vmem:[#allocation2 + $0xb0] sm:$0xff]  ;;  %v4207_v18 = vld [vmem:[#allocation2 + $0xb8] sm:$0xff]  ;;  %v4209_v19 = vld [vmem:[#allocation2 + $0xc0] sm:$0xff] }
  0x53   : > { %893 = vrot.lane.b32.xlu0 %v749_v40, %s3881_s13  ;;  %v851_v62 = vpack.c.bf16 %v836_v57, %v837_v58  ;;  %v834_v63 = vsel %vm806_vm3, %v777_v48, %v778_v50  ;;  %v835_v0 = vsel %vm806_vm3, %v776_v43, %v777_v48  ;;  %v780_v2 = vrot.slane %v4168_v59, 1  ;;  %v4235_v48 = vld [vmem:[#allocation2 + $0xc8] sm:$0xff]  ;;  %v4244_v52 = vld [vmem:[#allocation2 + $0xd0] sm:$0xff]  ;;  %v4248_v53 = vld [vmem:[#allocation2 + $0xe0] sm:$0xff] }
  0x54   : > { %951 = vrot.lane.b32.xlu1 %v849_v56, %s3882_s21  ;;  %v852_v4 = vpack.c.bf16 %v834_v63, %v835_v0  ;;  %v781_v5 = vrot.slane %v4177_v1, 1  ;;  %v782_v6 = vrot.slane %v4180_v3, 1  ;;  %v752_v10 = vpack.c.bf16 %v4161_v55, %v4134_v42  ;;  %v4363_v43 = vld [vmem:[#allocation2 + $0x18] sm:$0xff] }
  0x55   : > { %v832_v11 = vsel %vm806_vm3, %v779_v61, %v780_v2  ;;  %v833_v12 = vsel %vm806_vm3, %v778_v50, %v779_v61  ;;  %v753_v17 = vpack.c.bf16 %v4177_v1, %v4168_v59  ;;  %v783_v23 = vrot.slane %v4185_v7, 1  ;;  %v4263_v61 = vld [vmem:[#allocation2 + $0xf0] sm:$0xff]  ;;  %6415 = vst [vmem:[#allocation11_spill] sm:$0xff] %v4363_v43 }
  0x56   : > { %v853_v20 = vpack.c.bf16 %v832_v11, %v833_v12  ;;  %v830_v21 = vsel %vm806_vm3, %v781_v5, %v782_v6  ;;  %v831_v22 = vsel %vm806_vm3, %v780_v2, %v781_v5  ;;  %v784_v24 = vrot.slane %v4187_v8, 1  ;;  %v4283_v11 = vld [vmem:[#allocation2 + $0x150] sm:$0xff] }
  0x57   : > { %895 = vrot.lane.b32.xlu0 %v750_v49, %s3881_s13  ;;  %v785_v25 = vrot.slane %v4189_v9, 1  ;;  %v786_v26 = vrot.slane %v4198_v13, 1  ;;  %v787_v30 = vrot.slane %v4200_v14, 1  ;;  %v4223_v31 = vrot.slane %v4106_v27, 7 }
  0x58   : > { %953 = vrot.lane.b32.xlu1 %v850_v60, %s3882_s21  ;;  %v788_v35 = vrot.slane %v4202_v15, 1  ;;  %v789_v39 = vrot.slane %v4207_v18, 1  ;;  %v790_v40 = vrot.slane %v4209_v19, 1  ;;  %v4231_v44 = vrot.slane %v4122_v36, 7  ;;  %v4246_v36 = vld [vmem:[#allocation2 + $0xd8] sm:$0xff]  ;;  %v4261_v60 = vld [vmem:[#allocation2 + $0xe8] sm:$0xff] }
  0x59   : > { %v754_v47 = vpack.c.bf16 %v4185_v7, %v4180_v3  ;;  %v854_v27 = vpack.c.bf16 %v830_v21, %v831_v22  ;;  %v755_v49 = vpack.c.bf16 %v4189_v9, %v4187_v8  ;;  %v829_v50 = vsel %vm806_vm3, %v782_v6, %v783_v23  ;;  %v4287_v21 = vld [vmem:[#allocation2 + $0xf8] sm:$0xff] }
  0x5a   : > { %v828_v54 = vsel %vm806_vm3, %v783_v23, %v784_v24  ;;  %v826_v56 = vsel %vm806_vm3, %v785_v25, %v786_v26  ;;  %v827_v57 = vsel %vm806_vm3, %v784_v24, %v785_v25  ;;  %v4259_v58 = vsel %vm806_vm3, %v786_v26, %v787_v30  ;;  %v4328_v26 = vld [vmem:[#allocation2 + $0x110] sm:$0xff]  ;;  %v4339_v24 = vld [vmem:[#allocation2 + $0x118] sm:$0xff] }
  0x5b   : > { %955 = vrot.lane.b32.xlu0 %v851_v62, %s3882_s21  ;;  %v4267_v62 = vsel %vm806_vm3, %v787_v30, %v788_v35  ;;  %v4271_v63 = vsel %vm806_vm3, %v789_v39, %v790_v40  ;;  %v4275_v0 = vsel %vm806_vm3, %v788_v35, %v789_v39  ;;  %v791_v2 = vrot.slane %v4235_v48, 1  ;;  %v4299_v30 = vld [vmem:[#allocation2 + $0x158] sm:$0xff]  ;;  %6410 = vst [vmem:[#allocation6_spill] sm:$0xff] %v4328_v26 }
  0x5c   : > { %957 = vrot.lane.b32.xlu1 %v852_v4, %s3882_s21  ;;  %v792_v5 = vrot.slane %v4244_v52, 1  ;;  %v793_v6 = vrot.slane %v4246_v36, 1  ;;  %v855_v12 = vpack.c.bf16 %v828_v54, %v829_v50  ;;  %v796_v22 = vrot.slane %v4263_v61, 1  ;;  %6408 = vst [vmem:[#allocation4_spill] sm:$0xff] %v4299_v30  ;;  %6411 = vst [vmem:[#allocation7_spill] sm:$0xff] %v4339_v24 }
  0x5d   : > { %v4303_v35 = vsel %vm806_vm3, %v790_v40, %v791_v2  ;;  %v6371_v50 = vrot.slane %v4283_v11, 1  ;;  %v4313_v54 = vrot.slane %v4299_v30, 1  ;;  %v797_v39 = vrot.slane %v4287_v21, 1 }
  0x5e   : > { %v800_v16 = vrot.slane %v4328_v26, 1  ;;  %v801_v41 = vrot.slane %v4339_v24, 1  ;;  %v6417_v51 = vpack.c.bf16 %v4200_v14, %v4198_v13  ;;  %vm685_vm4 = vcmp.lt.s32.totalorder %v4139_v45, 1 }
  0x5f   : > { %899 = vrot.lane.b32.xlu0 %v752_v10, %s3881_s13  ;;  %v794_v10 = vrot.slane %v4248_v53, 1  ;;  %6409 = vst [vmem:[#allocation5_spill] sm:$0xff] %v4313_v54  ;;  %v4376_v23 = vsel %vm806_vm3, %v796_v22, %v797_v39  ;;  %v652_v4 = vrot.slane %v4124_v37, 7  ;;  %vm1047_vm6 = vcmask 64512  }
  0x60   : > { %901 = vrot.lane.b32.xlu1 %v753_v17, %s3881_s13  ;;  %v856_v17 = vpack.c.bf16 %v826_v56, %v827_v57  ;;  %v4317_v56 = vsel %vm806_vm3, %v791_v2, %v792_v5  ;;  %v4325_v57 = vsel %vm806_vm3, %v792_v5, %v793_v6  ;;  %v4346_v5 = vsel %vm806_vm3, %v6371_v50, %v4313_v54  ;;  %v4361_v50 = vld [vmem:[#allocation2 + $0x10] sm:$0xff] }
  0x61   : > { %v4321_v40 = vsel %vm806_vm3, %v793_v6, %v794_v10  ;;  %6412 = vst [vmem:[#allocation8_spill] sm:$0xff] %v4346_v5  ;;  %6414 = vst [vmem:[#allocation10_spill] sm:$0xff] %v4361_v50  ;;  %v4386_v6 = vld [vmem:[#allocation2 + $0x148] sm:$0xff]  ;;  %v4389_v5 = vrot.slane %v4299_v30, 7  ;;  %v4426_v37 = vsel %vm806_vm3, %v800_v16, %v801_v41  ;;  %vm1154_vm7 = vcmask 97280  }
  0x63   : > { %959 = vrot.lane.b32.xlu0 %v853_v20, %s3882_s21  ;;  %v795_v20 = vrot.slane %v4261_v60, 1  ;;  %6416 = vst [vmem:[#allocation12_spill] sm:$0xff] %v4389_v5  ;;  %v4457_v26 = vsel %vm685_vm4, %v4389_v5, %v4223_v31 }
  0x64   : > { %961 = vrot.lane.b32.xlu1 %v854_v27, %s3882_s21  ;;  %v4309_v27 = vld [vmem:[#allocation2 + $0x108] sm:$0xff] }
  0x65   : > { %v4333_v25 = vsel %vm806_vm3, %v795_v20, %v796_v22  ;;  %v4337_v2 = vsel %vm806_vm3, %v794_v10, %v795_v20  ;;  %v799_v20 = vrot.slane %v4309_v27, 1 }
  0x67   : > { %903 = vrot.lane.b32.xlu0 %v754_v47, %s3881_s13  ;;  %v4307_v47 = vld [vmem:[#allocation2 + $0x100] sm:$0xff]  ;;  %v4410_v22 = vsel %vm806_vm3, %v799_v20, %v800_v16 }
  0x68   : > { %905 = vrot.lane.b32.xlu1 %v755_v49, %s3881_s13  ;;  %v4352_v49 = vsel %vm806_vm3, %v4313_v54, %v4127_v38  ;;  %v798_v10 = vrot.slane %v4307_v47, 1  ;;  %v4381_v54 = vld [vmem:[#allocation2 + $0x120] sm:$0xff] }
  0x69   : > { %6413 = vst [vmem:[#allocation9_spill] sm:$0xff] %v4352_v49  ;;  %v769_v49 = vrot.slane %v4363_v43, 1 }
  0x6a   : > { %v4404_v24 = vsel %vm806_vm3, %v798_v10, %v799_v20  ;;  %v6423_v20 = vrot.slane %v4363_v43, 7  ;;  %v632_v43 = vld [vmem:[#allocation2 + $0x130] sm:$0xff] }
  0x6b   : > { %963 = vrot.lane.b32.xlu0 %v855_v12, %s3882_s21  ;;  %v4384_v12 = vld [vmem:[#allocation2 + $0x140] sm:$0xff] }
  0x6c   : > { %965 = vrot.lane.b32.xlu1 %v856_v17, %s3882_s21  ;;  %v4400_v17 = vsel %vm806_vm3, %v797_v39, %v798_v10  ;;  %v6419_v39 = vrot.slane %v4361_v50, 1  ;;  %v4451_v30 = vsel %vm685_vm4, %v6423_v20, %v4223_v31  ;;  %v6426_v20 = vpack.c.bf16 %v4267_v62, %v4259_v58 }
  0x6d   : > { %v6428_v58 = vrot.slane %v4381_v54, 1 }
  0x6e   : > { %v4422_v10 = vsel %vm806_vm3, %v6419_v39, %v769_v49  ;;  %v6422_v39 = vrot.slane %v4108_v28, 7 }
  0x6f   : > { %907 = vrot.lane.b32.xlu0 %v6417_v51, %s3881_s13  ;;  %v4416_v51 = vsel %vm806_vm3, %v769_v49, %v4127_v38  ;;  %6420 = vst [vmem:[#allocation14_spill] sm:$0xff] %v4422_v10  ;;  %v3829_v38 = vld [vmem:[%s6366_s3 + $0x8] sm:$0x3f]   ;;  %v6421_v49 = vpack.c.bf16 %v4207_v18, %v4202_v15  ;;  %v6425_v10 = vrot.slane %v4110_v29, 7  ;;  %v4491_v62 = vsel %vm806_vm3, %v801_v41, %v6428_v58 }
  0x70   : > { %6418 = vst [vmem:[#allocation13_spill] sm:$0xff] %v4416_v51  ;;  %v4444_v16 = vsel %vm685_vm4, %v4223_v31, %v6422_v39  ;;  %v4467_v51 = vld [vmem:[#allocation2 + $0x178] sm:$0xff]  ;;  %v650_v29 = vrot.slane %v4118_v34, 7  ;;  %3774 = vmatprep.subr.msk.bf16.mxu0 %vm1195_vm5, %v3829_v38  ;;  %v1197_v31 = vsel %vm1195_vm5, %v3829_v38, 0  ;;  %v4507_v41 = vsel %vm685_vm4, %v4231_v44, %v652_v4  ;;  %3775 = vmatprep.subr.msk.bf16.mxu1 %vm1195_vm5, %v3829_v38 }
  0x71   : > { %909 = vrot.lane.b32.xlu1 %v6421_v49, %s3881_s13  ;;  %v6424_v49 = vrot.slane %v4114_v32, 7  ;;  %v6427_v50 = vmov %v6425_v10  ;;  %v6389_v58 = vrot.slane %v4467_v51, 7  ;;  %3539 = vmatpush3.bf16.msra.mxu0 %v1197_v31  ;;  %v6431_v38 = vpack.c.bf16 %v4235_v48, %v4209_v19 }
  0x72   : > { %v4481_v5 = vsel %vm685_vm4, %v652_v4, %v6427_v50  ;;  %v6429_v50 = vrot.slane %v4108_v28, 7  ;;  %v6430_v28 = vpack.c.bf16 %v4271_v63, %v4275_v0  ;;  %v655_v4 = vrot.slane %v4134_v42, 7  ;;  %3773 = vmatpush3.bf16.msra.mxu1 %v1197_v31 }
  0x73   : > { %v4465_v39 = vsel %vm685_vm4, %v6425_v10, %v6424_v49  ;;  %967 = vrot.lane.b32.xlu0 %v6426_v20, %s3882_s21  ;;  %v649_v10 = vrot.slane %v4116_v33, 7  ;;  %v3830_v49 = vld [vmem:[%s6366_s3 + $0x10] sm:$0x3f]   ;;  %v656_v20 = vrot.slane %v4161_v55, 7  ;;  %v657_v42 = vrot.slane %v4168_v59, 7  ;;  %v631_v55 = vld [vmem:[#allocation2 + $0x128] sm:$0xff] }
  0x74   : > { %3777 = vmatprep.subr.msk.bf16.mxu0 %vm1195_vm5, %v3830_v49  ;;  %v4563_v0 = vsel %vm1195_vm5, %v3830_v49, 0  ;;  %v659_v63 = vrot.slane %v4180_v3, 7  ;;  %v660_v31 = vrot.slane %v4185_v7, 7  ;;  %v6434_v49 = vpack.c.bf16 %v4317_v56, %v4303_v35 }
  0x75   : > { %v4500_v33 = vsel %vm685_vm4, %v6429_v50, %v649_v10  ;;  %969 = vrot.lane.b32.xlu1 %v6430_v28, %s3882_s21  ;;  %v4517_v34 = vsel %vm685_vm4, %v649_v10, %v650_v29  ;;  %v4522_v50 = vsel %vm685_vm4, %v650_v29, %v4231_v44  ;;  %v4539_v10 = vsel %vm685_vm4, %v6389_v58, %v4231_v44 }
  0x76   : > { %v4547_v29 = vsel %vm685_vm4, %v655_v4, %v656_v20  ;;  %v6432_v28 = vrot.slane %v4114_v32, 7  ;;  %v658_v44 = vrot.slane %v4177_v1, 7  ;;  %v4560_v59 = vsel %vm685_vm4, %v656_v20, %v657_v42 }
  0x77   : > { %911 = vrot.lane.b32.xlu0 %v6431_v38, %s3881_s13  ;;  %v6433_v32 = vpack.c.bf16 %v4246_v36, %v4244_v52  ;;  %v662_v20 = vrot.slane %v4189_v9, 7  ;;  %v664_v7 = vrot.slane %v4200_v14, 7  ;;  %v665_v56 = vrot.slane %v4202_v15, 7 }
  0x78   : > { %v4553_v38 = vsel %vm685_vm4, %v6432_v28, %v655_v4  ;;  %v4572_v1 = vsel %vm685_vm4, %v657_v42, %v658_v44  ;;  %v661_v4 = vrot.slane %v4187_v8, 7  ;;  %v4585_v28 = vsel %vm685_vm4, %v658_v44, %v659_v63 }
  0x79   : > { %913 = vrot.lane.b32.xlu1 %v6433_v32, %s3881_s13  ;;  %v663_v42 = vrot.slane %v4198_v13, 7  ;;  %v4591_v8 = vsel %vm685_vm4, %v659_v63, %v660_v31  ;;  %v6435_v32 = vpack.c.bf16 %v4321_v40, %v4325_v57  ;;  %v862_v15 = vpack.c.bf16 %v4400_v17, %v4376_v23  ;;  %v4627_v13 = vld [vmem:[#allocation2 + $0x170] sm:$0xff] }
  0x7a   : > { %v4595_v9 = vsel %vm685_vm4, %v661_v4, %v662_v20  ;;  %v4599_v35 = vsel %vm685_vm4, %v660_v31, %v661_v4  ;;  %v666_v4 = vrot.slane %v4207_v18, 7  ;;  %v863_v40 = vpack.c.bf16 %v4410_v22, %v4404_v24 }
  0x7b   : > { %971 = vrot.lane.b32.xlu0 %v6434_v49, %s3882_s21  ;;  %v4608_v14 = vsel %vm685_vm4, %v663_v42, %v664_v7  ;;  %v4612_v63 = vsel %vm685_vm4, %v662_v20, %v663_v42  ;;  %v4625_v49 = vsel %vm685_vm4, %v664_v7, %v665_v56  ;;  %v6436_v20 = vpack.c.bf16 %v4261_v60, %v4248_v53 }
  0x7c   : > { %v667_v57 = vrot.slane %v4209_v19, 7  ;;  %v4642_v17 = vsel %vm685_vm4, %v665_v56, %v666_v4  ;;  %v668_v42 = vrot.slane %v4235_v48, 7  ;;  %v669_v7 = vrot.slane %v4244_v52, 7 }
  0x7d   : > { %973 = vrot.lane.b32.xlu1 %v6435_v32, %s3882_s21  ;;  %v670_v32 = vrot.slane %v4246_v36, 7  ;;  %v6437_v24 = vrot.slane %v4386_v6, 1  ;;  %v6438_v22 = vrot.slane %v4384_v12, 1  ;;  %v6390_v56 = vrot.slane %v4627_v13, 1 }
  0x7e   : > { %v4660_v48 = vsel %vm685_vm4, %v666_v4, %v667_v57  ;;  %v6439_v52 = vpack.c.bf16 %v4287_v21, %v4263_v61  ;;  %v6440_v36 = vrot.slane %v4283_v11, 1  ;;  %v4684_v19 = vsel %vm685_vm4, %v668_v42, %v669_v7 }
  0x7f   : > { %915 = vrot.lane.b32.xlu0 %v6436_v20, %s3881_s13  ;;  %v4653_v20 = vsel %vm806_vm3, %v6438_v22, %v6437_v24  ;;  %v6441_v31 = vmov %v6437_v24  ;;  %v4676_v22 = vsel %vm685_vm4, %v667_v57, %v668_v42  ;;  %v4680_v4 = vsel %vm685_vm4, %v669_v7, %v670_v32 }
  0x80   : > { %v4672_v24 = vsel %vm806_vm3, %v6441_v31, %v6440_v36  ;;  %v1578_v36 = vrot.slane %v4467_v51, 1  ;;  %v671_v44 = vrot.slane %v4248_v53, 7  ;;  %v672_v3 = vrot.slane %v4261_v60, 7 }
  0x81   : > { %917 = vrot.lane.b32.xlu1 %v6439_v52, %s3881_s13  ;;  %v6442_v52 = vpack.c.bf16 %v4333_v25, %v4337_v2  ;;  %v673_v42 = vrot.slane %v4263_v61, 7  ;;  %v674_v7 = vrot.slane %v4287_v21, 7  ;;  %v675_v58 = vrot.slane %v4307_v47, 7 }
  0x82   : > { %v4704_v25 = vsel %vm806_vm3, %v6390_v56, %v1578_v36  ;;  %v4709_v2 = vsel %vm806_vm3, %v1578_v36, %v4142_v46  ;;  %v4713_v53 = vsel %vm685_vm4, %v670_v32, %v671_v44  ;;  %v676_v60 = vrot.slane %v4309_v27, 7 }
  0x83   : > { %975 = vrot.lane.b32.xlu0 %v6442_v52, %s3882_s21  ;;  %v4721_v21 = vsel %vm685_vm4, %v671_v44, %v672_v3  ;;  %v4725_v52 = vsel %vm685_vm4, %v673_v42, %v674_v7  ;;  %v4729_v46 = vsel %vm685_vm4, %v672_v3, %v673_v42  ;;  %v6444_v32 = vpack.c.bf16 %v4309_v27, %v4307_v47  ;;  %v6447_v27 = vld [vmem:[#allocation6_spill] sm:$0xff] }
  0x84   : > { %6443 = vst [vmem:[#allocation15_spill] sm:$0xff] %v4729_v46  ;;  %v4743_v57 = vsel %vm685_vm4, %v675_v58, %v676_v60  ;;  %v4747_v3 = vsel %vm685_vm4, %v674_v7, %v675_v58  ;;  %v677_v42 = vrot.slane %v6447_v27, 7  ;;  %v1090_v44 = vrot.slane %v4384_v12, 7 }
  0x85   : > { %977 = vrot.lane.b32.xlu1 %v862_v15, %s3882_s21  ;;  %v4735_v15 = vld [vmem:[#allocation2 + $0x138] sm:$0xff]  ;;  %6445 = vst [vmem:[#allocation16_spill] sm:$0xff] %v4743_v57  ;;  %6446 = vst [vmem:[#allocation17_spill] sm:$0xff] %v4747_v3  ;;  %v1091_v61 = vrot.slane %v4386_v6, 7  ;;  %v1092_v56 = vrot.slane %v4283_v11, 7  ;;  %v679_v58 = vrot.slane %v4381_v54, 7 }
  0x86   : > { %v682_v36 = vrot.slane %v4735_v15, 7  ;;  %v4768_v18 = vsel %vm685_vm4, %v676_v60, %v677_v42  ;;  %v680_v23 = vrot.slane %v631_v55, 7  ;;  %v681_v3 = vrot.slane %v632_v43, 7  ;;  %v594_v57 = vld [vmem:[#allocation2] sm:$0xff] }
  0x87   : > { %919 = vrot.lane.b32.xlu0 %v6444_v32, %s3881_s13  ;;  %v6448_v32 = vld [vmem:[#allocation7_spill] sm:$0xff]  ;;  %v4775_v46 = vsel %vm685_vm4, %v1090_v44, %v1091_v61 }
  0x88   : > { %v678_v31 = vrot.slane %v6448_v32, 7  ;;  %v6449_v7 = vpack.c.bf16 %v6448_v32, %v6447_v27  ;;  %v4779_v27 = vsel %vm685_vm4, %v682_v36, %v1090_v44  ;;  %v6450_v32 = vld [vmem:[#allocation12_spill] sm:$0xff] }
  0x89   : > { %v4784_v60 = vsel %vm685_vm4, %v1092_v56, %v6450_v32 }
  0x8a   : > { %921 = vrot.lane.b32.xlu1 %v6449_v7, %s3881_s13  ;;  %v4764_v47 = vsel %vm685_vm4, %v677_v42, %v678_v31  ;;  %6451 = vst [vmem:[#allocation6_spill] sm:$0xff] %v4784_v60  ;;  %v4794_v7 = vsel %vm685_vm4, %v679_v58, %v680_v23  ;;  %v4798_v44 = vsel %vm685_vm4, %v678_v31, %v679_v58  ;;  %v6458_v31 = vld [vmem:[#allocation4_spill] sm:$0xff] }
  0x8b   : > { %979 = vrot.lane.b32.xlu0 %v863_v40, %s3882_s21  ;;  %v4790_v40 = vsel %vm685_vm4, %v1091_v61, %v1092_v56  ;;  %6453 = vst [vmem:[#allocation18_spill] sm:$0xff] %v4794_v7  ;;  %6454 = vst [vmem:[#allocation19_spill] sm:$0xff] %v4798_v44  ;;  %v4806_v42 = vsel %vm685_vm4, %v681_v3, %v682_v36  ;;  %v4810_v56 = vsel %vm685_vm4, %v680_v23, %v681_v3 }
  0x8c   : > { %6452 = vst [vmem:[#allocation7_spill] sm:$0xff] %v4790_v40  ;;  %6455 = vst [vmem:[#allocation20_spill] sm:$0xff] %v4806_v42  ;;  %v6457_v61 = vpack.c.bf16 %v4491_v62, %v4426_v37  ;;  %v1103_v58 = vpack.c.bf16 %v6458_v31, %v4283_v11  ;;  %v595_v40 = vld [vmem:[#allocation2 + $0x8] sm:$0xff]  ;;  %v6459_v44 = vpack.c.bf16 %v4386_v6, %v4384_v12  ;;  %v643_v7 = vrot.slane %v594_v57, 7  ;;  %v3831_v11 = vld [vmem:[%s6366_s3] sm:$0x3f]  }
  0x8d   : > { %6456 = vst [vmem:[#allocation21_spill] sm:$0xff] %v4810_v56  ;;  %v1114_v23 = vpack.c.bf16 %v4672_v24, %v4653_v20  ;;  %v644_v3 = vrot.slane %v595_v40, 7  ;;  %v803_v37 = vrot.slane %v631_v55, 1  ;;  %v804_v62 = vrot.slane %v632_v43, 1  ;;  %3776 = vmatprep.subr.msk.bf16.mxu1 %vm1195_vm5, %v3831_v11  ;;  %v6468_v24 = vld [vmem:[#allocation8_spill] sm:$0xff] }
  0x8e   : > { %981 = vrot.lane.b32.xlu1 %v6457_v61, %s3882_s21  ;;  %v6460_v61 = vld [vmem:[#allocation10_spill] sm:$0xff]  ;;  %v4836_v6 = vsel %vm685_vm4, %v682_v36, %v643_v7  ;;  %v764_v20 = vpack.c.bf16 %v631_v55, %v4381_v54  ;;  %v805_v36 = vrot.slane %v4735_v15, 1  ;;  %v4856_v55 = vsel %vm1195_vm5, %v3831_v11, 0 }
  0x8f   : > { %1118 = vrot.lane.b32.xlu0 %v6459_v44, %s3881_s13  ;;  %v645_v60 = vrot.slane %v6460_v61, 7  ;;  %v4832_v31 = vsel %vm685_vm4, %v643_v7, %v644_v3  ;;  %6461 = vst [vmem:[#allocation4_spill] sm:$0xff] %v4836_v6  ;;  %v6462_v44 = vld [vmem:[#allocation11_spill] sm:$0xff] }
  0x90   : > { %v6463_v32 = vrot.slane %v6462_v44, 7  ;;  %v807_v7 = vsel %vm806_vm3, %v804_v62, %v805_v36 }
  0x91   : > { %v4850_v42 = vsel %vm685_vm4, %v644_v3, %v645_v60  ;;  %v6467_v3 = vld [vmem:[#allocation9_spill] sm:$0xff] }
  0x92   : > { %1120 = vrot.lane.b32.xlu1 %v1103_v58, %s3881_s13  ;;  %v4846_v56 = vsel %vm685_vm4, %v645_v60, %v6463_v32  ;;  %6465 = vst [vmem:[#allocation11_spill] sm:$0xff] %v4850_v42  ;;  %v808_v32 = vsel %vm806_vm3, %v803_v37, %v804_v62  ;;  %v6466_v58 = vrot.slane %v4381_v54, 1  ;;  %v6469_v11 = vpack.c.bf16 %v6467_v3, %v6468_v24 }
  0x93   : > { %6464 = vst [vmem:[#allocation10_spill] sm:$0xff] %v4846_v56  ;;  %1127 = vrot.lane.b32.xlu0 %v1114_v23, %s3882_s21  ;;  %v765_v23 = vpack.c.bf16 %v4735_v15, %v632_v43  ;;  %v6470_v42 = vrot.slane %v4384_v12, 1  ;;  %v766_v56 = vrot.slane %v594_v57, 1  ;;  %v746_v15 = vpack.c.bf16 %v595_v40, %v594_v57 }
  0x94   : > { %v809_v60 = vsel %vm806_vm3, %v6466_v58, %v803_v37  ;;  %v767_v37 = vrot.slane %v595_v40, 1  ;;  %v4878_v58 = vld [vmem:[#allocation2 + $0x160] sm:$0xff]  ;;  %v4896_v40 = vld [vmem:[#allocation2 + $0x168] sm:$0xff] }
  0x95   : > { %v865_v6 = vpack.c.bf16 %v808_v32, %v809_v60  ;;  %v1111_v54 = vsel %vm806_vm3, %v805_v36, %v6470_v42  ;;  %v1575_v42 = vrot.slane %v4878_v58, 1  ;;  %v747_v32 = vpack.c.bf16 %v6462_v44, %v6460_v61  ;;  %v6473_v44 = vld [vmem:[#allocation13_spill] sm:$0xff] }
  0x96   : > { %923 = vrot.lane.b32.xlu1 %v764_v20, %s3881_s13  ;;  %v1113_v43 = vpack.c.bf16 %v1111_v54, %v807_v7  ;;  %v6471_v20 = vrot.slane %v6460_v61, 1  ;;  %v845_v12 = vsel %vm806_vm3, %v766_v56, %v767_v37  ;;  %v846_v3 = vsel %vm806_vm3, %v805_v36, %v766_v56 }
  0x97   : > { %1129 = vrot.lane.b32.xlu0 %v6469_v11, %s3882_s21  ;;  %v1576_v61 = vrot.slane %v4896_v40, 1  ;;  %v6474_v11 = vld [vmem:[#allocation14_spill] sm:$0xff]  ;;  %v1574_v36 = vpack.c.bf16 %v4467_v51, %v4627_v13 }
  0x98   : > { %v844_v62 = vsel %vm806_vm3, %v767_v37, %v6471_v20  ;;  %v6475_v54 = vpack.c.bf16 %v6473_v44, %v6474_v11  ;;  %v866_v37 = vpack.c.bf16 %v846_v3, %v807_v7  ;;  %v6477_v20 = vpack.c.bf16 %v4709_v2, %v4704_v25 }
  0x99   : > { %v847_v60 = vpack.c.bf16 %v844_v62, %v845_v12  ;;  %v1581_v56 = vsel %vm806_vm3, %v1575_v42, %v1576_v61  ;;  %v6478_v12 = vpack.c.bf16 %v4444_v16, %v4451_v30  ;;  %v6480_v30 = vpack.c.bf16 %v4507_v41, %v4539_v10 }
  0x9a   : > { %925 = vrot.lane.b32.xlu1 %v765_v23, %s3881_s13  ;;  %v6481_v44 = vpack.c.bf16 %v4517_v34, %v4500_v33  ;;  %v6482_v11 = vpack.c.bf16 %v4507_v41, %v4522_v50  ;;  %v6483_v50 = vpack.c.bf16 %v4465_v39, %v4481_v5 }
  0x9b   : > { %983 = vrot.lane.b32.xlu0 %v865_v6, %s3882_s21  ;;  %v6472_v6 = vld [vmem:[#allocation5_spill] sm:$0xff] }
  0x9c   : > { %v1582_v57 = vsel %vm806_vm3, %v6472_v6, %v1575_v42  ;;  %v6479_v6 = vpack.c.bf16 %v4444_v16, %v4457_v26 }
  0x9d   : > { %v1584_v23 = vpack.c.bf16 %v1582_v57, %v6468_v24 }
  0x9e   : > { %1125 = vrot.lane.b32.xlu1 %v1113_v43, %s3882_s21  ;;  %v1573_v43 = vpack.c.bf16 %v4896_v40, %v4878_v58 }
  0x9f   : > { %887 = vrot.lane.b32.xlu0 %v746_v15, %s3881_s13  ;;  %v6476_v15 = vrot.slane %v4627_v13, 1 }
  0xa1   : > { %v1580_v24 = vsel %vm806_vm3, %v1576_v61, %v6476_v15 }
  0xa2   : > { %889 = vrot.lane.b32.xlu1 %v747_v32, %s3881_s13  ;;  %v1585_v7 = vpack.c.bf16 %v1580_v24, %v1581_v56 }
  0xa3   : > { %947 = vrot.lane.b32.xlu0 %v847_v60, %s3882_s21 }
  0xa6   : > { %949 = vrot.lane.b32.xlu1 %v6475_v54, %s3882_s21 }
  0xa7   : > { %1596 = vrot.lane.b32.xlu0 %v1584_v23, %s3882_s21 }
  0xaa   : > { %985 = vrot.lane.b32.xlu1 %v866_v37, %s3882_s21 }
  0xab   : > { %1589 = vrot.lane.b32.xlu0 %v1573_v43, %s3881_s13 }
  0xae   : > { %1591 = vrot.lane.b32.xlu1 %v1574_v36, %s3881_s13  ;;  %v6484_v36 = vpack.c.bf16 %v4547_v29, %v4553_v38 }
  0xaf   : > { %1598 = vrot.lane.b32.xlu0 %v1585_v7, %s3882_s21 }
  0xb2   : > { %1600 = vrot.lane.b32.xlu1 %v6477_v20, %s3882_s21 }
  0xc1   : > { %v892_v62 = vpop.permute.xlu0 %891 }
  0xc2   : > { %v995_v42 = vsel %vm535_vm2, %v6478_v12, %v892_v62  ;;  %v898_v32 = vpop.permute.xlu1 %897  ;;  %v1132_v57 = vsel %vm535_vm2, %v6479_v6, %v892_v62  ;;  %v6485_v62 = vpack.c.bf16 %v4572_v1, %v4560_v59 }
  0xc3   : > { %v1004_v15 = vsel %vm535_vm2, %v6483_v50, %v898_v32  ;;  %v6492_v50 = vpack.c.bf16 %v4721_v21, %v4713_v53 }
  0xc5   : > { %v894_v60 = vpop.permute.xlu0 %893 }
  0xc6   : > { %v952_v23 = vpop.permute.xlu1 %951  ;;  %v998_v26 = vsel %vm535_vm2, %v6481_v44, %v894_v60  ;;  %v6489_v44 = vpack.c.bf16 %v4642_v17, %v4625_v49 }
  0xc7   : > { %v4936_v3 = vsel %vm1047_vm6, %v995_v42, %v952_v23  ;;  %v1139_v25 = vsel %vm1047_vm6, %v1132_v57, %v952_v23  ;;  %v6486_v42 = vpack.c.bf16 %v4591_v8, %v4585_v28  ;;  %v6487_v57 = vpack.c.bf16 %v4595_v9, %v4599_v35 }
  0xc8   : > { %3540 = vmatprep.mubr.msk.bf16.mxu0 %vm1154_vm7, %v1139_v25  ;;  %v6488_v25 = vpack.c.bf16 %v4608_v14, %v4612_v63 }
  0xc9   : > { %v896_v2 = vpop.permute.xlu0 %895 }
  0xca   : > { %v1603_v61 = vsel %vm535_vm2, %v6480_v30, %v896_v2  ;;  %v954_v16 = vpop.permute.xlu1 %953  ;;  %v1001_v54 = vsel %vm535_vm2, %v6482_v11, %v896_v2 }
  0xcb   : > { %v4953_v37 = vsel %vm1047_vm6, %v998_v26, %v954_v16  ;;  %v6490_v16 = vpack.c.bf16 %v4676_v22, %v4660_v48 }
  0xcc   : > { %3541 = vmatmul.mubr.msk.bf16.vlgmr.msra.gmra.mrb[0].mxu0 %vm1154_vm7, %v4953_v37 }
  0xcd   : > { %v956_v43 = vpop.permute.xlu0 %955  ;;  %3623 = vmatpush3.bf16.msra.mxu0 %v4563_v0 }
  0xce   : > { %v4958_v10 = vsel %vm1047_vm6, %v1001_v54, %v956_v43  ;;  %v4961_v33 = vsel %vm1047_vm6, %v1603_v61, %v956_v43  ;;  %v958_v41 = vpop.permute.xlu1 %957 }
  0xcf   : > { %3544 = vmatprep.mubr.msk.bf16.mxu0 %vm1154_vm7, %v4958_v10  ;;  %v4971_v56 = vsel %vm1047_vm6, %v1004_v15, %v958_v41  ;;  %v6491_v41 = vpack.c.bf16 %v4680_v4, %v4684_v19 }
  0xd1   : > { %v900_v34 = vpop.permute.xlu0 %899 }
  0xd2   : > { %v902_v24 = vpop.permute.xlu1 %901  ;;  %v1007_v7 = vsel %vm535_vm2, %v6484_v36, %v900_v34 }
  0xd3   : > { %v1010_v12 = vsel %vm535_vm2, %v6485_v62, %v902_v24  ;;  %v6496_v62 = vld [vmem:[#allocation17_spill] sm:$0xff] }
  0xd4   : > { %3545 = vmatmul.mubr.msk.bf16.gmra.mrb[4].mxu0 %vm1154_vm7, %v4971_v56 }
  0xd5   : > { %v960_v20 = vpop.permute.xlu0 %959 }
  0xd6   : > { %v4980_v0 = vsel %vm1047_vm6, %v1007_v7, %v960_v20  ;;  %v962_v5 = vpop.permute.xlu1 %961  ;;  %v6493_v7 = vld [vmem:[#allocation15_spill] sm:$0xff] }
  0xd7   : > { %3548 = vmatprep.mubr.msk.bf16.mxu0 %vm1154_vm7, %v4980_v0  ;;  %v4989_v38 = vsel %vm1047_vm6, %v1010_v12, %v962_v5  ;;  %v6494_v20 = vpack.c.bf16 %v4725_v52, %v6493_v7 }
  0xd9   : > { %v904_v39 = vpop.permute.xlu0 %903 }
  0xda   : > { %v906_v29 = vpop.permute.xlu1 %905  ;;  %v1013_v32 = vsel %vm535_vm2, %v6486_v42, %v904_v39  ;;  %v6495_v39 = vld [vmem:[#allocation16_spill] sm:$0xff] }
  0xdb   : > { %v1016_v23 = vsel %vm535_vm2, %v6487_v57, %v906_v29  ;;  %v6497_v12 = vpack.c.bf16 %v6495_v39, %v6496_v62  ;;  %v6511_v39 = vld [vmem:[#allocation10_spill] sm:$0xff]  ;;  %v6512_v62 = vld [vmem:[#allocation11_spill] sm:$0xff] }
  0xdc   : > { %3549 = vmatmul.mubr.msk.bf16.gmra.mrb[8].mxu0 %vm1154_vm7, %v4989_v38 }
  0xdd   : > { %v964_v60 = vpop.permute.xlu0 %963 }
  0xde   : > { %v4998_v6 = vsel %vm1047_vm6, %v1013_v32, %v964_v60  ;;  %v966_v59 = vpop.permute.xlu1 %965 }
  0xdf   : > { %3552 = vmatprep.mubr.msk.bf16.mxu0 %vm1154_vm7, %v4998_v6  ;;  %v5007_v8 = vsel %vm1047_vm6, %v1016_v23, %v966_v59  ;;  %v6498_v59 = vpack.c.bf16 %v4764_v47, %v4768_v18  ;;  %v6500_v47 = vld [vmem:[#allocation6_spill] sm:$0xff] }
  0xe1   : > { %v908_v1 = vpop.permute.xlu0 %907 }
  0xe2   : > { %v1019_v2 = vsel %vm535_vm2, %v6488_v25, %v908_v1 }
  0xe3   : > { %v910_v28 = vpop.permute.xlu1 %909 }
  0xe4   : > { %3553 = vmatmul.mubr.msk.bf16.gmra.mrb[12].mxu0 %vm1154_vm7, %v5007_v8  ;;  %v1022_v26 = vsel %vm535_vm2, %v6489_v44, %v910_v28  ;;  %v6499_v28 = vpack.c.bf16 %v4775_v46, %v4779_v27 }
  0xe5   : > { %v968_v30 = vpop.permute.xlu0 %967 }
  0xe6   : > { %v5016_v61 = vsel %vm1047_vm6, %v1019_v2, %v968_v30 }
  0xe7   : > { %3556 = vmatprep.mubr.msk.bf16.mxu0 %vm1154_vm7, %v5016_v61  ;;  %v970_v9 = vpop.permute.xlu1 %969 }
  0xe8   : > { %v5025_v63 = vsel %vm1047_vm6, %v1022_v26, %v970_v9  ;;  %v6501_v9 = vld [vmem:[#allocation7_spill] sm:$0xff] }
  0xe9   : > { %v912_v35 = vpop.permute.xlu0 %911 }
  0xea   : > { %v1025_v11 = vsel %vm535_vm2, %v6490_v16, %v912_v35  ;;  %v6502_v35 = vpack.c.bf16 %v6500_v47, %v6501_v9  ;;  %v6504_v16 = vld [vmem:[#allocation19_spill] sm:$0xff] }
  0xeb   : > { %v914_v14 = vpop.permute.xlu1 %913 }
  0xec   : > { %3557 = vmatmul.mubr.msk.bf16.gmra.mrb[16].mxu0 %vm1154_vm7, %v5025_v63  ;;  %v1028_v34 = vsel %vm535_vm2, %v6491_v41, %v914_v14  ;;  %v6503_v14 = vld [vmem:[#allocation18_spill] sm:$0xff]  ;;  %v6506_v41 = vld [vmem:[#allocation20_spill] sm:$0xff] }
  0xed   : > { %v972_v54 = vpop.permute.xlu0 %971 }
  0xee   : > { %v5034_v43 = vsel %vm1047_vm6, %v1025_v11, %v972_v54  ;;  %v6505_v11 = vpack.c.bf16 %v6503_v14, %v6504_v16 }
  0xef   : > { %3560 = vmatprep.mubr.msk.bf16.mxu0 %vm1154_vm7, %v5034_v43  ;;  %v974_v49 = vpop.permute.xlu1 %973 }
  0xf0   : > { %v5043_v22 = vsel %vm1047_vm6, %v1028_v34, %v974_v49  ;;  %v6507_v34 = vld [vmem:[#allocation21_spill] sm:$0xff] }
  0xf1   : > { %v916_v17 = vpop.permute.xlu0 %915 }
  0xf2   : > { %v1031_v15 = vsel %vm535_vm2, %v6492_v50, %v916_v17 }
  0xf3   : > { %v918_v48 = vpop.permute.xlu1 %917 }
  0xf4   : > { %3561 = vmatmul.mubr.msk.bf16.gmra.mrb[20].mxu0 %vm1154_vm7, %v5043_v22  ;;  %v1034_v5 = vsel %vm535_vm2, %v6494_v20, %v918_v48  ;;  %v6508_v48 = vpack.c.bf16 %v6506_v41, %v6507_v34 }
  0xf5   : > { %v976_v24 = vpop.permute.xlu0 %975 }
  0xf6   : > { %v5052_v36 = vsel %vm1047_vm6, %v1031_v15, %v976_v24 }
  0xf7   : > { %3564 = vmatprep.mubr.msk.bf16.mxu0 %vm1154_vm7, %v5052_v36  ;;  %v978_v19 = vpop.permute.xlu1 %977 }
  0xf8   : > { %v5061_v21 = vsel %vm1047_vm6, %v1034_v5, %v978_v19 }
  0xf9   : > { %v920_v4 = vpop.permute.xlu0 %919 }
  0xfa   : > { %v1037_v29 = vsel %vm535_vm2, %v6497_v12, %v920_v4  ;;  %v6509_v4 = vld [vmem:[#allocation4_spill] sm:$0xff]  ;;  %v6513_v12 = vpack.c.bf16 %v6511_v39, %v6512_v62 }
  0xfb   : > { %v6510_v7 = vpack.c.bf16 %v4832_v31, %v6509_v4  ;;  %v1561_v31 = vrot.slane %v4878_v58, 7  ;;  %v1563_v58 = vrot.slane %v4627_v13, 7 }
  0xfc   : > { %v922_v53 = vpop.permute.xlu1 %921  ;;  %3565 = vmatmul.mubr.msk.bf16.gmra.mrb[24].mxu0 %vm1154_vm7, %v5061_v21 }
  0xfd   : > { %v980_v42 = vpop.permute.xlu0 %979  ;;  %v1040_v1 = vsel %vm535_vm2, %v6498_v59, %v922_v53 }
  0xfe   : > { %v5070_v32 = vsel %vm1047_vm6, %v1037_v29, %v980_v42 }
  0xff   : > { %3568 = vmatprep.mubr.msk.bf16.mxu0 %vm1154_vm7, %v5070_v32 }
 0x100   : > { %v982_v52 = vpop.permute.xlu1 %981 }
 0x101   : > { %v1119_v60 = vpop.permute.xlu0 %1118  ;;  %v5079_v23 = vsel %vm1047_vm6, %v1040_v1, %v982_v52 }
 0x102   : > { %v1135_v25 = vsel %vm535_vm2, %v6499_v28, %v1119_v60 }
 0x104   : > { %v1121_v57 = vpop.permute.xlu1 %1120  ;;  %3569 = vmatmul.mubr.msk.bf16.gmra.mrb[28].mxu0 %vm1154_vm7, %v5079_v23 }
 0x105   : > { %v1128_v2 = vpop.permute.xlu0 %1127  ;;  %v5096_v44 = vsel %vm535_vm2, %v6502_v35, %v1121_v57 }
 0x106   : > { %v5088_v30 = vsel %vm1047_vm6, %v1135_v25, %v1128_v2 }
 0x107   : > { %3576 = vmatprep.mubr.msk.bf16.mxu1 %vm1154_vm7, %v5088_v30 }
 0x108   : > { %v924_v18 = vpop.permute.xlu1 %923 }
 0x109   : > { %v1130_v46 = vpop.permute.xlu0 %1129  ;;  %v1043_v54 = vsel %vm535_vm2, %v6505_v11, %v924_v18 }
 0x10a   : > { %v1145_v27 = vsel %vm1047_vm6, %v5096_v44, %v1130_v46 }
 0x10b   : > { %3577 = vmatmul.mubr.msk.bf16.vlgmr.msra.gmra.mrb[0].mxu1 %vm1154_vm7, %v1145_v27 }
 0x10c   : > { %v926_v26 = vpop.permute.xlu1 %925  ;;  %3581 = vmatpush3.bf16.msra.mxu1 %v4856_v55 }
 0x10d   : > { %v984_v49 = vpop.permute.xlu0 %983  ;;  %v5115_v50 = vsel %vm535_vm2, %v6508_v48, %v926_v26 }
 0x10e   : > { %v5107_v17 = vsel %vm1047_vm6, %v1043_v54, %v984_v49 }
 0x10f   : > { %3572 = vmatprep.mubr.msk.bf16.mxu0 %vm1154_vm7, %v5107_v17 }
 0x110   : > { %v1126_v15 = vpop.permute.xlu1 %1125 }
 0x111   : > { %v1141_v55 = vsel %vm1047_vm6, %v5115_v50, %v1126_v15  ;;  %v888_v24 = vpop.permute.xlu0 %887 }
 0x112   : > { %3573 = vmatmul.mubr.msk.bf16.gmra.mrb[32].mxu0 %vm1154_vm7, %v1141_v55  ;;  %v989_v20 = vsel %vm535_vm2, %v6510_v7, %v888_v24 }
 0x113   : > { %3624 = vmatprep.mubr.msk.bf16.mxu0 %vm1154_vm7, %v4961_v33  ;;  %v6514_v33 = vld [vmem:[#allocation12_spill] sm:$0xff] }
 0x114   : > { %v890_v19 = vpop.permute.xlu1 %889 }
 0x115   : > { %v948_v5 = vpop.permute.xlu0 %947  ;;  %v992_v29 = vsel %vm535_vm2, %v6513_v12, %v890_v19 }
 0x116   : > { %v1049_v53 = vsel %vm1047_vm6, %v989_v20, %v948_v5 }
 0x117   : > { %3582 = vmatprep.mubr.msk.bf16.mxu1 %vm1154_vm7, %v1049_v53 }
 0x118   : > { %v950_v42 = vpop.permute.xlu1 %949 }
 0x119   : > { %v1051_v52 = vsel %vm1047_vm6, %v992_v29, %v950_v42 }
 0x11a   : > { %3583 = vmatmul.mubr.msk.bf16.vlgmr.msra.gmra.mrb[4].mxu1 %vm1154_vm7, %v1051_v52  ;;  %3625 = vmatmul.mubr.msk.bf16.vlgmr.msra.gmra.mrb[36].mxu0 %vm1154_vm7, %v4971_v56 }
 0x11b   : > { %3628 = vmatprep.mubr.msk.bf16.mxu0 %vm1154_vm7, %v4980_v0  ;;  %3586 = vmatprep.mubr.msk.bf16.mxu1 %vm1154_vm7, %v4936_v3  ;;  %v1562_v3 = vrot.slane %v4896_v40, 7 }
 0x11d   : > { %v1566_v13 = vsel %vm685_vm4, %v1562_v3, %v1563_v58 }
 0x122   : > { %3587 = vmatmul.mubr.msk.bf16.gmra.mrb[8].mxu1 %vm1154_vm7, %v4953_v37  ;;  %3629 = vmatmul.mubr.msk.bf16.gmra.mrb[40].mxu0 %vm1154_vm7, %v4989_v38  ;;  %v1597_v37 = vpop.permute.xlu0 %1596 }
 0x123   : > { %3590 = vmatprep.mubr.msk.bf16.mxu1 %vm1154_vm7, %v4958_v10  ;;  %3632 = vmatprep.mubr.msk.bf16.mxu0 %vm1154_vm7, %v4998_v6  ;;  %v1567_v10 = vsel %vm685_vm4, %v1561_v31, %v1562_v3 }
 0x12a   : > { %3591 = vmatmul.mubr.msk.bf16.gmra.mrb[12].mxu1 %vm1154_vm7, %v4971_v56  ;;  %3633 = vmatmul.mubr.msk.bf16.gmra.mrb[44].mxu0 %vm1154_vm7, %v5007_v8  ;;  %v1568_v56 = vsel %vm685_vm4, %v6514_v33, %v1561_v31 }
 0x12b   : > { %3594 = vmatprep.mubr.msk.bf16.mxu1 %vm1154_vm7, %v4980_v0  ;;  %3636 = vmatprep.mubr.msk.bf16.mxu0 %vm1154_vm7, %v5016_v61  ;;  %v1590_v0 = vpop.permute.xlu0 %1589 }
 0x132   : > { %3595 = vmatmul.mubr.msk.bf16.gmra.mrb[16].mxu1 %vm1154_vm7, %v4989_v38  ;;  %3637 = vmatmul.mubr.msk.bf16.gmra.mrb[48].mxu0 %vm1154_vm7, %v5025_v63  ;;  %v1571_v38 = vpack.c.bf16 %v1567_v10, %v1568_v56 }
 0x133   : > { %3598 = vmatprep.mubr.msk.bf16.mxu1 %vm1154_vm7, %v4998_v6  ;;  %3640 = vmatprep.mubr.msk.bf16.mxu0 %vm1154_vm7, %v5034_v43  ;;  %v986_v6 = vpop.permute.xlu1 %985 }
 0x134   : > { %v1606_v40 = vsel %vm535_vm2, %v1571_v38, %v1590_v0  ;;  %v1087_v59 = vsel %vm1047_vm6, %v5115_v50, %v986_v6  ;;  %v5262_v38 = vld [vmem:[%s6367_s4] ss:$0 sm:$0xff] }
 0x13a   : > { %3599 = vmatmul.mubr.msk.bf16.gmra.mrb[20].mxu1 %vm1154_vm7, %v5007_v8  ;;  %3641 = vmatmul.mubr.msk.bf16.gmra.mrb[52].mxu0 %vm1154_vm7, %v5043_v22  ;;  %v6515_v8 = vrot.slane %v4467_v51, 7 }
 0x13b   : > { %3602 = vmatprep.mubr.msk.bf16.mxu1 %vm1154_vm7, %v5016_v61  ;;  %3644 = vmatprep.mubr.msk.bf16.mxu0 %vm1154_vm7, %v5052_v36 }
 0x13c   : > { %v1565_v61 = vsel %vm685_vm4, %v1563_v58, %v6515_v8 }
 0x142   : > { %3603 = vmatmul.mubr.msk.bf16.gmra.mrb[24].mxu1 %vm1154_vm7, %v5025_v63  ;;  %3645 = vmatmul.mubr.msk.bf16.gmra.mrb[56].mxu0 %vm1154_vm7, %v5061_v21  ;;  %v1599_v63 = vpop.permute.xlu0 %1598 }
 0x143   : > { %3606 = vmatprep.mubr.msk.bf16.mxu1 %vm1154_vm7, %v5034_v43  ;;  %3648 = vmatprep.mubr.msk.bf16.mxu0 %vm1154_vm7, %v5070_v32  ;;  %v1592_v43 = vpop.permute.xlu1 %1591 }
 0x14a   : > { %3607 = vmatmul.mubr.msk.bf16.gmra.mrb[28].mxu1 %vm1154_vm7, %v5043_v22  ;;  %3649 = vmatmul.mubr.msk.bf16.gmra.mrb[60].mxu0 %vm1154_vm7, %v5079_v23  ;;  %v1572_v22 = vpack.c.bf16 %v1565_v61, %v1566_v13 }
 0x14b   : > { %3610 = vmatprep.mubr.msk.bf16.mxu1 %vm1154_vm7, %v5052_v36  ;;  %3652 = vmatprep.mubr.msk.bf16.mxu0 %vm1154_vm7, %v5107_v17  ;;  %v1614_v36 = vsel %vm1047_vm6, %v1606_v40, %v1599_v63 }
 0x14c   : > { %v1609_v51 = vsel %vm535_vm2, %v1572_v22, %v1592_v43 }
 0x152   : > { %3611 = vmatmul.mubr.msk.bf16.gmra.mrb[32].mxu1 %vm1154_vm7, %v5061_v21  ;;  %3653 = vmatmul.mubr.msk.bf16.gmra.mrb[64].mxu0 %vm1154_vm7, %v1141_v55  ;;  %v1612_v21 = vsel %vm1047_vm6, %v5096_v44, %v1597_v37 }
 0x153   : > { %3614 = vmatprep.mubr.msk.bf16.mxu1 %vm1154_vm7, %v5070_v32  ;;  %3656 = vmatprep.mubr.msk.bf16.mxu0 %vm1154_vm7, %v5088_v30  ;;  %v1601_v32 = vpop.permute.xlu1 %1600 }
 0x154   : > { %v1616_v60 = vsel %vm1047_vm6, %v1609_v51, %v1601_v32 }
 0x15a   : > { %3657 = vmatmul.mubr.msk.bf16.gmra.mrb[68].mxu0 %vm1154_vm7, %v1612_v21  ;;  %3615 = vmatmul.mubr.msk.bf16.gmra.mrb[36].mxu1 %vm1154_vm7, %v5079_v23 }
 0x15b   : > { %3618 = vmatprep.mubr.msk.bf16.mxu1 %vm1154_vm7, %v5107_v17  ;;  %3660 = vmatprep.mubr.msk.bf16.mxu0 %vm1154_vm7, %v1614_v36 }
 0x162   : > { %3619 = vmatmul.mubr.msk.bf16.gmra.mrb[40].mxu1 %vm1154_vm7, %v1087_v59  ;;  %3661 = vmatmul.mubr.msk.bf16.gmra.mrb[72].mxu0 %vm1154_vm7, %v1616_v60 }
 0x19f   : > { %v3542_v1 = vpop.f32.mrb[0].mxu0 }
 0x1a0   : > { %v1233_v57 = vpop.f32.mrb[1].mxu0 }
 0x1a1   : > { %v3543_v23 = vpop.f32.mrb[2].mxu0 }
 0x1a2   : > { %v1236_v28 = vpop.f32.mrb[3].mxu0 }
 0x1a7   : > { %v3546_v25 = vpop.f32.mrb[4].mxu0 }
 0x1a8   : > { %v1247_v2 = vpop.f32.mrb[5].mxu0 }
 0x1a9   : > { %v3547_v30 = vpop.f32.mrb[6].mxu0 }
 0x1aa   : > { %v5225_v18 = vpop.f32.mrb[7].mxu0 }
 0x1af   : > { %v3550_v47 = vpop.f32.mrb[8].mxu0 }
 0x1b0   : > { %v5227_v9 = vpop.f32.mrb[9].mxu0 }
 0x1b1   : > { %v3551_v35 = vpop.f32.mrb[10].mxu0 }
 0x1b2   : > { %v5229_v44 = vpop.f32.mrb[11].mxu0 }
 0x1b7   : > { %v3554_v46 = vpop.f32.mrb[12].mxu0 }
 0x1b8   : > { %v5231_v27 = vpop.f32.mrb[13].mxu0 }
 0x1b9   : > { %v3555_v26 = vpop.f32.mrb[14].mxu0 }
 0x1ba   : > { %v5233_v14 = vpop.f32.mrb[15].mxu0 }
 0x1bf   : > { %v3558_v16 = vpop.f32.mrb[16].mxu0 }
 0x1c0   : > { %v5235_v11 = vpop.f32.mrb[17].mxu0 }
 0x1c1   : > { %v3559_v54 = vpop.f32.mrb[18].mxu0 }
 0x1c2   : > { %v5237_v49 = vpop.f32.mrb[19].mxu0 }
 0x1c7   : > { %v3562_v17 = vpop.f32.mrb[20].mxu0 }
 0x1c8   : > { %v5239_v41 = vpop.f32.mrb[21].mxu0 }
 0x1c9   : > { %v3563_v34 = vpop.f32.mrb[22].mxu0 }
 0x1ca   : > { %v5241_v48 = vpop.f32.mrb[23].mxu0 }
 0x1cf   : > { %v3566_v50 = vpop.f32.mrb[24].mxu0 }
 0x1d0   : > { %v5243_v15 = vpop.f32.mrb[25].mxu0 }
 0x1d1   : > { %v3567_v55 = vpop.f32.mrb[26].mxu0 }
 0x1d2   : > { %v5245_v24 = vpop.f32.mrb[27].mxu0 }
 0x1d7   : > { %v3570_v19 = vpop.f32.mrb[28].mxu0 }
 0x1d8   : > { %v5247_v4 = vpop.f32.mrb[29].mxu0 }
 0x1d9   : > { %v3571_v7 = vpop.f32.mrb[30].mxu0 }
 0x1da   : > { %v5249_v20 = vpop.f32.mrb[31].mxu0 }
 0x1de   : > { %v3578_v5 = vpop.f32.mrb[0].mxu1 }
 0x1df   : > { %v5251_v53 = vpop.f32.mrb[1].mxu1 }
 0x1e0   : > { %v3579_v39 = vpop.f32.mrb[2].mxu1 }
 0x1e1   : > { %v5253_v62 = vpop.f32.mrb[3].mxu1 }
 0x1e5   : > { %v3574_v12 = vpop.f32.mrb[32].mxu0 }
 0x1e6   : > { %v5255_v29 = vpop.f32.mrb[33].mxu0 }
 0x1e7   : > { %v3575_v42 = vpop.f32.mrb[34].mxu0 }
 0x1e8   : > { %v5257_v52 = vpop.f32.mrb[35].mxu0 }
 0x1ed   : > { %v3584_v31 = vpop.f32.mrb[4].mxu1  ;;  %v3626_v3 = vpop.f32.mrb[36].mxu0 }
 0x1ee   : > { %v1422_v37 = vpop.f32.mrb[5].mxu1  ;;  %v1670_v10 = vpop.f32.mrb[37].mxu0 }
 0x1ef   : > { %v1423_v33 = vadd.f32 %v1422_v37, %v1233_v57  ;;  %v3585_v56 = vpop.f32.mrb[6].mxu1  ;;  %v3627_v0 = vpop.f32.mrb[38].mxu0 }
 0x1f0   : > { %v1425_v58 = vpop.f32.mrb[7].mxu1  ;;  %v1673_v6 = vpop.f32.mrb[39].mxu0 }
 0x1f1   : > { %v1809_v40 = vadd.f32 %v1670_v10, %v1423_v33  ;;  %v1426_v8 = vadd.f32 %v1425_v58, %v1236_v28 }
 0x1f3   : > { %v1835_v61 = vadd.f32 %v5262_v38, %v1809_v40  ;;  %v1810_v13 = vadd.f32 %v1673_v6, %v1426_v8 }
 0x1f5   : > { %vm1855_vm8 = vcmp.gt.f32.partialorder %v1835_v61, 0.0  ;;  %v1875_v63 = vmul.f32 0.01, %v1835_v61  ;;  %v1836_v43 = vadd.f32 %v5262_v38, %v1810_v13  ;;  %v3588_v22 = vpop.f32.mrb[8].mxu1  ;;  %v3630_v36 = vpop.f32.mrb[40].mxu0 }
 0x1f6   : > { %v1436_v21 = vpop.f32.mrb[9].mxu1  ;;  %v1684_v51 = vpop.f32.mrb[41].mxu0 }
 0x1f7   : > { %v1895_v32 = vsel %vm1855_vm8, %v1835_v61, %v1875_v63  ;;  %vm1856_vm9 = vcmp.gt.f32.partialorder %v1836_v43, 0.0  ;;  %v1876_v60 = vmul.f32 0.01, %v1836_v43  ;;  %v1437_v59 = vadd.f32 %v1436_v21, %v1247_v2  ;;  %v3589_v1 = vpop.f32.mrb[10].mxu1  ;;  %v3631_v57 = vpop.f32.mrb[42].mxu0 }
 0x1f8   : > { %1915 = vst.msk [vmem:[#allocation3] sm:$0xff] %vm1047_vm6, %v1895_v32  ;;  %v1439_v23 = vpop.f32.mrb[11].mxu1  ;;  %v1687_v28 = vpop.f32.mrb[43].mxu0 }
 0x1f9   : > { %v1896_v25 = vsel %vm1856_vm9, %v1836_v43, %v1876_v60  ;;  %v1811_v30 = vadd.f32 %v1684_v51, %v1437_v59  ;;  %v1440_v47 = vadd.f32 %v1439_v23, %v5225_v18 }
 0x1fa   : > { %1916 = vst.msk [vmem:[#allocation3 + $0x8] sm:$0xff] %vm1047_vm6, %v1896_v25 }
 0x1fb   : > { %v1837_v35 = vadd.f32 %v5262_v38, %v1811_v30  ;;  %v1812_v46 = vadd.f32 %v1687_v28, %v1440_v47 }
 0x1fd   : > { %vm1857_vm10 = vcmp.gt.f32.partialorder %v1837_v35, 0.0  ;;  %v1877_v26 = vmul.f32 0.01, %v1837_v35  ;;  %v1838_v16 = vadd.f32 %v5262_v38, %v1812_v46  ;;  %v3592_v2 = vpop.f32.mrb[12].mxu1  ;;  %v3634_v54 = vpop.f32.mrb[44].mxu0 }
 0x1fe   : > { %v1450_v17 = vpop.f32.mrb[13].mxu1  ;;  %v1698_v34 = vpop.f32.mrb[45].mxu0 }
 0x1ff   : > { %v1897_v50 = vsel %vm1857_vm10, %v1837_v35, %v1877_v26  ;;  %vm1858_vm11 = vcmp.gt.f32.partialorder %v1838_v16, 0.0  ;;  %v1878_v55 = vmul.f32 0.01, %v1838_v16  ;;  %v1451_v19 = vadd.f32 %v1450_v17, %v5227_v9  ;;  %v3593_v7 = vpop.f32.mrb[14].mxu1  ;;  %v3635_v18 = vpop.f32.mrb[46].mxu0 }
 0x200   : > { %1917 = vst.msk [vmem:[#allocation3 + $0x20] sm:$0xff] %vm1047_vm6, %v1897_v50  ;;  %v1453_v5 = vpop.f32.mrb[15].mxu1  ;;  %v1701_v39 = vpop.f32.mrb[47].mxu0 }
 0x201   : > { %v1898_v12 = vsel %vm1858_vm11, %v1838_v16, %v1878_v55  ;;  %v1813_v42 = vadd.f32 %v1698_v34, %v1451_v19  ;;  %v1454_v31 = vadd.f32 %v1453_v5, %v5229_v44 }
 0x202   : > { %1918 = vst.msk [vmem:[#allocation3 + $0x28] sm:$0xff] %vm1047_vm6, %v1898_v12 }
 0x203   : > { %v1839_v3 = vadd.f32 %v5262_v38, %v1813_v42  ;;  %v1814_v37 = vadd.f32 %v1701_v39, %v1454_v31 }
 0x205   : > { %vm1859_vm12 = vcmp.gt.f32.partialorder %v1839_v3, 0.0  ;;  %v1879_v10 = vmul.f32 0.01, %v1839_v3  ;;  %v1840_v33 = vadd.f32 %v5262_v38, %v1814_v37  ;;  %v3596_v9 = vpop.f32.mrb[16].mxu1  ;;  %v3638_v56 = vpop.f32.mrb[48].mxu0 }
 0x206   : > { %v1464_v0 = vpop.f32.mrb[17].mxu1  ;;  %v1712_v58 = vpop.f32.mrb[49].mxu0 }
 0x207   : > { %v1899_v6 = vsel %vm1859_vm12, %v1839_v3, %v1879_v10  ;;  %vm1860_vm13 = vcmp.gt.f32.partialorder %v1840_v33, 0.0  ;;  %v1880_v40 = vmul.f32 0.01, %v1840_v33  ;;  %v1465_v8 = vadd.f32 %v1464_v0, %v5231_v27  ;;  %v3597_v61 = vpop.f32.mrb[18].mxu1  ;;  %v3639_v44 = vpop.f32.mrb[50].mxu0 }
 0x208   : > { %1919 = vst.msk [vmem:[#allocation3 + $0x40] sm:$0xff] %vm1047_vm6, %v1899_v6  ;;  %v1467_v13 = vpop.f32.mrb[19].mxu1  ;;  %v1715_v63 = vpop.f32.mrb[51].mxu0 }
 0x209   : > { %v1900_v43 = vsel %vm1860_vm13, %v1840_v33, %v1880_v40  ;;  %v1815_v22 = vadd.f32 %v1712_v58, %v1465_v8  ;;  %v1468_v36 = vadd.f32 %v1467_v13, %v5233_v14 }
 0x20a   : > { %1920 = vst.msk [vmem:[#allocation3 + $0x48] sm:$0xff] %vm1047_vm6, %v1900_v43 }
 0x20b   : > { %v1841_v21 = vadd.f32 %v5262_v38, %v1815_v22  ;;  %v1816_v51 = vadd.f32 %v1715_v63, %v1468_v36 }
 0x20d   : > { %vm1861_vm14 = vcmp.gt.f32.partialorder %v1841_v21, 0.0  ;;  %v1881_v32 = vmul.f32 0.01, %v1841_v21  ;;  %v1842_v60 = vadd.f32 %v5262_v38, %v1816_v51  ;;  %v3600_v27 = vpop.f32.mrb[20].mxu1  ;;  %v3642_v59 = vpop.f32.mrb[52].mxu0 }
 0x20e   : > { %v1478_v1 = vpop.f32.mrb[21].mxu1  ;;  %v1726_v57 = vpop.f32.mrb[53].mxu0 }
 0x20f   : > { %v1901_v23 = vsel %vm1861_vm14, %v1841_v21, %v1881_v32  ;;  %vm1862_vm15 = vcmp.gt.f32.partialorder %v1842_v60, 0.0  ;;  %v1882_v28 = vmul.f32 0.01, %v1842_v60  ;;  %v1479_v25 = vadd.f32 %v1478_v1, %v5235_v11  ;;  %v3601_v30 = vpop.f32.mrb[22].mxu1  ;;  %v3643_v14 = vpop.f32.mrb[54].mxu0 }
 0x210   : > { %1921 = vst.msk [vmem:[#allocation3 + $0x60] sm:$0xff] %vm1047_vm6, %v1901_v23  ;;  %v1481_v47 = vpop.f32.mrb[23].mxu1  ;;  %v1729_v35 = vpop.f32.mrb[55].mxu0 }
 0x211   : > { %v1902_v46 = vsel %vm1862_vm15, %v1842_v60, %v1882_v28  ;;  %v1817_v26 = vadd.f32 %v1726_v57, %v1479_v25  ;;  %v1482_v16 = vadd.f32 %v1481_v47, %v5237_v49 }
 0x212   : > { %1922 = vst.msk [vmem:[#allocation3 + $0x68] sm:$0xff] %vm1047_vm6, %v1902_v46 }
 0x213   : > { %v1843_v2 = vadd.f32 %v5262_v38, %v1817_v26  ;;  %v1818_v54 = vadd.f32 %v1729_v35, %v1482_v16 }
 0x215   : > { %vm1863_vm0 = vcmp.gt.f32.partialorder %v1843_v2, 0.0  ;;  %v1883_v17 = vmul.f32 0.01, %v1843_v2  ;;  %v1844_v34 = vadd.f32 %v5262_v38, %v1818_v54  ;;  %v3604_v11 = vpop.f32.mrb[24].mxu1  ;;  %v3646_v50 = vpop.f32.mrb[56].mxu0 }
 0x216   : > { %v1492_v55 = vpop.f32.mrb[25].mxu1  ;;  %v1740_v19 = vpop.f32.mrb[57].mxu0 }
 0x217   : > { %v1903_v7 = vsel %vm1863_vm0, %v1843_v2, %v1883_v17  ;;  %vm1864_vm1 = vcmp.gt.f32.partialorder %v1844_v34, 0.0  ;;  %v1884_v18 = vmul.f32 0.01, %v1844_v34  ;;  %v1493_v5 = vadd.f32 %v1492_v55, %v5239_v41  ;;  %v3605_v39 = vpop.f32.mrb[26].mxu1  ;;  %v3647_v49 = vpop.f32.mrb[58].mxu0 }
 0x218   : > { %1923 = vst.msk [vmem:[#allocation3 + $0x80] sm:$0xff] %vm1047_vm6, %v1903_v7  ;;  %v1495_v12 = vpop.f32.mrb[27].mxu1  ;;  %v1743_v42 = vpop.f32.mrb[59].mxu0 }
 0x219   : > { %v1904_v31 = vsel %vm1864_vm1, %v1844_v34, %v1884_v18  ;;  %v1819_v3 = vadd.f32 %v1740_v19, %v1493_v5  ;;  %v1496_v37 = vadd.f32 %v1495_v12, %v5241_v48 }
 0x21a   : > { %1924 = vst.msk [vmem:[#allocation3 + $0x88] sm:$0xff] %vm1047_vm6, %v1904_v31 }
 0x21b   : > { %v1845_v10 = vadd.f32 %v5262_v38, %v1819_v3  ;;  %v1820_v33 = vadd.f32 %v1743_v42, %v1496_v37 }
 0x21d   : > { %vm1865_vm2 = vcmp.gt.f32.partialorder %v1845_v10, 0.0  ;;  %v1885_v9 = vmul.f32 0.01, %v1845_v10  ;;  %v1846_v56 = vadd.f32 %v5262_v38, %v1820_v33  ;;  %v3608_v41 = vpop.f32.mrb[28].mxu1  ;;  %v3650_v0 = vpop.f32.mrb[60].mxu0 }
 0x21e   : > { %v1506_v58 = vpop.f32.mrb[29].mxu1  ;;  %v1754_v6 = vpop.f32.mrb[61].mxu0 }
 0x21f   : > { %v1905_v40 = vsel %vm1865_vm2, %v1845_v10, %v1885_v9  ;;  %vm1866_vm5 = vcmp.gt.f32.partialorder %v1846_v56, 0.0  ;;  %v1886_v8 = vmul.f32 0.01, %v1846_v56  ;;  %v1507_v61 = vadd.f32 %v1506_v58, %v5243_v15  ;;  %v3609_v44 = vpop.f32.mrb[30].mxu1  ;;  %v3651_v48 = vpop.f32.mrb[62].mxu0 }
 0x220   : > { %1925 = vst.msk [vmem:[#allocation3 + $0xa0] sm:$0xff] %vm1047_vm6, %v1905_v40  ;;  %v1509_v13 = vpop.f32.mrb[31].mxu1  ;;  %v1757_v63 = vpop.f32.mrb[63].mxu0 }
 0x221   : > { %v1906_v43 = vsel %vm1866_vm5, %v1846_v56, %v1886_v8  ;;  %v1821_v22 = vadd.f32 %v1754_v6, %v1507_v61  ;;  %v1510_v36 = vadd.f32 %v1509_v13, %v5245_v24 }
 0x222   : > { %1926 = vst.msk [vmem:[#allocation3 + $0xa8] sm:$0xff] %vm1047_vm6, %v1906_v43 }
 0x223   : > { %v1847_v21 = vadd.f32 %v5262_v38, %v1821_v22  ;;  %v1822_v51 = vadd.f32 %v1757_v63, %v1510_v36 }
 0x225   : > { %vm1867_vm7 = vcmp.gt.f32.partialorder %v1847_v21, 0.0  ;;  %v1887_v32 = vmul.f32 0.01, %v1847_v21  ;;  %v1848_v60 = vadd.f32 %v5262_v38, %v1822_v51  ;;  %v3612_v15 = vpop.f32.mrb[32].mxu1  ;;  %v3654_v27 = vpop.f32.mrb[64].mxu0 }
 0x226   : > { %v1520_v59 = vpop.f32.mrb[33].mxu1  ;;  %v1768_v1 = vpop.f32.mrb[65].mxu0 }
 0x227   : > { %v1907_v57 = vsel %vm1867_vm7, %v1847_v21, %v1887_v32  ;;  %vm1868_vm8 = vcmp.gt.f32.partialorder %v1848_v60, 0.0  ;;  %v1888_v23 = vmul.f32 0.01, %v1848_v60  ;;  %v1521_v28 = vadd.f32 %v1520_v59, %v5247_v4  ;;  %v3613_v25 = vpop.f32.mrb[34].mxu1  ;;  %v3655_v24 = vpop.f32.mrb[66].mxu0 }
 0x228   : > { %1927 = vst.msk [vmem:[#allocation3 + $0xc0] sm:$0xff] %vm1047_vm6, %v1907_v57  ;;  %v1523_v30 = vpop.f32.mrb[35].mxu1  ;;  %v1771_v14 = vpop.f32.mrb[67].mxu0 }
 0x229   : > { %v1908_v47 = vsel %vm1868_vm8, %v1848_v60, %v1888_v23  ;;  %v1823_v35 = vadd.f32 %v1768_v1, %v1521_v28  ;;  %v1524_v46 = vadd.f32 %v1523_v30, %v5249_v20 }
 0x22a   : > { %1928 = vst.msk [vmem:[#allocation3 + $0xc8] sm:$0xff] %vm1047_vm6, %v1908_v47 }
 0x22b   : > { %v1849_v26 = vadd.f32 %v5262_v38, %v1823_v35  ;;  %v1824_v16 = vadd.f32 %v1771_v14, %v1524_v46 }
 0x22d   : > { %vm1869_vm9 = vcmp.gt.f32.partialorder %v1849_v26, 0.0  ;;  %v1889_v2 = vmul.f32 0.01, %v1849_v26  ;;  %v1850_v54 = vadd.f32 %v5262_v38, %v1824_v16  ;;  %v3616_v4 = vpop.f32.mrb[36].mxu1  ;;  %v3658_v17 = vpop.f32.mrb[68].mxu0 }
 0x22e   : > { %v1534_v34 = vpop.f32.mrb[37].mxu1  ;;  %v1782_v11 = vpop.f32.mrb[69].mxu0 }
 0x22f   : > { %v1909_v50 = vsel %vm1869_vm9, %v1849_v26, %v1889_v2  ;;  %vm1870_vm10 = vcmp.gt.f32.partialorder %v1850_v54, 0.0  ;;  %v1890_v55 = vmul.f32 0.01, %v1850_v54  ;;  %v1535_v19 = vadd.f32 %v1534_v34, %v5255_v29  ;;  %v3617_v7 = vpop.f32.mrb[38].mxu1  ;;  %v3659_v20 = vpop.f32.mrb[70].mxu0 }
 0x230   : > { %1929 = vst.msk [vmem:[#allocation3 + $0xe0] sm:$0xff] %vm1047_vm6, %v1909_v50  ;;  %v1537_v18 = vpop.f32.mrb[39].mxu1  ;;  %v1785_v5 = vpop.f32.mrb[71].mxu0 }
 0x231   : > { %v1910_v39 = vsel %vm1870_vm10, %v1850_v54, %v1890_v55  ;;  %v1825_v49 = vadd.f32 %v1782_v11, %v1535_v19  ;;  %v1538_v12 = vadd.f32 %v1537_v18, %v5257_v52 }
 0x232   : > { %1930 = vst.msk [vmem:[#allocation3 + $0xe8] sm:$0xff] %vm1047_vm6, %v1910_v39 }
 0x233   : > { %v1851_v42 = vadd.f32 %v5262_v38, %v1825_v49  ;;  %v1826_v31 = vadd.f32 %v1785_v5, %v1538_v12 }
 0x235   : > { %vm1871_vm11 = vcmp.gt.f32.partialorder %v1851_v42, 0.0  ;;  %v1891_v3 = vmul.f32 0.01, %v1851_v42  ;;  %v1852_v37 = vadd.f32 %v5262_v38, %v1826_v31  ;;  %v3620_v29 = vpop.f32.mrb[40].mxu1  ;;  %v3662_v10 = vpop.f32.mrb[72].mxu0 }
 0x236   : > { %v1548_v33 = vpop.f32.mrb[41].mxu1  ;;  %v1796_v9 = vpop.f32.mrb[73].mxu0 }
 0x237   : > { %v1911_v56 = vsel %vm1871_vm11, %v1851_v42, %v1891_v3  ;;  %vm1872_vm12 = vcmp.gt.f32.partialorder %v1852_v37, 0.0  ;;  %v1892_v41 = vmul.f32 0.01, %v1852_v37  ;;  %v1549_v0 = vadd.f32 %v1548_v33, %v5251_v53  ;;  %v3621_v58 = vpop.f32.mrb[42].mxu1  ;;  %v3663_v52 = vpop.f32.mrb[74].mxu0 }
 0x238   : > { %1931 = vst.msk [vmem:[#allocation3 + $0x100] sm:$0xff] %vm1047_vm6, %v1911_v56  ;;  %v1551_v6 = vpop.f32.mrb[43].mxu1  ;;  %v1799_v40 = vpop.f32.mrb[75].mxu0 }
 0x239   : > { %v1912_v8 = vsel %vm1872_vm12, %v1852_v37, %v1892_v41  ;;  %v1827_v61 = vadd.f32 %v1796_v9, %v1549_v0  ;;  %v1552_v44 = vadd.f32 %v1551_v6, %v5253_v62  ;;  %v3883_v62 = vmov (!%p3273_p13), 0.0  }
 0x23a   : > { %1932 = vst.msk [vmem:[#allocation3 + $0x108] sm:$0xff] %vm1047_vm6, %v1912_v8  ;;  %1938 = vst.msk [vmem:[#allocation3] sm:$0xff] (!%p3273_p13), %vm1047_vm6, %v3883_v62 }
 0x23b   : > { %v1853_v48 = vadd.f32 %v5262_v38, %v1827_v61  ;;  %v1828_v13 = vadd.f32 %v1799_v40, %v1552_v44  ;;  %1939 = vst.msk [vmem:[#allocation3 + $0x8] sm:$0xff] (!%p3273_p13), %vm1047_vm6, %v3883_v62 }
 0x23c   : > { %1937 = sbr.rel (%p3273_p13) target bundleno = 579 (0x243), region = 68 }
 0x23d   : > { %vm1873_vm13 = vcmp.gt.f32.partialorder %v1853_v48, 0.0  ;;  %v1893_v63 = vmul.f32 0.01, %v1853_v48  ;;  %v1854_v43 = vadd.f32 %v5262_v38, %v1828_v13 }
 0x23f   : > { %v1913_v53 = vsel %vm1873_vm13, %v1853_v48, %v1893_v63  ;;  %vm1874_vm14 = vcmp.gt.f32.partialorder %v1854_v43, 0.0  ;;  %v1894_v22 = vmul.f32 0.01, %v1854_v43 }
 0x240   : > { %1933 = vst.msk [vmem:[#allocation3 + $0x120] sm:$0xff] %vm1047_vm6, %v1913_v53 }
 0x241   : > { %v1914_v36 = vsel %vm1874_vm14, %v1854_v43, %v1894_v22 }
 0x242   : > { %1934 = vst.msk [vmem:[#allocation3 + $0x128] sm:$0xff] %vm1047_vm6, %v1914_v36 }
 0x243 PF: > { %1942 = sbr.rel (%p3275_p1) target bundleno = 586 (0x24a), region = 72  ;;  %v3884_v38 = vmov (!%p3275_p1), 0.0  }
 0x244   : > { %1944 = vst.msk [vmem:[#allocation3 + $0x120] sm:$0xff] (!%p3275_p1), %vm1047_vm6, %v3884_v38  ;;  %1945 = vst.msk [vmem:[#allocation3 + $0x128] sm:$0xff] (!%p3275_p1), %vm1047_vm6, %v3884_v38 }
 0x24a PF: > { %v5329_v21 = vld [vmem:[#allocation3 + $0x20] sm:$0xff]  ;;  %v5331_v51 = vld [vmem:[#allocation3 + $0x28] sm:$0xff]  ;;  %v5333_v32 = vld [vmem:[#allocation3 + $0x30] sm:$0xff]  ;;  %s3885_s24 = smov 16   ;;  %vm2445_vm15 = vcmask 1043456   ;;  %vm2307_vm0 = vcmask 130048  }
 0x24b   : > { %v2069_v60 = vpack.c.bf16 %v5331_v51, %v5329_v21  ;;  %v5338_v15 = vrot.slane %v5329_v21, 1  ;;  %v5340_v27 = vld [vmem:[#allocation3 + $0x38] sm:$0xff]  ;;  %v5342_v59 = vld [vmem:[#allocation3 + $0x40] sm:$0xff]  ;;  %v5344_v1 = vld [vmem:[#allocation3 + $0x48] sm:$0xff]  ;;  %v2088_v57 = vrot.slane %v5331_v51, 1  ;;  %v2089_v23 = vrot.slane %v5333_v32, 1 }
 0x24c   : > { %v2090_v28 = vrot.slane %v5340_v27, 1  ;;  %v5349_v25 = vld [vmem:[#allocation3 + $0x50] sm:$0xff]  ;;  %v2070_v24 = vpack.c.bf16 %v5340_v27, %v5333_v32  ;;  %v5355_v30 = vrot.slane %v5342_v59, 1  ;;  %v2092_v46 = vrot.slane %v5344_v1, 1  ;;  %v5368_v2 = vld [vmem:[#allocation3 + $0x58] sm:$0xff]  ;;  %v5371_v4 = vld [vmem:[#allocation3 + $0x60] sm:$0xff] }
 0x24d   : > { %2183 = vrot.lane.b32.xlu0 %v2069_v60, %s3882_s21  ;;  %v2140_v14 = vsel %vm806_vm3, %v2088_v57, %v2089_v23  ;;  %v2141_v47 = vsel %vm806_vm3, %v5338_v15, %v2088_v57  ;;  %v2093_v54 = vrot.slane %v5349_v25, 1  ;;  %v2071_v34 = vpack.c.bf16 %v5344_v1, %v5342_v59  ;;  %v5384_v7 = vld [vmem:[#allocation3 + $0x68] sm:$0xff]  ;;  %v5386_v20 = vld [vmem:[#allocation3 + $0x70] sm:$0xff]  ;;  %v5392_v39 = vld [vmem:[#allocation3 + $0x78] sm:$0xff] }
 0x24e   : > { %v2139_v35 = vsel %vm806_vm3, %v2089_v23, %v2090_v28  ;;  %v2149_v26 = vpack.c.bf16 %v2140_v14, %v2141_v47  ;;  %v2138_v16 = vsel %vm806_vm3, %v2090_v28, %v5355_v30  ;;  %v2094_v11 = vrot.slane %v5368_v2, 1  ;;  %v5400_v3 = vld [vmem:[#allocation3 + $0x80] sm:$0xff]  ;;  %v3832_v37 = vld [vmem:[%s6368_s5 + $0xc] sm:$0xff]   ;;  %v5410_v10 = vld [vmem:[%s6368_s5 + $0x14] ss:$0 sps:$4 sm:$0xff]  }
 0x24f   : > { %v2150_v17 = vpack.c.bf16 %v2138_v16, %v2139_v35  ;;  %v2136_v50 = vsel %vm806_vm3, %v2092_v46, %v2093_v54  ;;  %v2137_v55 = vsel %vm806_vm3, %v5355_v30, %v2092_v46  ;;  %v2095_v19 = vrot.slane %v5371_v4, 1  ;;  %v5405_v29 = vld [vmem:[#allocation3 + $0x88] sm:$0xff]  ;;  %v5417_v41 = vld [vmem:[#allocation3 + $0x90] sm:$0xff]  ;;  %v5419_v0 = vld [vmem:[#allocation3 + $0x98] sm:$0xff]  ;;  %3664 = vmatprep.subr.bf16.mxu1 %v3832_v37 }
 0x250   : > { %2231 = vrot.lane.b32.xlu1 %v2149_v26, %s3885_s24  ;;  %v2072_v18 = vpack.c.bf16 %v5368_v2, %v5349_v25  ;;  %v2151_v5 = vpack.c.bf16 %v2136_v50, %v2137_v55  ;;  %v2135_v12 = vsel %vm806_vm3, %v2093_v54, %v2094_v11  ;;  %v2096_v42 = vrot.slane %v5384_v7, 1  ;;  %v5421_v58 = vld [vmem:[#allocation3 + $0xa0] sm:$0xff]  ;;  %v5428_v8 = vld [vmem:[#allocation3 + $0xa8] sm:$0xff]  ;;  %v5430_v61 = vld [vmem:[#allocation3 + $0xb0] sm:$0xff]  ;;  %3665 = vmatpush3.bf16.msra.mxu1 %v3832_v37 }
 0x251   : > { %2185 = vrot.lane.b32.xlu0 %v2070_v24, %s3882_s21  ;;  %v2134_v49 = vsel %vm806_vm3, %v2094_v11, %v2095_v19  ;;  %v2097_v31 = vrot.slane %v5386_v20, 1  ;;  %v2073_v9 = vpack.c.bf16 %v5384_v7, %v5371_v4  ;;  %v2098_v56 = vrot.slane %v5392_v39, 1  ;;  %v3835_v44 = vld [vmem:[%s6368_s5 + $0x18] sm:$0xff]   ;;  %3778 = vmatprep.subr.msk.bf16.mxu1 %vm2445_vm15, %v5410_v10  ;;  %v5442_v13 = vld [vmem:[%s6368_s5 + $0x20] ss:$0 sps:$4 sm:$0xff]   ;;  %v5468_v16 = vld [vmem:[#allocation3 + $0xc8] sm:$0xff] }
 0x252   : > { %v2152_v33 = vpack.c.bf16 %v2134_v49, %v2135_v12  ;;  %v2133_v6 = vsel %vm806_vm3, %v2095_v19, %v2096_v42  ;;  %v2099_v40 = vrot.slane %v5400_v3, 1  ;;  %v5435_v48 = vld [vmem:[#allocation3 + $0xb8] sm:$0xff]  ;;  %v2074_v63 = vpack.c.bf16 %v5392_v39, %v5386_v20  ;;  %v5451_v36 = vld [vmem:[#allocation3 + $0xc0] sm:$0xff]  ;;  %3736 = vmatprep.subr.bf16.mxu0 %v3835_v44  ;;  %v5479_v11 = vld [vmem:[#allocation3 + $0xd0] sm:$0xff] }
 0x253   : > { %v2132_v52 = vsel %vm806_vm3, %v2096_v42, %v2097_v31  ;;  %v2131_v53 = vsel %vm806_vm3, %v2097_v31, %v2098_v56  ;;  %v2100_v22 = vrot.slane %v5405_v29, 1  ;;  %v2101_v38 = vrot.slane %v5417_v41, 1  ;;  %3737 = vmatpush3.bf16.msra.mxu0 %v3835_v44  ;;  %v5481_v50 = vld [vmem:[#allocation3 + $0xd8] sm:$0xff]  ;;  %v5491_v49 = vld [vmem:[#allocation3 + $0xe0] sm:$0xff] }
 0x254   : > { %2233 = vrot.lane.b32.xlu1 %v2150_v17, %s3885_s24  ;;  %v2153_v43 = vpack.c.bf16 %v2132_v52, %v2133_v6  ;;  %v2130_v62 = vsel %vm806_vm3, %v2098_v56, %v2099_v40  ;;  %v2102_v60 = vrot.slane %v5419_v0, 1  ;;  %v2103_v57 = vrot.slane %v5421_v58, 1  ;;  %3780 = vmatprep.subr.msk.bf16.mxu0 %vm2445_vm15, %v5442_v13  ;;  %v5518_v44 = vld [vmem:[#allocation3 + $0x118] sm:$0xff] }
 0x255   : > { %2187 = vrot.lane.b32.xlu0 %v2071_v34, %s3882_s21  ;;  %v1992_v23 = vrot.slane %v5331_v51, 7  ;;  %v2104_v28 = vrot.slane %v5428_v8, 1  ;;  %v2105_v24 = vrot.slane %v5430_v61, 1  ;;  %v2106_v14 = vrot.slane %v5435_v48, 1 }
 0x256   : > { %v1991_v47 = vrot.slane %v5329_v21, 7  ;;  %v2075_v35 = vpack.c.bf16 %v5405_v29, %v5400_v3  ;;  %v2076_v46 = vpack.c.bf16 %v5419_v0, %v5417_v41  ;;  %v2107_v26 = vrot.slane %v5451_v36, 1 }
 0x257   : > { %v1996_v54 = vrot.slane %v5344_v1, 7  ;;  %v2154_v21 = vpack.c.bf16 %v2130_v62, %v2131_v53  ;;  %v2129_v17 = vsel %vm806_vm3, %v2099_v40, %v2100_v22  ;;  %v2077_v34 = vpack.c.bf16 %v5428_v8, %v5421_v58  ;;  %v5516_v40 = vld [vmem:[#allocation3 + $0xf0] sm:$0xff] }
 0x258   : > { %2189 = vrot.lane.b32.xlu1 %v2072_v18, %s3882_s21  ;;  %v2128_v55 = vsel %vm806_vm3, %v2100_v22, %v2101_v38  ;;  %v2126_v19 = vsel %vm806_vm3, %v2102_v60, %v2103_v57  ;;  %v2127_v18 = vsel %vm806_vm3, %v2101_v38, %v2102_v60  ;;  %v5495_v12 = vsel %vm806_vm3, %v2104_v28, %v2105_v24  ;;  %v5602_v60 = vld [vmem:[#allocation3 + $0x108] sm:$0xff] }
 0x259   : > { %2235 = vrot.lane.b32.xlu0 %v2151_v5, %s3885_s24  ;;  %v5499_v42 = vsel %vm806_vm3, %v2103_v57, %v2104_v28  ;;  %v5503_v31 = vsel %vm806_vm3, %v2105_v24, %v2106_v14  ;;  %v2108_v37 = vrot.slane %v5468_v16, 1  ;;  %v5512_v56 = vsel %vm806_vm3, %v2106_v14, %v2107_v26 }
 0x25a   : > { %v2109_v52 = vrot.slane %v5479_v11, 1  ;;  %v2110_v6 = vrot.slane %v5481_v50, 1  ;;  %v2156_v53 = vpack.c.bf16 %v2126_v19, %v2127_v18  ;;  %v2111_v22 = vrot.slane %v5491_v49, 1 }
 0x25b   : > { %v5525_v62 = vrot.slane %v5518_v44, 7  ;;  %v5536_v28 = vsel %vm685_vm4, %v1991_v47, %v1992_v23  ;;  %v2157_v24 = vpack.c.bf16 %v5495_v12, %v5499_v42  ;;  %v5571_v42 = vld [vmem:[#allocation3 + $0x100] sm:$0xff]  ;;  %v1994_v18 = vrot.slane %v5340_v27, 7 }
 0x25c   : > { %2237 = vrot.lane.b32.xlu1 %v2152_v33, %s3885_s24  ;;  %v5506_v33 = vld [vmem:[#allocation3 + $0xe8] sm:$0xff]  ;;  %v5555_v19 = vsel %vm806_vm3, %v2109_v52, %v2110_v6  ;;  %v5569_v12 = vsel %vm806_vm3, %v2110_v6, %v2111_v22  ;;  %v2447_v27 = vsel %vm2445_vm15, %v5410_v10, 0  ;;  %v1995_v38 = vrot.slane %v5342_v59, 7 }
 0x25d   : > { %2191 = vrot.lane.b32.xlu0 %v2073_v9, %s3882_s21  ;;  %v5508_v9 = vld [vmem:[#allocation3 + $0x18] sm:$0xff]  ;;  %6516 = vst [vmem:[#allocation9_spill] sm:$0xff] %v5525_v62  ;;  %v2112_v57 = vrot.slane %v5506_v33, 1  ;;  %3667 = vmatpush3.bf16.msra.mxu1 %v2447_v27  ;;  %v1997_v5 = vrot.slane %v5349_v25, 7  ;;  %v2003_v1 = vrot.slane %v5400_v3, 7 }
 0x25e   : > { %v5647_v59 = vsel %vm685_vm4, %v1995_v38, %v1996_v54  ;;  %v5651_v25 = vsel %vm685_vm4, %v1994_v18, %v1995_v38 }
 0x260   : > { %2193 = vrot.lane.b32.xlu1 %v2074_v63, %s3882_s21  ;;  %v6403_v63 = vrot.slane %v5508_v9, 7 }
 0x261   : > { %2239 = vrot.lane.b32.xlu0 %v2153_v43, %s3885_s24  ;;  %v2155_v43 = vpack.c.bf16 %v2128_v55, %v2129_v17  ;;  %v2113_v17 = vrot.slane %v5516_v40, 1  ;;  %v5551_v55 = vsel %vm806_vm3, %v2108_v37, %v2109_v52  ;;  %v5578_v52 = vsel %vm685_vm4, %v5525_v62, %v1991_v47 }
 0x264   : > { %2241 = vrot.lane.b32.xlu1 %v2154_v21, %s3885_s24  ;;  %v5546_v21 = vld [vmem:[#allocation3 + $0xf8] sm:$0xff] }
 0x265   : > { %2195 = vrot.lane.b32.xlu0 %v2075_v35, %s3882_s21  ;;  %v5544_v35 = vsel %vm806_vm3, %v2107_v26, %v2108_v37  ;;  %v5563_v26 = vsel %vm685_vm4, %v6403_v63, %v1991_v47  ;;  %v1993_v63 = vrot.slane %v5333_v32, 7  ;;  %v5591_v37 = vld [vmem:[#allocation3 + $0x138] sm:$0xff]  ;;  %v5596_v47 = vld [vmem:[%s6368_s5] sm:$0xff]   ;;  %v5600_v32 = vsel %vm806_vm3, %v2112_v57, %v2113_v17 }
 0x266   : > { %v6404_v6 = vrot.slane %v5591_v37, 7  ;;  %v5616_v14 = vrot.slane %v5546_v21, 7  ;;  %3700 = vmatprep.subr.bf16.mxu1 %v5596_v47 }
 0x267   : > { %v5621_v51 = vsel %vm685_vm4, %v1993_v63, %v1994_v18  ;;  %v1999_v18 = vrot.slane %v5371_v4, 7  ;;  %v2004_v4 = vrot.slane %v5405_v29, 7  ;;  %v6519_v29 = vpack.c.bf16 %v5512_v56, %v5503_v31  ;;  %v5737_v31 = vld [vmem:[#allocation3 + $0x110] sm:$0xff] }
 0x268   : > { %2197 = vrot.lane.b32.xlu1 %v2076_v46, %s3882_s21  ;;  %v5582_v46 = vrot.slane %v5546_v21, 1  ;;  %v2345_v56 = vrot.slane %v5737_v31, 7 }
 0x269   : > { %2243 = vrot.lane.b32.xlu0 %v2155_v43, %s3885_s24  ;;  %v5586_v43 = vsel %vm806_vm3, %v2111_v22, %v2112_v57  ;;  %v5608_v22 = vsel %vm685_vm4, %v1992_v23, %v1993_v63  ;;  %v2160_v57 = vpack.c.bf16 %v5569_v12, %v5555_v19  ;;  %v6517_v23 = vrot.slane %v5571_v42, 1 }
 0x26a   : > { %v5641_v27 = vsel %vm806_vm3, %v2113_v17, %v5582_v46  ;;  %v5851_v19 = vsel %vm685_vm4, %v2345_v56, %v5525_v62  ;;  %v6526_v62 = vpack.c.bf16 %v5600_v32, %v5586_v43 }
 0x26b   : > { %v5664_v17 = vsel %vm806_vm3, %v5582_v46, %v6517_v23  ;;  %v5683_v23 = vsel %vm685_vm4, %v1996_v54, %v1997_v5 }
 0x26c   : > { %2245 = vrot.lane.b32.xlu1 %v2156_v53, %s3885_s24  ;;  %v2000_v53 = vrot.slane %v5384_v7, 7  ;;  %v2005_v7 = vrot.slane %v5417_v41, 7  ;;  %v6520_v41 = vpack.c.bf16 %v5468_v16, %v5451_v36 }
 0x26d   : > { %2199 = vrot.lane.b32.xlu0 %v2077_v34, %s3882_s21  ;;  %v1998_v34 = vrot.slane %v5368_v2, 7  ;;  %v5657_v2 = vsel %vm685_vm4, %v6404_v6, %v1995_v38  ;;  %v6518_v38 = vpack.c.bf16 %v5435_v48, %v5430_v61  ;;  %v2837_v6 = vsel %vm2445_vm15, %v5442_v13, 0 }
 0x26e   : > { %3739 = vmatpush3.bf16.msra.mxu0 %v2837_v6  ;;  %v5696_v54 = vsel %vm685_vm4, %v1999_v18, %v2000_v53  ;;  %v2017_v6 = vrot.slane %v5516_v40, 7 }
 0x26f   : > { %v5672_v63 = vsel %vm685_vm4, %v1997_v5, %v1998_v34  ;;  %v5700_v13 = vsel %vm685_vm4, %v1998_v34, %v1999_v18  ;;  %v2006_v34 = vrot.slane %v5419_v0, 7  ;;  %v5735_v18 = vsel %vm685_vm4, %v2004_v4, %v2005_v7 }
 0x270   : > { %2201 = vrot.lane.b32.xlu1 %v6518_v38, %s3882_s21  ;;  %v2001_v38 = vrot.slane %v5386_v20, 7  ;;  %v2010_v0 = vrot.slane %v5435_v48, 7  ;;  %v6521_v48 = vpack.c.bf16 %v5481_v50, %v5479_v11 }
 0x271   : > { %2247 = vrot.lane.b32.xlu0 %v2157_v24, %s3885_s24  ;;  %v2002_v24 = vrot.slane %v5392_v39, 7 }
 0x272   : > { %v5712_v39 = vsel %vm685_vm4, %v2000_v53, %v2001_v38  ;;  %v5730_v53 = vsel %vm685_vm4, %v2003_v1, %v2004_v4  ;;  %v2011_v4 = vrot.slane %v5451_v36, 7  ;;  %v6522_v36 = vpack.c.bf16 %v5551_v55, %v5544_v35 }
 0x273   : > { %v5708_v20 = vsel %vm685_vm4, %v2001_v38, %v2002_v24  ;;  %v5716_v3 = vsel %vm685_vm4, %v2002_v24, %v2003_v1  ;;  %v2007_v38 = vrot.slane %v5421_v58, 7  ;;  %v2008_v24 = vrot.slane %v5428_v8, 7 }
 0x274   : > { %2249 = vrot.lane.b32.xlu1 %v6519_v29, %s3885_s24  ;;  %v2009_v29 = vrot.slane %v5430_v61, 7  ;;  %v5746_v1 = vsel %vm685_vm4, %v2005_v7, %v2006_v34  ;;  %v5788_v35 = vsel %vm685_vm4, %v2010_v0, %v2011_v4  ;;  %v2013_v55 = vrot.slane %v5479_v11, 7 }
 0x275   : > { %2203 = vrot.lane.b32.xlu0 %v6520_v41, %s3882_s21  ;;  %v2012_v41 = vrot.slane %v5468_v16, 7  ;;  %v5755_v58 = vsel %vm685_vm4, %v2007_v38, %v2008_v24  ;;  %v5759_v8 = vsel %vm685_vm4, %v2006_v34, %v2007_v38  ;;  %v2359_v16 = vrot.slane %v5737_v31, 1 }
 0x276   : > { %v5763_v61 = vsel %vm685_vm4, %v2008_v24, %v2009_v29  ;;  %v5778_v34 = vsel %vm685_vm4, %v2009_v29, %v2010_v0  ;;  %v2015_v29 = vrot.slane %v5491_v49, 7  ;;  %v2016_v7 = vrot.slane %v5506_v33, 7 }
 0x277   : > { %v5782_v38 = vsel %vm685_vm4, %v2011_v4, %v2012_v41  ;;  %v5803_v0 = vsel %vm685_vm4, %v2012_v41, %v2013_v55  ;;  %v2343_v11 = vrot.slane %v5571_v42, 7  ;;  %v6523_v4 = vpack.c.bf16 %v5506_v33, %v5491_v49 }
 0x278   : > { %2205 = vrot.lane.b32.xlu1 %v6521_v48, %s3882_s21  ;;  %v2014_v48 = vrot.slane %v5481_v50, 7  ;;  %v2344_v50 = vrot.slane %v5602_v60, 7  ;;  %v5819_v41 = vsel %vm685_vm4, %v2015_v29, %v2016_v7  ;;  %v5831_v49 = vsel %vm685_vm4, %v2017_v6, %v5616_v14 }
 0x279   : > { %2251 = vrot.lane.b32.xlu0 %v6522_v36, %s3885_s24  ;;  %v5835_v33 = vsel %vm685_vm4, %v2016_v7, %v2017_v6  ;;  %v1948_v7 = vld [vmem:[#allocation3 + $0x10] sm:$0xff] }
 0x27a   : > { %v5799_v24 = vsel %vm685_vm4, %v2013_v55, %v2014_v48  ;;  %v5823_v55 = vsel %vm685_vm4, %v2014_v48, %v2015_v29  ;;  %v5839_v12 = vsel %vm685_vm4, %v2343_v11, %v2344_v50  ;;  %v1947_v48 = vld [vmem:[#allocation3 + $0x8] sm:$0xff]  ;;  %v5855_v6 = vsel %vm685_vm4, %v2344_v50, %v2345_v56 }
 0x27b   : > { %6524 = vst [vmem:[#allocation8_spill] sm:$0xff] %v5855_v6  ;;  %v1988_v5 = vrot.slane %v1947_v48, 7  ;;  %v2366_v56 = vpack.c.bf16 %v5664_v17, %v5641_v27  ;;  %v2355_v50 = vpack.c.bf16 %v5602_v60, %v5571_v42  ;;  %v2360_v29 = vrot.slane %v5518_v44, 1 }
 0x27c   : > { %2253 = vrot.lane.b32.xlu1 %v2160_v57, %s3885_s24  ;;  %v1946_v57 = vld [vmem:[#allocation3] sm:$0xff]  ;;  %v1989_v36 = vrot.slane %v1948_v7, 7  ;;  %v6527_v6 = vrot.slane %v5602_v60, 1  ;;  %v2085_v17 = vrot.slane %v1948_v7, 1 }
 0x27d   : > { %2207 = vrot.lane.b32.xlu0 %v6523_v4, %s3882_s21  ;;  %v5846_v4 = vsel %vm685_vm4, %v5616_v14, %v2343_v11  ;;  %v1987_v10 = vrot.slane %v1946_v57, 7  ;;  %v6525_v11 = vpack.c.bf16 %v5546_v21, %v5516_v40 }
 0x27e   : > { %v2362_v40 = vsel %vm806_vm3, %v6527_v6, %v2359_v16  ;;  %v6528_v21 = vmov %v6527_v6  ;;  %v6531_v6 = vrot.slane %v5508_v9, 7 }
 0x27f   : > { %v5886_v43 = vsel %vm685_vm4, %v1987_v10, %v1988_v5  ;;  %v5891_v32 = vsel %vm685_vm4, %v5616_v14, %v1987_v10  ;;  %v2356_v14 = vpack.c.bf16 %v5518_v44, %v5737_v31  ;;  %v2086_v44 = vrot.slane %v5508_v9, 1 }
 0x280   : > { %2209 = vrot.lane.b32.xlu1 %v6525_v11, %s3882_s21  ;;  %v6529_v11 = vrot.slane %v5571_v42, 1  ;;  %6530 = vst [vmem:[#allocation5_spill] sm:$0xff] %v5891_v32  ;;  %v5899_v60 = vsel %vm685_vm4, %v1989_v36, %v6531_v6  ;;  %v5903_v42 = vsel %vm685_vm4, %v1988_v5, %v1989_v36  ;;  %v2361_v6 = vsel %vm806_vm3, %v2359_v16, %v2360_v29  ;;  %v5916_v32 = vld [vmem:[#allocation3 + $0x120] sm:$0xff] }
 0x281   : > { %2255 = vrot.lane.b32.xlu0 %v6526_v62, %s3885_s24  ;;  %v2365_v5 = vsel %vm806_vm3, %v2360_v29, %v5338_v15  ;;  %v2084_v36 = vrot.slane %v1947_v48, 1 }
 0x282   : > { %v2363_v62 = vsel %vm806_vm3, %v6529_v11, %v6528_v21  ;;  %v2052_v21 = vpack.c.bf16 %v5899_v60, %v5903_v42  ;;  %v2083_v11 = vrot.slane %v1946_v57, 1 }
 0x283   : > { %v2367_v10 = vpack.c.bf16 %v2362_v40, %v2363_v62  ;;  %v2144_v31 = vsel %vm806_vm3, %v2084_v36, %v2085_v17  ;;  %v2773_v40 = vrot.slane %v5916_v32, 1  ;;  %v2068_v62 = vpack.c.bf16 %v5508_v9, %v1948_v7 }
 0x284   : > { %2378 = vrot.lane.b32.xlu1 %v2366_v56, %s3885_s24  ;;  %v2368_v56 = vpack.c.bf16 %v2365_v5, %v2361_v6  ;;  %v2145_v16 = vsel %vm806_vm3, %v2083_v11, %v2084_v36  ;;  %v5936_v5 = vld [vmem:[#allocation3 + $0x128] sm:$0xff]  ;;  %v5938_v36 = vld [vmem:[#allocation3 + $0x130] sm:$0xff] }
 0x285   : > { %2371 = vrot.lane.b32.xlu0 %v2355_v50, %s3882_s21  ;;  %v2067_v50 = vpack.c.bf16 %v1947_v48, %v1946_v57  ;;  %v2142_v57 = vsel %vm806_vm3, %v2086_v44, %v5338_v15  ;;  %v2143_v48 = vsel %vm806_vm3, %v2085_v17, %v2086_v44  ;;  %v2146_v15 = vsel %vm806_vm3, %v5582_v46, %v2083_v11 }
 0x286   : > { %v2148_v9 = vpack.c.bf16 %v2142_v57, %v2143_v48  ;;  %v2775_v17 = vrot.slane %v5938_v36, 1  ;;  %v2776_v44 = vrot.slane %v5591_v37, 1  ;;  %v2772_v11 = vpack.c.bf16 %v5591_v37, %v5938_v36 }
 0x287   : > { %v6533_v48 = vpack.c.bf16 %v5536_v28, %v5578_v52  ;;  %v3837_v52 = vld [vmem:[%s6368_s5 + $0x8] ss:$0 sps:$4 sm:$0xff]  }
 0x288   : > { %2373 = vrot.lane.b32.xlu1 %v2356_v14, %s3882_s21  ;;  %v2147_v14 = vpack.c.bf16 %v2144_v31, %v2145_v16  ;;  %v2781_v16 = vsel %vm806_vm3, %v2776_v44, %v5355_v30 }
 0x289   : > { %2380 = vrot.lane.b32.xlu0 %v2367_v10, %s3885_s24  ;;  %v2780_v10 = vsel %vm806_vm3, %v2360_v29, %v2773_v40  ;;  %v2162_v29 = vpack.c.bf16 %v2146_v15, %v5641_v27  ;;  %v2777_v27 = vsel %vm806_vm3, %v2775_v17, %v2776_v44 }
 0x28a   : > { %v2782_v7 = vpack.c.bf16 %v2780_v10, %v2361_v6 }
 0x28c   : > { %2382 = vrot.lane.b32.xlu1 %v2368_v56, %s3885_s24  ;;  %v2774_v56 = vrot.slane %v5936_v5, 1 }
 0x28d   : > { %2179 = vrot.lane.b32.xlu0 %v2067_v50, %s3882_s21  ;;  %v2771_v50 = vpack.c.bf16 %v5936_v5, %v5916_v32 }
 0x28e   : > { %v2778_v6 = vsel %vm806_vm3, %v2774_v56, %v2775_v17  ;;  %v2779_v46 = vsel %vm806_vm3, %v2773_v40, %v2774_v56  ;;  %v2784_v40 = vpack.c.bf16 %v2781_v16, %v2777_v27  ;;  %vm2412_vm3 = vcmask 195584  }
 0x28f   : > { %v2783_v31 = vpack.c.bf16 %v2778_v6, %v2779_v46  ;;  %v6534_v56 = vpack.c.bf16 %v5621_v51, %v5608_v22  ;;  %v6536_v22 = vpack.c.bf16 %v5647_v59, %v5657_v2 }
 0x290   : > { %2181 = vrot.lane.b32.xlu1 %v2068_v62, %s3882_s21 }
 0x291   : > { %2227 = vrot.lane.b32.xlu0 %v2147_v14, %s3885_s24  ;;  %v6532_v14 = vpack.c.bf16 %v5536_v28, %v5563_v26 }
 0x294   : > { %2229 = vrot.lane.b32.xlu1 %v2148_v9, %s3885_s24 }
 0x295   : > { %2794 = vrot.lane.b32.xlu0 %v2782_v7, %s3885_s24 }
 0x298   : > { %2257 = vrot.lane.b32.xlu1 %v2162_v29, %s3885_s24 }
 0x299   : > { %2787 = vrot.lane.b32.xlu0 %v2771_v50, %s3882_s21  ;;  %v6535_v50 = vpack.c.bf16 %v5647_v59, %v5651_v25 }
 0x29c   : > { %2789 = vrot.lane.b32.xlu1 %v2772_v11, %s3882_s21  ;;  %v2612_v11 = vsel %vm2445_vm15, %v3837_v52, 0 }
 0x29d   : > { %2796 = vrot.lane.b32.xlu0 %v2783_v31, %s3885_s24 }
 0x2a0   : > { %2798 = vrot.lane.b32.xlu1 %v2784_v40, %s3885_s24  ;;  %v6538_v40 = vpack.c.bf16 %v5696_v54, %v5700_v13  ;;  %v6539_v54 = vpack.c.bf16 %v5708_v20, %v5712_v39 }
 0x2bf   : > { %v2184_v62 = vpop.permute.xlu0 %2183 }
 0x2c0   : > { %v2267_v57 = vsel %vm1047_vm6, %v6532_v14, %v2184_v62  ;;  %v2385_v10 = vsel %vm1047_vm6, %v6533_v48, %v2184_v62 }
 0x2c2   : > { %v2232_v30 = vpop.permute.xlu1 %2231 }
 0x2c3   : > { %v2186_v9 = vpop.permute.xlu0 %2185  ;;  %v5978_v7 = vsel %vm2307_vm0, %v2267_v57, %v2232_v30  ;;  %v2392_v15 = vsel %vm2307_vm0, %v2385_v10, %v2232_v30  ;;  %v6540_v30 = vpack.c.bf16 %v5730_v53, %v5716_v3  ;;  %v6541_v3 = vpack.c.bf16 %v5746_v1, %v5735_v18 }
 0x2c4   : > { %v2270_v26 = vsel %vm1047_vm6, %v6534_v56, %v2186_v9  ;;  %3668 = vmatprep.mubr.msk.bf16.mxu1 %vm2412_vm3, %v2392_v15 }
 0x2c6   : > { %v2234_v17 = vpop.permute.xlu1 %2233 }
 0x2c7   : > { %v2188_v28 = vpop.permute.xlu0 %2187  ;;  %v5990_v29 = vsel %vm2307_vm0, %v2270_v26, %v2234_v17 }
 0x2c8   : > { %v2273_v44 = vsel %vm1047_vm6, %v6535_v50, %v2188_v28  ;;  %v2801_v51 = vsel %vm1047_vm6, %v6536_v22, %v2188_v28  ;;  %3669 = vmatmul.mubr.msk.bf16.vlgmr.msra.gmra.mrb[44].mxu1 %vm2412_vm3, %v5990_v29  ;;  %v6542_v28 = vpack.c.bf16 %v5755_v58, %v5759_v8  ;;  %v6543_v58 = vpack.c.bf16 %v5778_v34, %v5763_v61 }
 0x2c9   : > { %3701 = vmatpush3.bf16.msra.mxu1 %v5596_v47  ;;  %v6537_v47 = vpack.c.bf16 %v5672_v63, %v5683_v23 }
 0x2ca   : > { %v2190_v6 = vpop.permute.xlu1 %2189  ;;  %3779 = vmatprep.subr.msk.bf16.mxu1 %vm2445_vm15, %v3837_v52 }
 0x2cb   : > { %v2236_v46 = vpop.permute.xlu0 %2235  ;;  %v2276_v59 = vsel %vm1047_vm6, %v6537_v47, %v2190_v6  ;;  %v6544_v6 = vpack.c.bf16 %v5782_v38, %v5788_v35  ;;  %v6545_v38 = vpack.c.bf16 %v5799_v24, %v5803_v0 }
 0x2cc   : > { %v6006_v25 = vsel %vm2307_vm0, %v2273_v44, %v2236_v46  ;;  %v2808_v31 = vsel %vm2307_vm0, %v2801_v51, %v2236_v46 }
 0x2cd   : > { %3672 = vmatprep.mubr.msk.bf16.mxu1 %vm2412_vm3, %v6006_v25  ;;  %3740 = vmatprep.mubr.msk.bf16.mxu0 %vm2412_vm3, %v2808_v31 }
 0x2ce   : > { %3703 = vmatpush3.bf16.msra.mxu1 %v2612_v11  ;;  %v2238_v2 = vpop.permute.xlu1 %2237 }
 0x2cf   : > { %v2192_v27 = vpop.permute.xlu0 %2191  ;;  %v6017_v16 = vsel %vm2307_vm0, %v2276_v59, %v2238_v2  ;;  %v6546_v2 = vpack.c.bf16 %v5819_v41, %v5823_v55  ;;  %v6547_v41 = vpack.c.bf16 %v5831_v49, %v5835_v33  ;;  %v6549_v33 = vld [vmem:[#allocation8_spill] sm:$0xff] }
 0x2d0   : > { %v2279_v62 = vsel %vm1047_vm6, %v6538_v40, %v2192_v27  ;;  %3673 = vmatmul.mubr.msk.bf16.gmra.mrb[48].mxu1 %vm2412_vm3, %v6017_v16  ;;  %3741 = vmatmul.mubr.msk.bf16.vlgmr.msra.gmra.mrb[76].mxu0 %vm2412_vm3, %v6017_v16 }
 0x2d2   : > { %v2194_v14 = vpop.permute.xlu1 %2193 }
 0x2d3   : > { %v2240_v63 = vpop.permute.xlu0 %2239  ;;  %v2282_v13 = vsel %vm1047_vm6, %v6539_v54, %v2194_v14  ;;  %v6548_v54 = vpack.c.bf16 %v5839_v12, %v5846_v4 }
 0x2d4   : > { %v6028_v23 = vsel %vm2307_vm0, %v2279_v62, %v2240_v63 }
 0x2d5   : > { %3676 = vmatprep.mubr.msk.bf16.mxu1 %vm2412_vm3, %v6028_v23  ;;  %3744 = vmatprep.mubr.msk.bf16.mxu0 %vm2412_vm3, %v6028_v23 }
 0x2d6   : > { %v2242_v57 = vpop.permute.xlu1 %2241 }
 0x2d7   : > { %v2196_v48 = vpop.permute.xlu0 %2195  ;;  %v6039_v10 = vsel %vm2307_vm0, %v2282_v13, %v2242_v57 }
 0x2d8   : > { %v2285_v9 = vsel %vm1047_vm6, %v6540_v30, %v2196_v48  ;;  %3677 = vmatmul.mubr.msk.bf16.gmra.mrb[52].mxu1 %vm2412_vm3, %v6039_v10  ;;  %3745 = vmatmul.mubr.msk.bf16.gmra.mrb[80].mxu0 %vm2412_vm3, %v6039_v10  ;;  %v6550_v30 = vpack.c.bf16 %v5851_v19, %v6549_v33 }
 0x2da   : > { %v2198_v15 = vpop.permute.xlu1 %2197 }
 0x2db   : > { %v2244_v20 = vpop.permute.xlu0 %2243  ;;  %v2288_v53 = vsel %vm1047_vm6, %v6541_v3, %v2198_v15 }
 0x2dc   : > { %v6050_v39 = vsel %vm2307_vm0, %v2285_v9, %v2244_v20  ;;  %v6551_v20 = vld [vmem:[#allocation5_spill] sm:$0xff] }
 0x2dd   : > { %3680 = vmatprep.mubr.msk.bf16.mxu1 %vm2412_vm3, %v6050_v39  ;;  %3748 = vmatprep.mubr.msk.bf16.mxu0 %vm2412_vm3, %v6050_v39  ;;  %v6552_v3 = vpack.c.bf16 %v5886_v43, %v6551_v20 }
 0x2de   : > { %v2246_v56 = vpop.permute.xlu1 %2245 }
 0x2df   : > { %v2200_v26 = vpop.permute.xlu0 %2199  ;;  %v6061_v17 = vsel %vm2307_vm0, %v2288_v53, %v2246_v56  ;;  %v2759_v56 = vrot.slane %v5916_v32, 7 }
 0x2e0   : > { %v2291_v52 = vsel %vm1047_vm6, %v6542_v28, %v2200_v26  ;;  %3681 = vmatmul.mubr.msk.bf16.gmra.mrb[56].mxu1 %vm2412_vm3, %v6061_v17  ;;  %3749 = vmatmul.mubr.msk.bf16.gmra.mrb[84].mxu0 %vm2412_vm3, %v6061_v17  ;;  %v2760_v26 = vrot.slane %v5936_v5, 7 }
 0x2e2   : > { %v2202_v50 = vpop.permute.xlu1 %2201 }
 0x2e3   : > { %v2248_v18 = vpop.permute.xlu0 %2247  ;;  %v2294_v8 = vsel %vm1047_vm6, %v6543_v58, %v2202_v50  ;;  %v2765_v50 = vsel %vm685_vm4, %v2759_v56, %v2760_v26  ;;  %v2761_v58 = vrot.slane %v5938_v36, 7  ;;  %v6554_v36 = vrot.slane %v5591_v37, 7 }
 0x2e4   : > { %v6072_v1 = vsel %vm2307_vm0, %v2291_v52, %v2248_v18  ;;  %v6553_v18 = vld [vmem:[#allocation9_spill] sm:$0xff] }
 0x2e5   : > { %3684 = vmatprep.mubr.msk.bf16.mxu1 %vm2412_vm3, %v6072_v1  ;;  %3752 = vmatprep.mubr.msk.bf16.mxu0 %vm2412_vm3, %v6072_v1  ;;  %v2766_v43 = vsel %vm685_vm4, %v6553_v18, %v2759_v56  ;;  %v2763_v60 = vsel %vm685_vm4, %v2761_v58, %v6554_v36  ;;  %v2764_v42 = vsel %vm685_vm4, %v2760_v26, %v2761_v58 }
 0x2e6   : > { %v2250_v44 = vpop.permute.xlu1 %2249 }
 0x2e7   : > { %v2204_v22 = vpop.permute.xlu0 %2203  ;;  %v6083_v51 = vsel %vm2307_vm0, %v2294_v8, %v2250_v44 }
 0x2e8   : > { %v2297_v46 = vsel %vm1047_vm6, %v6544_v6, %v2204_v22  ;;  %3685 = vmatmul.mubr.msk.bf16.gmra.mrb[60].mxu1 %vm2412_vm3, %v6083_v51  ;;  %3753 = vmatmul.mubr.msk.bf16.gmra.mrb[88].mxu0 %vm2412_vm3, %v6083_v51  ;;  %v2769_v6 = vpack.c.bf16 %v2765_v50, %v2766_v43 }
 0x2ea   : > { %v2206_v11 = vpop.permute.xlu1 %2205 }
 0x2eb   : > { %v2252_v61 = vpop.permute.xlu0 %2251  ;;  %v2300_v35 = vsel %vm1047_vm6, %v6545_v38, %v2206_v11 }
 0x2ec   : > { %v6094_v34 = vsel %vm2307_vm0, %v2297_v46, %v2252_v61  ;;  %v2770_v61 = vpack.c.bf16 %v2763_v60, %v2764_v42 }
 0x2ed   : > { %3688 = vmatprep.mubr.msk.bf16.mxu1 %vm2412_vm3, %v6094_v34  ;;  %3756 = vmatprep.mubr.msk.bf16.mxu0 %vm2412_vm3, %v6094_v34 }
 0x2ee   : > { %v2254_v31 = vpop.permute.xlu1 %2253 }
 0x2ef   : > { %v2208_v47 = vpop.permute.xlu0 %2207  ;;  %v6105_v59 = vsel %vm2307_vm0, %v2300_v35, %v2254_v31 }
 0x2f0   : > { %v2303_v27 = vsel %vm1047_vm6, %v6546_v2, %v2208_v47  ;;  %3689 = vmatmul.mubr.msk.bf16.gmra.mrb[64].mxu1 %vm2412_vm3, %v6105_v59  ;;  %3757 = vmatmul.mubr.msk.bf16.gmra.mrb[92].mxu0 %vm2412_vm3, %v6105_v59 }
 0x2f2   : > { %v2210_v40 = vpop.permute.xlu1 %2209 }
 0x2f3   : > { %v2256_v24 = vpop.permute.xlu0 %2255  ;;  %v6126_v55 = vsel %vm1047_vm6, %v6547_v41, %v2210_v40 }
 0x2f4   : > { %v6116_v0 = vsel %vm2307_vm0, %v2303_v27, %v2256_v24 }
 0x2f5   : > { %3692 = vmatprep.mubr.msk.bf16.mxu1 %vm2412_vm3, %v6116_v0  ;;  %3760 = vmatprep.mubr.msk.bf16.mxu0 %vm2412_vm3, %v6116_v0 }
 0x2f6   : > { %v2379_v62 = vpop.permute.xlu1 %2378 }
 0x2f7   : > { %v2372_v14 = vpop.permute.xlu0 %2371  ;;  %v2394_v63 = vsel %vm2307_vm0, %v6126_v55, %v2379_v62 }
 0x2f8   : > { %v2388_v13 = vsel %vm1047_vm6, %v6548_v54, %v2372_v14  ;;  %3693 = vmatmul.mubr.msk.bf16.gmra.mrb[68].mxu1 %vm2412_vm3, %v2394_v63  ;;  %3761 = vmatmul.mubr.msk.bf16.gmra.mrb[96].mxu0 %vm2412_vm3, %v2394_v63 }
 0x2fa   : > { %v2374_v57 = vpop.permute.xlu1 %2373 }
 0x2fb   : > { %v2381_v48 = vpop.permute.xlu0 %2380  ;;  %v2391_v9 = vsel %vm1047_vm6, %v6550_v30, %v2374_v57 }
 0x2fc   : > { %v2396_v49 = vsel %vm2307_vm0, %v2388_v13, %v2381_v48 }
 0x2fd   : > { %3696 = vmatprep.mubr.msk.bf16.mxu1 %vm2412_vm3, %v2396_v49  ;;  %3764 = vmatprep.mubr.msk.bf16.mxu0 %vm2412_vm3, %v2396_v49 }
 0x2fe   : > { %v2383_v12 = vpop.permute.xlu1 %2382 }
 0x2ff   : > { %v2180_v4 = vpop.permute.xlu0 %2179  ;;  %v2398_v15 = vsel %vm2307_vm0, %v2391_v9, %v2383_v12 }
 0x300   : > { %v2261_v53 = vsel %vm1047_vm6, %v6552_v3, %v2180_v4  ;;  %3697 = vmatmul.mubr.msk.bf16.gmra.mrb[72].mxu1 %vm2412_vm3, %v2398_v15 }
 0x302   : > { %v2182_v28 = vpop.permute.xlu1 %2181 }
 0x303   : > { %v2228_v52 = vpop.permute.xlu0 %2227  ;;  %v2264_v32 = vsel %vm1047_vm6, %v2052_v21, %v2182_v28 }
 0x304   : > { %v2309_v19 = vsel %vm2307_vm0, %v2261_v53, %v2228_v52 }
 0x305   : > { %3704 = vmatprep.mubr.msk.bf16.mxu1 %vm2412_vm3, %v2309_v19 }
 0x306   : > { %v2230_v5 = vpop.permute.xlu1 %2229 }
 0x307   : > { %v2795_v8 = vpop.permute.xlu0 %2794  ;;  %v2311_v44 = vsel %vm2307_vm0, %v2264_v32, %v2230_v5 }
 0x308   : > { %v2810_v22 = vsel %vm2307_vm0, %v2391_v9, %v2795_v8  ;;  %3705 = vmatmul.mubr.msk.bf16.vlgmr.msra.gmra.mrb[76].mxu1 %vm2412_vm3, %v2311_v44 }
 0x309   : > { %3765 = vmatmul.mubr.msk.bf16.gmra.mrb[100].mxu0 %vm2412_vm3, %v2810_v22  ;;  %3708 = vmatprep.mubr.msk.bf16.mxu1 %vm2412_vm3, %v5978_v7 }
 0x30a   : > { %v2258_v21 = vpop.permute.xlu1 %2257 }
 0x30b   : > { %v2788_v46 = vpop.permute.xlu0 %2787 }
 0x30c   : > { %v2804_v11 = vsel %vm1047_vm6, %v2769_v6, %v2788_v46 }
 0x30e   : > { %v2790_v38 = vpop.permute.xlu1 %2789 }
 0x30f   : > { %v2797_v35 = vpop.permute.xlu0 %2796  ;;  %v2807_v37 = vsel %vm1047_vm6, %v2770_v61, %v2790_v38 }
 0x310   : > { %v2812_v31 = vsel %vm2307_vm0, %v2804_v11, %v2797_v35  ;;  %3709 = vmatmul.mubr.msk.bf16.gmra.mrb[80].mxu1 %vm2412_vm3, %v5990_v29  ;;  %v2339_v29 = vsel %vm2307_vm0, %v6126_v55, %v2258_v21 }
 0x311   : > { %3768 = vmatprep.mubr.msk.bf16.mxu0 %vm2412_vm3, %v2812_v31  ;;  %3712 = vmatprep.mubr.msk.bf16.mxu1 %vm2412_vm3, %v6006_v25 }
 0x312   : > { %v2799_v45 = vpop.permute.xlu1 %2798 }
 0x313   : > { %v2814_v7 = vsel %vm2307_vm0, %v2807_v37, %v2799_v45 }
 0x314   : > { %3769 = vmatmul.mubr.msk.bf16.gmra.mrb[104].mxu0 %vm2412_vm3, %v2814_v7 }
 0x318   : > { %3713 = vmatmul.mubr.msk.bf16.gmra.mrb[84].mxu1 %vm2412_vm3, %v6017_v16 }
 0x319   : > { %3716 = vmatprep.mubr.msk.bf16.mxu1 %vm2412_vm3, %v6028_v23 }
 0x320   : > { %3717 = vmatmul.mubr.msk.bf16.gmra.mrb[88].mxu1 %vm2412_vm3, %v6039_v10 }
 0x321   : > { %3720 = vmatprep.mubr.msk.bf16.mxu1 %vm2412_vm3, %v6050_v39 }
 0x328   : > { %3721 = vmatmul.mubr.msk.bf16.gmra.mrb[92].mxu1 %vm2412_vm3, %v6061_v17 }
 0x329   : > { %3724 = vmatprep.mubr.msk.bf16.mxu1 %vm2412_vm3, %v6072_v1 }
 0x330   : > { %3725 = vmatmul.mubr.msk.bf16.gmra.mrb[96].mxu1 %vm2412_vm3, %v6083_v51 }
 0x331   : > { %3728 = vmatprep.mubr.msk.bf16.mxu1 %vm2412_vm3, %v6094_v34 }
 0x338   : > { %3729 = vmatmul.mubr.msk.bf16.gmra.mrb[100].mxu1 %vm2412_vm3, %v6105_v59 }
 0x339   : > { %3732 = vmatprep.mubr.msk.bf16.mxu1 %vm2412_vm3, %v6116_v0 }
 0x340   : > { %3733 = vmatmul.mubr.msk.bf16.gmra.mrb[104].mxu1 %vm2412_vm3, %v2339_v29  ;;  %v6263_v29 = vld [vmem:[%s6369_s6] ss:$0 sm:$0xff] }
 0x39b   : > { %v3670_v25 = vpop.f32.mrb[44].mxu1 }
 0x39c   : > { %v2483_v16 = vpop.f32.mrb[45].mxu1 }
 0x39d   : > { %v3671_v23 = vpop.f32.mrb[46].mxu1 }
 0x39e   : > { %v6208_v10 = vpop.f32.mrb[47].mxu1 }
 0x3a3   : > { %v3674_v39 = vpop.f32.mrb[48].mxu1  ;;  %v3742_v17 = vpop.f32.mrb[76].mxu0 }
 0x3a4   : > { %v6210_v1 = vpop.f32.mrb[49].mxu1  ;;  %v2873_v51 = vpop.f32.mrb[77].mxu0 }
 0x3a5   : > { %v3675_v34 = vpop.f32.mrb[50].mxu1  ;;  %v3743_v47 = vpop.f32.mrb[78].mxu0 }
 0x3a6   : > { %v6212_v59 = vpop.f32.mrb[51].mxu1  ;;  %v2876_v2 = vpop.f32.mrb[79].mxu0 }
 0x3ab   : > { %v3678_v27 = vpop.f32.mrb[52].mxu1  ;;  %v3746_v40 = vpop.f32.mrb[80].mxu0 }
 0x3ac   : > { %v6214_v24 = vpop.f32.mrb[53].mxu1  ;;  %v6216_v0 = vpop.f32.mrb[81].mxu0 }
 0x3ad   : > { %v3679_v41 = vpop.f32.mrb[54].mxu1  ;;  %v3747_v55 = vpop.f32.mrb[82].mxu0 }
 0x3ae   : > { %v6218_v62 = vpop.f32.mrb[55].mxu1  ;;  %v6220_v14 = vpop.f32.mrb[83].mxu0 }
 0x3b3   : > { %v3682_v63 = vpop.f32.mrb[56].mxu1  ;;  %v3750_v54 = vpop.f32.mrb[84].mxu0 }
 0x3b4   : > { %v6222_v13 = vpop.f32.mrb[57].mxu1  ;;  %v6224_v57 = vpop.f32.mrb[85].mxu0 }
 0x3b5   : > { %v3683_v48 = vpop.f32.mrb[58].mxu1  ;;  %v3751_v49 = vpop.f32.mrb[86].mxu0 }
 0x3b6   : > { %v6226_v33 = vpop.f32.mrb[59].mxu1  ;;  %v6228_v30 = vpop.f32.mrb[87].mxu0 }
 0x3bb   : > { %v3686_v9 = vpop.f32.mrb[60].mxu1  ;;  %v3754_v12 = vpop.f32.mrb[88].mxu0 }
 0x3bc   : > { %v6230_v4 = vpop.f32.mrb[61].mxu1  ;;  %v6232_v15 = vpop.f32.mrb[89].mxu0 }
 0x3bd   : > { %v3687_v20 = vpop.f32.mrb[62].mxu1  ;;  %v3755_v3 = vpop.f32.mrb[90].mxu0 }
 0x3be   : > { %v6234_v53 = vpop.f32.mrb[63].mxu1  ;;  %v6236_v56 = vpop.f32.mrb[91].mxu0 }
 0x3c3   : > { %v3690_v26 = vpop.f32.mrb[64].mxu1  ;;  %v3758_v28 = vpop.f32.mrb[92].mxu0 }
 0x3c4   : > { %v6238_v52 = vpop.f32.mrb[65].mxu1  ;;  %v6240_v19 = vpop.f32.mrb[93].mxu0 }
 0x3c5   : > { %v3691_v50 = vpop.f32.mrb[66].mxu1  ;;  %v3759_v18 = vpop.f32.mrb[94].mxu0 }
 0x3c6   : > { %v6242_v43 = vpop.f32.mrb[67].mxu1  ;;  %v6244_v58 = vpop.f32.mrb[95].mxu0 }
 0x3cb   : > { %v3694_v32 = vpop.f32.mrb[68].mxu1  ;;  %v3762_v5 = vpop.f32.mrb[96].mxu0 }
 0x3cc   : > { %v6246_v8 = vpop.f32.mrb[69].mxu1  ;;  %v6248_v44 = vpop.f32.mrb[97].mxu0 }
 0x3cd   : > { %v3695_v22 = vpop.f32.mrb[70].mxu1  ;;  %v3763_v6 = vpop.f32.mrb[98].mxu0 }
 0x3ce   : > { %v6250_v36 = vpop.f32.mrb[71].mxu1  ;;  %v6252_v60 = vpop.f32.mrb[99].mxu0 }
 0x3d3   : > { %v3698_v42 = vpop.f32.mrb[72].mxu1 }
 0x3d4   : > { %v6254_v21 = vpop.f32.mrb[73].mxu1 }
 0x3d5   : > { %v3699_v46 = vpop.f32.mrb[74].mxu1 }
 0x3d6   : > { %v6256_v11 = vpop.f32.mrb[75].mxu1 }
 0x3db   : > { %v3706_v61 = vpop.f32.mrb[76].mxu1 }
 0x3dc   : > { %v3766_v38 = vpop.f32.mrb[100].mxu0  ;;  %v2648_v35 = vpop.f32.mrb[77].mxu1 }
 0x3dd   : > { %v6258_v31 = vpop.f32.mrb[101].mxu0  ;;  %v2649_v37 = vadd.f32 %v2648_v35, %v2483_v16  ;;  %v3707_v45 = vpop.f32.mrb[78].mxu1 }
 0x3de   : > { %v3767_v7 = vpop.f32.mrb[102].mxu0  ;;  %v2651_v25 = vpop.f32.mrb[79].mxu1 }
 0x3df   : > { %v6265_v23 = vpop.f32.mrb[103].mxu0  ;;  %v2984_v39 = vadd.f32 %v2873_v51, %v2649_v37  ;;  %v2652_v17 = vadd.f32 %v2651_v25, %v6208_v10 }
 0x3e1   : > { %v3006_v34 = vadd.f32 %v6263_v29, %v2984_v39  ;;  %v2985_v47 = vadd.f32 %v2876_v2, %v2652_v17 }
 0x3e3   : > { %vm3022_vm4 = vcmp.gt.f32.partialorder %v3006_v34, 0.0  ;;  %v3038_v16 = vmul.f32 0.01, %v3006_v34  ;;  %v3007_v27 = vadd.f32 %v6263_v29, %v2985_v47  ;;  %v3710_v40 = vpop.f32.mrb[80].mxu1 }
 0x3e4   : > { %v2662_v41 = vpop.f32.mrb[81].mxu1 }
 0x3e5   : > { %v3054_v55 = vsel %vm3022_vm4, %v3006_v34, %v3038_v16  ;;  %vm3023_vm1 = vcmp.gt.f32.partialorder %v3007_v27, 0.0  ;;  %v3039_v63 = vmul.f32 0.01, %v3007_v27  ;;  %v2663_v54 = vadd.f32 %v2662_v41, %v6210_v1  ;;  %v3711_v48 = vpop.f32.mrb[82].mxu1 }
 0x3e6   : > { %3070 = vst.msk [vmem:[%s4035_s12] sm:$0xff] %vm1047_vm6, %v3054_v55  ;;  %v2665_v51 = vpop.f32.mrb[83].mxu1 }
 0x3e7   : > { %v3055_v10 = vsel %vm3023_vm1, %v3007_v27, %v3039_v63  ;;  %v2986_v49 = vadd.f32 %v6216_v0, %v2663_v54  ;;  %v2666_v2 = vadd.f32 %v2665_v51, %v6212_v59  ;;  %v3770_v9 = vpop.f32.mrb[104].mxu0 }
 0x3e8   : > { %3071 = vst.msk [vmem:[%s4035_s12 + $0x8] sm:$0xff] %vm1047_vm6, %v3055_v10  ;;  %v6277_v12 = vpop.f32.mrb[105].mxu0 }
 0x3e9   : > { %v3008_v20 = vadd.f32 %v6263_v29, %v2986_v49  ;;  %v2987_v3 = vadd.f32 %v6220_v14, %v2666_v2  ;;  %v3771_v1 = vpop.f32.mrb[106].mxu0 }
 0x3ea   : > { %v6281_v26 = vpop.f32.mrb[107].mxu0 }
 0x3eb   : > { %vm3024_vm2 = vcmp.gt.f32.partialorder %v3008_v20, 0.0  ;;  %v3040_v28 = vmul.f32 0.01, %v3008_v20  ;;  %v3009_v0 = vadd.f32 %v6263_v29, %v2987_v3  ;;  %v3714_v50 = vpop.f32.mrb[84].mxu1 }
 0x3ec   : > { %v2676_v59 = vpop.f32.mrb[85].mxu1 }
 0x3ed   : > { %v3056_v18 = vsel %vm3024_vm2, %v3008_v20, %v3040_v28  ;;  %vm3025_vm5 = vcmp.gt.f32.partialorder %v3009_v0, 0.0  ;;  %v3041_v32 = vmul.f32 0.01, %v3009_v0  ;;  %v2677_v5 = vadd.f32 %v2676_v59, %v6214_v24  ;;  %v3715_v22 = vpop.f32.mrb[86].mxu1 }
 0x3ee   : > { %3072 = vst.msk [vmem:[%s4035_s12 + $0x10] sm:$0xff] %vm1047_vm6, %v3056_v18  ;;  %v2679_v6 = vpop.f32.mrb[87].mxu1 }
 0x3ef   : > { %v3057_v14 = vsel %vm3025_vm5, %v3009_v0, %v3041_v32  ;;  %v2988_v42 = vadd.f32 %v6224_v57, %v2677_v5  ;;  %v2680_v46 = vadd.f32 %v2679_v6, %v6218_v62 }
 0x3f0   : > { %3073 = vst.msk [vmem:[%s4035_s12 + $0x18] sm:$0xff] %vm1047_vm6, %v3057_v14 }
 0x3f1   : > { %v3010_v61 = vadd.f32 %v6263_v29, %v2988_v42  ;;  %v2989_v38 = vadd.f32 %v6228_v30, %v2680_v46 }
 0x3f3   : > { %vm3026_vm7 = vcmp.gt.f32.partialorder %v3010_v61, 0.0  ;;  %v3042_v35 = vmul.f32 0.01, %v3010_v61  ;;  %v3011_v24 = vadd.f32 %v6263_v29, %v2989_v38  ;;  %v3718_v37 = vpop.f32.mrb[88].mxu1 }
 0x3f4   : > { %v2690_v45 = vpop.f32.mrb[89].mxu1 }
 0x3f5   : > { %v3058_v7 = vsel %vm3026_vm7, %v3010_v61, %v3042_v35  ;;  %vm3027_vm8 = vcmp.gt.f32.partialorder %v3011_v24, 0.0  ;;  %v3043_v25 = vmul.f32 0.01, %v3011_v24  ;;  %v2691_v57 = vadd.f32 %v2690_v45, %v6222_v13  ;;  %v3719_v39 = vpop.f32.mrb[90].mxu1 }
 0x3f6   : > { %3074 = vst.msk [vmem:[%s4035_s12 + $0x20] sm:$0xff] %vm1047_vm6, %v3058_v7  ;;  %v2693_v62 = vpop.f32.mrb[91].mxu1 }
 0x3f7   : > { %v3059_v17 = vsel %vm3027_vm8, %v3011_v24, %v3043_v25  ;;  %v2990_v30 = vadd.f32 %v6232_v15, %v2691_v57  ;;  %v2694_v34 = vadd.f32 %v2693_v62, %v6226_v33 }
 0x3f8   : > { %3075 = vst.msk [vmem:[%s4035_s12 + $0x28] sm:$0xff] %vm1047_vm6, %v3059_v17 }
 0x3f9   : > { %v3012_v47 = vadd.f32 %v6263_v29, %v2990_v30  ;;  %v2991_v16 = vadd.f32 %v6236_v56, %v2694_v34 }
 0x3fb   : > { %vm3028_vm9 = vcmp.gt.f32.partialorder %v3012_v47, 0.0  ;;  %v3044_v27 = vmul.f32 0.01, %v3012_v47  ;;  %v3013_v13 = vadd.f32 %v6263_v29, %v2991_v16  ;;  %v3722_v40 = vpop.f32.mrb[92].mxu1 }
 0x3fc   : > { %v2704_v41 = vpop.f32.mrb[93].mxu1 }
 0x3fd   : > { %v3060_v55 = vsel %vm3028_vm9, %v3012_v47, %v3044_v27  ;;  %vm3029_vm10 = vcmp.gt.f32.partialorder %v3013_v13, 0.0  ;;  %v3045_v63 = vmul.f32 0.01, %v3013_v13  ;;  %v2705_v15 = vadd.f32 %v2704_v41, %v6230_v4  ;;  %v3723_v54 = vpop.f32.mrb[94].mxu1 }
 0x3fe   : > { %3076 = vst.msk [vmem:[%s4035_s12 + $0x30] sm:$0xff] %vm1047_vm6, %v3060_v55  ;;  %v2707_v33 = vpop.f32.mrb[95].mxu1 }
 0x3ff   : > { %v3061_v48 = vsel %vm3029_vm10, %v3013_v13, %v3045_v63  ;;  %v2992_v56 = vadd.f32 %v6240_v19, %v2705_v15  ;;  %v2708_v51 = vadd.f32 %v2707_v33, %v6234_v53 }
 0x400   : > { %3077 = vst.msk [vmem:[%s4035_s12 + $0x38] sm:$0xff] %vm1047_vm6, %v3061_v48 }
 0x401   : > { %v3014_v10 = vadd.f32 %v6263_v29, %v2992_v56  ;;  %v2993_v49 = vadd.f32 %v6244_v58, %v2708_v51 }
 0x403   : > { %vm3030_vm11 = vcmp.gt.f32.partialorder %v3014_v10, 0.0  ;;  %v3046_v2 = vmul.f32 0.01, %v3014_v10  ;;  %v3015_v4 = vadd.f32 %v6263_v29, %v2993_v49  ;;  %v3726_v9 = vpop.f32.mrb[96].mxu1 }
 0x404   : > { %v2718_v20 = vpop.f32.mrb[97].mxu1 }
 0x405   : > { %v3062_v3 = vsel %vm3030_vm11, %v3014_v10, %v3046_v2  ;;  %vm3031_vm12 = vcmp.gt.f32.partialorder %v3015_v4, 0.0  ;;  %v3047_v1 = vmul.f32 0.01, %v3015_v4  ;;  %v2719_v19 = vadd.f32 %v2718_v20, %v6238_v52  ;;  %v3727_v28 = vpop.f32.mrb[98].mxu1 }
 0x406   : > { %3078 = vst.msk [vmem:[%s4035_s12 + $0x40] sm:$0xff] %vm1047_vm6, %v3062_v3  ;;  %v2721_v53 = vpop.f32.mrb[99].mxu1 }
 0x407   : > { %v3063_v0 = vsel %vm3031_vm12, %v3015_v4, %v3047_v1  ;;  %v2994_v58 = vadd.f32 %v6248_v44, %v2719_v19  ;;  %v2722_v50 = vadd.f32 %v2721_v53, %v6242_v43 }
 0x408   : > { %3079 = vst.msk [vmem:[%s4035_s12 + $0x48] sm:$0xff] %vm1047_vm6, %v3063_v0 }
 0x409   : > { %v3016_v59 = vadd.f32 %v6263_v29, %v2994_v58  ;;  %v2995_v18 = vadd.f32 %v6252_v60, %v2722_v50 }
 0x40b   : > { %vm3032_vm13 = vcmp.gt.f32.partialorder %v3016_v59, 0.0  ;;  %v3048_v32 = vmul.f32 0.01, %v3016_v59  ;;  %v3017_v52 = vadd.f32 %v6263_v29, %v2995_v18  ;;  %v3730_v5 = vpop.f32.mrb[100].mxu1 }
 0x40c   : > { %v2732_v22 = vpop.f32.mrb[101].mxu1 }
 0x40d   : > { %v3064_v6 = vsel %vm3032_vm13, %v3016_v59, %v3048_v32  ;;  %vm3033_vm14 = vcmp.gt.f32.partialorder %v3017_v52, 0.0  ;;  %v3049_v14 = vmul.f32 0.01, %v3017_v52  ;;  %v2733_v44 = vadd.f32 %v2732_v22, %v6246_v8  ;;  %v3731_v42 = vpop.f32.mrb[102].mxu1 }
 0x40e   : > { %3080 = vst.msk [vmem:[%s4035_s12 + $0x50] sm:$0xff] %vm1047_vm6, %v3064_v6  ;;  %v2735_v43 = vpop.f32.mrb[103].mxu1 }
 0x40f   : > { %v3065_v46 = vsel %vm3033_vm14, %v3017_v52, %v3049_v14  ;;  %v2996_v60 = vadd.f32 %v6258_v31, %v2733_v44  ;;  %v2736_v61 = vadd.f32 %v2735_v43, %v6250_v36 }
 0x410   : > { %3081 = vst.msk [vmem:[%s4035_s12 + $0x58] sm:$0xff] %vm1047_vm6, %v3065_v46 }
 0x411   : > { %v3018_v38 = vadd.f32 %v6263_v29, %v2996_v60  ;;  %v2997_v35 = vadd.f32 %v6265_v23, %v2736_v61 }
 0x413   : > { %vm3034_vm15 = vcmp.gt.f32.partialorder %v3018_v38, 0.0  ;;  %v3050_v24 = vmul.f32 0.01, %v3018_v38  ;;  %v3019_v8 = vadd.f32 %v6263_v29, %v2997_v35  ;;  %v3734_v37 = vpop.f32.mrb[104].mxu1 }
 0x414   : > { %v2746_v45 = vpop.f32.mrb[105].mxu1 }
 0x415   : > { %v3066_v7 = vsel %vm3034_vm15, %v3018_v38, %v3050_v24  ;;  %vm3035_vm0 = vcmp.gt.f32.partialorder %v3019_v8, 0.0  ;;  %v3051_v25 = vmul.f32 0.01, %v3019_v8  ;;  %v2747_v31 = vadd.f32 %v2746_v45, %v6254_v21  ;;  %v3735_v36 = vpop.f32.mrb[106].mxu1 }
 0x416   : > { %3082 = vst.msk [vmem:[%s4035_s12 + $0x60] sm:$0xff] %vm1047_vm6, %v3066_v7  ;;  %v2749_v57 = vpop.f32.mrb[107].mxu1 }
 0x417   : > { %v3067_v39 = vsel %vm3035_vm0, %v3019_v8, %v3051_v25  ;;  %v2998_v23 = vadd.f32 %v6277_v12, %v2747_v31  ;;  %v2750_v62 = vadd.f32 %v2749_v57, %v6256_v11 }
 0x418   : > { %3083 = vst.msk [vmem:[%s4035_s12 + $0x68] sm:$0xff] %vm1047_vm6, %v3067_v39 }
 0x419   : > { %v3020_v17 = vadd.f32 %v6263_v29, %v2998_v23  ;;  %v2999_v30 = vadd.f32 %v6281_v26, %v2750_v62 }
 0x41b   : > { %vm3036_vm3 = vcmp.gt.f32.partialorder %v3020_v17, 0.0  ;;  %v3052_v34 = vmul.f32 0.01, %v3020_v17  ;;  %v3021_v21 = vadd.f32 %v6263_v29, %v2999_v30 }
 0x41d   : > { %v3068_v47 = vsel %vm3036_vm3, %v3020_v17, %v3052_v34  ;;  %vm3037_vm4 = vcmp.gt.f32.partialorder %v3021_v21, 0.0  ;;  %v3053_v16 = vmul.f32 0.01, %v3021_v21 }
 0x41e   : > { %3084 = vst.msk [vmem:[%s4035_s12 + $0x70] sm:$0xff] %vm1047_vm6, %v3068_v47 }
 0x41f   : > { %v3069_v27 = vsel %vm3037_vm4, %v3021_v21, %v3053_v16 }
 0x420   : > { %3085 = vst.msk [vmem:[%s4035_s12 + $0x78] sm:$0xff] %vm1047_vm6, %v3069_v27 }
 0x421 PF: > { %s17_s28 = sadd.s32 1, %s3876_s28   ;;  %s6555_s24 = smov %s3868_s26 }
 0x422   : > { %p14_p2 = scmp.ge.s32.totalorder %s17_s28, 6   ;;  %s6556_s25 = smov %s3872_s27 }
 0x423   : > { %s6557_s26 = smov %s6560_s29  ;;  %s6558_s27 = smov %s6564_s30 }
 0x424   :  { %16 = sbr.rel (!%p14_p2) target bundleno = 3 (0x3), region = 116 }

</bundles_post_ra>
